<compile_context>
chip_gen: v6e
topology: v6e:2x2x1
jax: 0.10.0
libtpu: 0.0.40
codegen_flags: <defaults>
</compile_context>

<pallas_src>
import math

import jax
import jax.numpy as jnp
from jax.experimental import pallas as pl
from jax.experimental.pallas import tpu as pltpu


def _layernorm(x, g, b, eps=1e-5):
    # PyTorch nn.LayerNorm semantics: biased variance, eps inside rsqrt.
    mu = jnp.mean(x, axis=-1, keepdims=True)
    xc = x - mu
    var = jnp.mean(xc * xc, axis=-1, keepdims=True)
    return xc * jax.lax.rsqrt(var + eps) * g + b


def _make_fused_kernel(Bt, S, head1, head2):
    do1, do2 = 256, 64
    dk1, dk2 = do1 // head1, do2 // head2
    R = Bt * S
    bf = jnp.bfloat16
    f32 = jnp.float32

    def heads_to_ctx(Q, K, V, n_heads, dk, ctx_ref):
        # Q/K/V: (R, n_heads*dk) f32.  Attention is computed per batch element
        # (Bt is the einsum batch axis), so flattened rows never attend across
        # batch boundaries.  Scale 1/sqrt(dk) is already folded into wq.
        Qb = Q.astype(bf).reshape(Bt, S, n_heads * dk)
        Kb = K.astype(bf).reshape(Bt, S, n_heads * dk)
        Vb = V.astype(bf).reshape(Bt, S, n_heads * dk)
        for h in range(n_heads):                              # static, unrolled
            sl = slice(h * dk, (h + 1) * dk)
            s = jnp.einsum('bqd,bkd->bqk', Qb[:, :, sl], Kb[:, :, sl],
                           preferred_element_type=f32)        # (Bt, S, S)
            s = s - jnp.max(s, axis=-1, keepdims=True)
            p = jnp.exp(s)
            p = p * pl.reciprocal(jnp.sum(p, axis=-1, keepdims=True),
                                  approx=True)
            ctx = jnp.einsum('bqk,bkd->bqd', p.astype(bf), Vb[:, :, sl],
                             preferred_element_type=f32)      # (Bt, S, dk)
            # Each head's context lands at its lane offset so the output
            # projection below is a single K=do matmul (full MXU contraction)
            # instead of n_heads K=dk matmuls + VPU adds.
            ctx_ref[:, :, sl] = ctx.astype(bf)

    def kernel(x_ref,
               wq1, wk1, wvg1, wo1, w11, w12, wgo1,
               wqk2, wv2, wo2, w21, w22, small,
               out_ref, ctx1_ref, ctx2_ref):
        sm = small[...]
        g1a, b1a = sm[0:1, :], sm[1:2, :]          # layer1 attention LN
        g1b, b1b = sm[2:3, :], sm[3:4, :]          # layer1 FFN LN
        bg1 = sm[4:5, :]                           # layer1 forget-gate bias
        g2a, b2a = sm[5:6, :do2], sm[6:7, :do2]    # layer2 attention LN

        # Flatten (Bt, S) into the matmul M dimension for all heavy matmuls.
        xb = x_ref[...].reshape(R, 1024).astype(bf)

        # ---- layer1: BasicStageAttention(1024 -> 256, LN=True) -------------
        q1 = jnp.dot(xb[:, :512], wq1[...], preferred_element_type=f32)  # (R,256)
        k1 = jnp.dot(xb[:, 512:], wk1[...], preferred_element_type=f32)  # (R,256)
        # V projection and forget-gate x-term share the full-x operand -> one
        # merged (1024, 512) matmul.
        vg1 = jnp.dot(xb, wvg1[...], preferred_element_type=f32)         # (R,512)
        v1, gate_x1 = vg1[:, :do1], vg1[:, do1:]

        heads_to_ctx(q1, k1, v1, head1, dk1, ctx1_ref)
        attn1 = jnp.dot(ctx1_ref[...].reshape(R, do1), wo1[...],
                        preferred_element_type=f32)                      # (R,256)
        y1 = _layernorm(attn1 + v1, g1a, b1a)             # residual='V' + LN
        h1 = jnp.maximum(jnp.dot(y1.astype(bf), w11[...],
                                 preferred_element_type=f32), 0.0)
        out1 = _layernorm(y1 + jnp.dot(h1.astype(bf), w12[...],
                                       preferred_element_type=f32),
                          g1b, b1b)                                      # (R,256)
        out1_b = out1.astype(bf)

        # forget gate 1: Linear(cat(out1, x)) split into two matmuls; the
        # x-term (gate_x1) was computed inside the merged vg1 matmul above.
        gate1 = (jnp.dot(out1_b, wgo1[...], preferred_element_type=f32)
                 + gate_x1 + bg1)
        forget1 = out1 * jax.nn.sigmoid(gate1)                           # (R,256)

        # ---- layer2: BasicSemAttention(256 -> 64, LN=False) ----------------
        # q_in == k_in == out1 -> Q and K projections merged into one
        # lane-dense (256, 128) matmul.
        qk2 = jnp.dot(out1_b, wqk2[...], preferred_element_type=f32)     # (R,128)
        q2, k2 = qk2[:, :do2], qk2[:, do2:]
        v2 = jnp.dot(forget1.astype(bf), wv2[...],
                     preferred_element_type=f32)                         # (R,64)

        heads_to_ctx(q2, k2, v2, head2, dk2, ctx2_ref)
        attn2 = jnp.dot(ctx2_ref[...].reshape(R, do2), wo2[...],
                        preferred_element_type=f32)                      # (R,64)
        y2 = _layernorm(attn2 + v2, g2a, b2a)
        h2 = jnp.maximum(jnp.dot(y2.astype(bf), w21[...],
                                 preferred_element_type=f32), 0.0)
        out2 = y2 + jnp.dot(h2.astype(bf), w22[...],
                            preferred_element_type=f32)                  # (R,64)
        # layer2's forget-gate output is discarded by SemAttentionLN -> skipped.

        # One contiguous (Bt, S, 64) slab store.
        out_ref[...] = out2.reshape(Bt, S, do2).astype(out_ref.dtype)

    return kernel


def _pick_batch_tile(B, S, target_rows):
    """Largest divisor Bt of B with Bt*S <= target_rows; prefer grid >= 2 steps."""
    best = 1
    for bt in range(1, B + 1):
        if B % bt == 0 and bt * S <= target_rows:
            best = bt
    if best == B and B > 1:
        # Keep >= 2 grid steps so dimension_semantics=("parallel",) can split
        # the work across both TensorCores on v7x.
        for bt in range(best - 1, 0, -1):
            if B % bt == 0:
                best = bt
                break
    return best


def sem_attention_ln(inputs, p1, p2, head1, head2, *, target_rows=256):
    """SemAttentionLN.forward: inputs (B, S, 1024) -> (B, S, 64)."""
    B, S, Din = inputs.shape
    assert Din == 1024
    do1, do2 = 256, 64
    assert do1 % head1 == 0 and do2 % head2 == 0
    dk1, dk2 = do1 // head1, do2 // head2
    bf = jnp.bfloat16

    Bt = _pick_batch_tile(B, S, target_rows)
    grid = (B // Bt,)

    # One-time weight prep: fold 1/sqrt(d_k) into wq, merge projections that
    # share an input operand, and cast all MXU operands to bf16.
    wq1 = (p1["wq"] * (1.0 / math.sqrt(dk1))).astype(bf)                # (512,256)
    wk1 = p1["wk"].astype(bf)                                           # (512,256)
    wvg1 = jnp.concatenate([p1["wv"], p1["wg_f"]], axis=1).astype(bf)   # (1024,512)
    wo1 = p1["wo"].astype(bf)                                           # (256,256)
    w11 = p1["w1"].astype(bf)
    w12 = p1["w2"].astype(bf)
    wgo1 = p1["wg_out"].astype(bf)                                      # (256,256)
    wqk2 = jnp.concatenate([p2["wq"] * (1.0 / math.sqrt(dk2)),
                            p2["wk"]], axis=1).astype(bf)               # (256,128)
    wv2 = p2["wv"].astype(bf)                                           # (256,64)
    wo2 = p2["wo"].astype(bf)                                           # (64,64)
    w21 = p2["w1"].astype(bf)
    w22 = p2["w2"].astype(bf)

    # All tiny (1, N) parameters packed into a single (7, 256) array -> one DMA.
    def pad_to_256(v):
        return jnp.pad(v, ((0, 0), (0, 256 - v.shape[1])))
    small = jnp.concatenate(
        [p1["g1"], p1["b1"], p1["g2"], p1["b2"], p1["bg"],
         pad_to_256(p2["g1"]), pad_to_256(p2["b1"])], axis=0
    ).astype(jnp.float32)                                               # (7,256)

    weights = [wq1, wk1, wvg1, wo1, w11, w12, wgo1,
               wqk2, wv2, wo2, w21, w22, small]

    def full_spec(a):  # whole-array block, resident across the grid
        nd = a.ndim
        return pl.BlockSpec(a.shape, lambda b, _nd=nd: (0,) * _nd)

    in_specs = ([pl.BlockSpec((Bt, S, Din), lambda b: (b, 0, 0))]
                + [full_spec(a) for a in weights])
    out_specs = pl.BlockSpec((Bt, S, do2), lambda b: (b, 0, 0))
    out_shape = jax.ShapeDtypeStruct((B, S, do2), inputs.dtype)

    kernel = _make_fused_kernel(Bt, S, head1, head2)
    return pl.pallas_call(
        kernel,
        out_shape=out_shape,
        grid=grid,
        in_specs=in_specs,
        out_specs=out_specs,
        scratch_shapes=[pltpu.VMEM((Bt, S, do1), bf),   # per-head ctx, layer1
                        pltpu.VMEM((Bt, S, do2), bf)],  # per-head ctx, layer2
        compiler_params=pltpu.CompilerParams(
            dimension_semantics=("parallel",),          # 2 TCs on v7x
            vmem_limit_bytes=32 * 1024 * 1024),
    )(inputs, *weights)


def init_layer_params(key, dq, dv, do, d_ff_mult, dtype=jnp.float32):
    d_ff = do * d_ff_mult
    ks = jax.random.split(key, 9)

    def lin(k, fan_in, fan_out):
        return jax.random.normal(k, (fan_in, fan_out), dtype) / math.sqrt(fan_in)

    return dict(
        wq=lin(ks[0], dq, do),
        wk=lin(ks[1], dq, do),
        wv=lin(ks[2], dv, do),
        wo=lin(ks[3], do, do),
        g1=jnp.ones((1, do), dtype), b1=jnp.zeros((1, do), dtype),
        w1=lin(ks[4], do, d_ff),
        w2=lin(ks[5], d_ff, do),
        g2=jnp.ones((1, do), dtype), b2=jnp.zeros((1, do), dtype),
        # forgetgate Linear(do + dv, do), row-split: [outputs rows | forget rows]
        wg_out=jax.random.normal(ks[6], (do, do), dtype) / math.sqrt(do + dv),
        wg_f=jax.random.normal(ks[7], (dv, do), dtype) / math.sqrt(do + dv),
        bg=jax.random.normal(ks[8], (1, do), dtype) * 0.01,
    )


if __name__ == "__main__":
    key = jax.random.PRNGKey(0)
    kx, kl1, kl2 = jax.random.split(key, 3)

    # args: head1=4, head2=2, t_dff=2 (d_ff treated as hidden-size multiplier)
    head1, head2, t_dff = 4, 2, 2
    B, S = 4, 8
    x = jax.random.normal(kx, (B, S, 1024), jnp.float32)

    p1 = init_layer_params(kl1, dq=512, dv=1024, do=256, d_ff_mult=t_dff)
    p2 = init_layer_params(kl2, dq=256, dv=256, do=64, d_ff_mult=t_dff)

    out = sem_attention_ln(x, p1, p2, head1, head2)
    out = jax.block_until_ready(out)

    assert out.shape == (B, S, 64), out.shape
    assert out.dtype == jnp.float32
    assert bool(jnp.isfinite(out).all())
    print("KERNEL_OK")
</pallas_src>

<mosaic_0001>
module attributes {stable_mosaic.version = 11 : i64} {
  func.func @kernel(%arg0: i32, %arg1: memref<2x8x1024xf32, #tpu.memory_space<vmem>>, %arg2: memref<512x256xbf16, #tpu.memory_space<vmem>>, %arg3: memref<512x256xbf16, #tpu.memory_space<vmem>>, %arg4: memref<1024x512xbf16, #tpu.memory_space<vmem>>, %arg5: memref<256x256xbf16, #tpu.memory_space<vmem>>, %arg6: memref<256x512xbf16, #tpu.memory_space<vmem>>, %arg7: memref<512x256xbf16, #tpu.memory_space<vmem>>, %arg8: memref<256x256xbf16, #tpu.memory_space<vmem>>, %arg9: memref<256x128xbf16, #tpu.memory_space<vmem>>, %arg10: memref<256x64xbf16, #tpu.memory_space<vmem>>, %arg11: memref<64x64xbf16, #tpu.memory_space<vmem>>, %arg12: memref<64x128xbf16, #tpu.memory_space<vmem>>, %arg13: memref<128x64xbf16, #tpu.memory_space<vmem>>, %arg14: memref<7x256xf32, #tpu.memory_space<vmem>>, %arg15: memref<2x8x64xf32, #tpu.memory_space<vmem>>, %arg16: memref<2x8x256xbf16, #tpu.memory_space<vmem>>, %arg17: memref<2x8x64xbf16, #tpu.memory_space<vmem>>) attributes {dimension_semantics = [#tpu.dimension_semantics<parallel>], iteration_bounds = array<i64: 2>, scalar_prefetch = 0 : i64, scratch_operands = 2 : i64, tpu.core_type = #tpu.core_type<tc>, window_params = [{transform_indices = @transform_0, window_bounds = array<i64: 2, 8, 1024>}, {pipeline_mode = #tpu.pipeline_mode<synchronous>, transform_indices = @transform_1, window_bounds = array<i64: 512, 256>}, {pipeline_mode = #tpu.pipeline_mode<synchronous>, transform_indices = @transform_2, window_bounds = array<i64: 512, 256>}, {pipeline_mode = #tpu.pipeline_mode<synchronous>, transform_indices = @transform_3, window_bounds = array<i64: 1024, 512>}, {pipeline_mode = #tpu.pipeline_mode<synchronous>, transform_indices = @transform_4, window_bounds = array<i64: 256, 256>}, {pipeline_mode = #tpu.pipeline_mode<synchronous>, transform_indices = @transform_5, window_bounds = array<i64: 256, 512>}, {pipeline_mode = #tpu.pipeline_mode<synchronous>, transform_indices = @transform_6, window_bounds = array<i64: 512, 256>}, {pipeline_mode = #tpu.pipeline_mode<synchronous>, transform_indices = @transform_7, window_bounds = array<i64: 256, 256>}, {pipeline_mode = #tpu.pipeline_mode<synchronous>, transform_indices = @transform_8, window_bounds = array<i64: 256, 128>}, {pipeline_mode = #tpu.pipeline_mode<synchronous>, transform_indices = @transform_9, window_bounds = array<i64: 256, 64>}, {pipeline_mode = #tpu.pipeline_mode<synchronous>, transform_indices = @transform_10, window_bounds = array<i64: 64, 64>}, {pipeline_mode = #tpu.pipeline_mode<synchronous>, transform_indices = @transform_11, window_bounds = array<i64: 64, 128>}, {pipeline_mode = #tpu.pipeline_mode<synchronous>, transform_indices = @transform_12, window_bounds = array<i64: 128, 64>}, {pipeline_mode = #tpu.pipeline_mode<synchronous>, transform_indices = @transform_13, window_bounds = array<i64: 7, 256>}, {transform_indices = @transform_14, window_bounds = array<i64: 2, 8, 64>}]} {
    %c0 = arith.constant 0 : index
    %c0_0 = arith.constant 0 : index
    %0 = vector.load %arg14[%c0, %c0_0] : memref<7x256xf32, #tpu.memory_space<vmem>>, vector<7x256xf32>
    %1 = vector.extract_strided_slice %0 {offsets = [0, 0], sizes = [1, 256], strides = [1, 1]} : vector<7x256xf32> to vector<1x256xf32>
    %2 = vector.extract_strided_slice %0 {offsets = [1, 0], sizes = [1, 256], strides = [1, 1]} : vector<7x256xf32> to vector<1x256xf32>
    %3 = vector.extract_strided_slice %0 {offsets = [2, 0], sizes = [1, 256], strides = [1, 1]} : vector<7x256xf32> to vector<1x256xf32>
    %4 = vector.extract_strided_slice %0 {offsets = [3, 0], sizes = [1, 256], strides = [1, 1]} : vector<7x256xf32> to vector<1x256xf32>
    %5 = vector.extract_strided_slice %0 {offsets = [4, 0], sizes = [1, 256], strides = [1, 1]} : vector<7x256xf32> to vector<1x256xf32>
    %6 = vector.extract_strided_slice %0 {offsets = [5, 0], sizes = [1, 64], strides = [1, 1]} : vector<7x256xf32> to vector<1x64xf32>
    %7 = vector.extract_strided_slice %0 {offsets = [6, 0], sizes = [1, 64], strides = [1, 1]} : vector<7x256xf32> to vector<1x64xf32>
    %c0_1 = arith.constant 0 : index
    %c0_2 = arith.constant 0 : index
    %c0_3 = arith.constant 0 : index
    %8 = vector.load %arg1[%c0_1, %c0_2, %c0_3] : memref<2x8x1024xf32, #tpu.memory_space<vmem>>, vector<2x8x1024xf32>
    %9 = vector.shape_cast %8 : vector<2x8x1024xf32> to vector<16x1024xf32>
    %10 = arith.truncf %9 : vector<16x1024xf32> to vector<16x1024xbf16>
    %11 = vector.extract_strided_slice %10 {offsets = [0, 0], sizes = [16, 512], strides = [1, 1]} : vector<16x1024xbf16> to vector<16x512xbf16>
    %c0_4 = arith.constant 0 : index
    %c0_5 = arith.constant 0 : index
    %12 = vector.load %arg2[%c0_4, %c0_5] : memref<512x256xbf16, #tpu.memory_space<vmem>>, vector<512x256xbf16>
    %cst = arith.constant dense<0.000000e+00> : vector<16x256xf32>
    %13 = tpu.matmul %11, %12, %cst {dimension_numbers = #tpu.dot_dimension_numbers<[1], [0], [0], [1], [0, 0, 1, 1], [], []>} : vector<16x512xbf16>, vector<512x256xbf16>, vector<16x256xf32> -> vector<16x256xf32>
    %14 = vector.extract_strided_slice %10 {offsets = [0, 512], sizes = [16, 512], strides = [1, 1]} : vector<16x1024xbf16> to vector<16x512xbf16>
    %c0_6 = arith.constant 0 : index
    %c0_7 = arith.constant 0 : index
    %15 = vector.load %arg3[%c0_6, %c0_7] : memref<512x256xbf16, #tpu.memory_space<vmem>>, vector<512x256xbf16>
    %cst_8 = arith.constant dense<0.000000e+00> : vector<16x256xf32>
    %16 = tpu.matmul %14, %15, %cst_8 {dimension_numbers = #tpu.dot_dimension_numbers<[1], [0], [0], [1], [0, 0, 1, 1], [], []>} : vector<16x512xbf16>, vector<512x256xbf16>, vector<16x256xf32> -> vector<16x256xf32>
    %c0_9 = arith.constant 0 : index
    %c0_10 = arith.constant 0 : index
    %17 = vector.load %arg4[%c0_9, %c0_10] : memref<1024x512xbf16, #tpu.memory_space<vmem>>, vector<1024x512xbf16>
    %cst_11 = arith.constant dense<0.000000e+00> : vector<16x512xf32>
    %18 = tpu.matmul %10, %17, %cst_11 {dimension_numbers = #tpu.dot_dimension_numbers<[1], [0], [0], [1], [0, 0, 1, 1], [], []>} : vector<16x1024xbf16>, vector<1024x512xbf16>, vector<16x512xf32> -> vector<16x512xf32>
    %19 = vector.extract_strided_slice %18 {offsets = [0, 0], sizes = [16, 256], strides = [1, 1]} : vector<16x512xf32> to vector<16x256xf32>
    %20 = vector.extract_strided_slice %18 {offsets = [0, 256], sizes = [16, 256], strides = [1, 1]} : vector<16x512xf32> to vector<16x256xf32>
    %21 = arith.truncf %13 : vector<16x256xf32> to vector<16x256xbf16>
    %22 = vector.shape_cast %21 : vector<16x256xbf16> to vector<2x8x256xbf16>
    %23 = arith.truncf %16 : vector<16x256xf32> to vector<16x256xbf16>
    %24 = vector.shape_cast %23 : vector<16x256xbf16> to vector<2x8x256xbf16>
    %25 = arith.truncf %19 : vector<16x256xf32> to vector<16x256xbf16>
    %26 = vector.shape_cast %25 : vector<16x256xbf16> to vector<2x8x256xbf16>
    %27 = vector.extract_strided_slice %22 {offsets = [0, 0, 0], sizes = [2, 8, 64], strides = [1, 1, 1]} : vector<2x8x256xbf16> to vector<2x8x64xbf16>
    %28 = vector.extract_strided_slice %24 {offsets = [0, 0, 0], sizes = [2, 8, 64], strides = [1, 1, 1]} : vector<2x8x256xbf16> to vector<2x8x64xbf16>
    "tpu.trace_start"() <{level = 10 : i32, message = "bqd,bkd->bqk"}> : () -> ()
    %cst_12 = arith.constant dense<0.000000e+00> : vector<2x8x8xf32>
    %29 = tpu.matmul %27, %28, %cst_12 {dimension_numbers = #tpu.dot_dimension_numbers<[2], [2], [1], [1], [0, 0, 0, 1, 1, 1], [0], [0]>} : vector<2x8x64xbf16>, vector<2x8x64xbf16>, vector<2x8x8xf32> -> vector<2x8x8xf32>
    "tpu.trace_stop"() : () -> ()
    %cst_13 = arith.constant dense<0xFF800000> : vector<2x8xf32>
    %30 = vector.multi_reduction <maximumf>, %29, %cst_13 [2] : vector<2x8x8xf32> to vector<2x8xf32>
    %31 = vector.shape_cast %30 : vector<2x8xf32> to vector<2x8x1xf32>
    %32 = vector.broadcast %31 : vector<2x8x1xf32> to vector<2x8x8xf32>
    %33 = arith.subf %29, %32 : vector<2x8x8xf32>
    %34 = math.exp %33 : vector<2x8x8xf32>
    %cst_14 = arith.constant dense<0.000000e+00> : vector<2x8xf32>
    %35 = vector.multi_reduction <add>, %34, %cst_14 [2] : vector<2x8x8xf32> to vector<2x8xf32>
    %36 = vector.shape_cast %35 : vector<2x8xf32> to vector<2x8x1xf32>
    %37 = tpu.reciprocal %36 {approx = true} : vector<2x8x1xf32> -> vector<2x8x1xf32>
    %38 = vector.broadcast %37 : vector<2x8x1xf32> to vector<2x8x8xf32>
    %39 = arith.mulf %34, %38 : vector<2x8x8xf32>
    %40 = arith.truncf %39 : vector<2x8x8xf32> to vector<2x8x8xbf16>
    %41 = vector.extract_strided_slice %26 {offsets = [0, 0, 0], sizes = [2, 8, 64], strides = [1, 1, 1]} : vector<2x8x256xbf16> to vector<2x8x64xbf16>
    "tpu.trace_start"() <{level = 10 : i32, message = "bqk,bkd->bqd"}> : () -> ()
    %cst_15 = arith.constant dense<0.000000e+00> : vector<2x8x64xf32>
    %42 = tpu.matmul %40, %41, %cst_15 {dimension_numbers = #tpu.dot_dimension_numbers<[2], [1], [1], [2], [0, 0, 0, 1, 1, 2], [0], [0]>} : vector<2x8x8xbf16>, vector<2x8x64xbf16>, vector<2x8x64xf32> -> vector<2x8x64xf32>
    "tpu.trace_stop"() : () -> ()
    %43 = arith.truncf %42 : vector<2x8x64xf32> to vector<2x8x64xbf16>
    %c0_16 = arith.constant 0 : index
    %c0_17 = arith.constant 0 : index
    %c0_18 = arith.constant 0 : index
    %44 = vector.load %arg16[%c0_16, %c0_17, %c0_18] : memref<2x8x256xbf16, #tpu.memory_space<vmem>>, vector<2x8x64xbf16>
    tpu.vector_store %arg16[%c0_16, %c0_17, %c0_18], %43 {strides = array<i32>} : memref<2x8x256xbf16, #tpu.memory_space<vmem>>, vector<2x8x64xbf16>,
    %45 = vector.extract_strided_slice %22 {offsets = [0, 0, 64], sizes = [2, 8, 64], strides = [1, 1, 1]} : vector<2x8x256xbf16> to vector<2x8x64xbf16>
    %46 = vector.extract_strided_slice %24 {offsets = [0, 0, 64], sizes = [2, 8, 64], strides = [1, 1, 1]} : vector<2x8x256xbf16> to vector<2x8x64xbf16>
    "tpu.trace_start"() <{level = 10 : i32, message = "bqd,bkd->bqk"}> : () -> ()
    %cst_19 = arith.constant dense<0.000000e+00> : vector<2x8x8xf32>
    %47 = tpu.matmul %45, %46, %cst_19 {dimension_numbers = #tpu.dot_dimension_numbers<[2], [2], [1], [1], [0, 0, 0, 1, 1, 1], [0], [0]>} : vector<2x8x64xbf16>, vector<2x8x64xbf16>, vector<2x8x8xf32> -> vector<2x8x8xf32>
    "tpu.trace_stop"() : () -> ()
    %cst_20 = arith.constant dense<0xFF800000> : vector<2x8xf32>
    %48 = vector.multi_reduction <maximumf>, %47, %cst_20 [2] : vector<2x8x8xf32> to vector<2x8xf32>
    %49 = vector.shape_cast %48 : vector<2x8xf32> to vector<2x8x1xf32>
    %50 = vector.broadcast %49 : vector<2x8x1xf32> to vector<2x8x8xf32>
    %51 = arith.subf %47, %50 : vector<2x8x8xf32>
    %52 = math.exp %51 : vector<2x8x8xf32>
    %cst_21 = arith.constant dense<0.000000e+00> : vector<2x8xf32>
    %53 = vector.multi_reduction <add>, %52, %cst_21 [2] : vector<2x8x8xf32> to vector<2x8xf32>
    %54 = vector.shape_cast %53 : vector<2x8xf32> to vector<2x8x1xf32>
    %55 = tpu.reciprocal %54 {approx = true} : vector<2x8x1xf32> -> vector<2x8x1xf32>
    %56 = vector.broadcast %55 : vector<2x8x1xf32> to vector<2x8x8xf32>
    %57 = arith.mulf %52, %56 : vector<2x8x8xf32>
    %58 = arith.truncf %57 : vector<2x8x8xf32> to vector<2x8x8xbf16>
    %59 = vector.extract_strided_slice %26 {offsets = [0, 0, 64], sizes = [2, 8, 64], strides = [1, 1, 1]} : vector<2x8x256xbf16> to vector<2x8x64xbf16>
    "tpu.trace_start"() <{level = 10 : i32, message = "bqk,bkd->bqd"}> : () -> ()
    %cst_22 = arith.constant dense<0.000000e+00> : vector<2x8x64xf32>
    %60 = tpu.matmul %58, %59, %cst_22 {dimension_numbers = #tpu.dot_dimension_numbers<[2], [1], [1], [2], [0, 0, 0, 1, 1, 2], [0], [0]>} : vector<2x8x8xbf16>, vector<2x8x64xbf16>, vector<2x8x64xf32> -> vector<2x8x64xf32>
    "tpu.trace_stop"() : () -> ()
    %61 = arith.truncf %60 : vector<2x8x64xf32> to vector<2x8x64xbf16>
    %c0_23 = arith.constant 0 : index
    %c0_24 = arith.constant 0 : index
    %c64 = arith.constant 64 : index
    %62 = vector.load %arg16[%c0_23, %c0_24, %c64] : memref<2x8x256xbf16, #tpu.memory_space<vmem>>, vector<2x8x64xbf16>
    tpu.vector_store %arg16[%c0_23, %c0_24, %c64], %61 {strides = array<i32>} : memref<2x8x256xbf16, #tpu.memory_space<vmem>>, vector<2x8x64xbf16>,
    %63 = vector.extract_strided_slice %22 {offsets = [0, 0, 128], sizes = [2, 8, 64], strides = [1, 1, 1]} : vector<2x8x256xbf16> to vector<2x8x64xbf16>
    %64 = vector.extract_strided_slice %24 {offsets = [0, 0, 128], sizes = [2, 8, 64], strides = [1, 1, 1]} : vector<2x8x256xbf16> to vector<2x8x64xbf16>
    "tpu.trace_start"() <{level = 10 : i32, message = "bqd,bkd->bqk"}> : () -> ()
    %cst_25 = arith.constant dense<0.000000e+00> : vector<2x8x8xf32>
    %65 = tpu.matmul %63, %64, %cst_25 {dimension_numbers = #tpu.dot_dimension_numbers<[2], [2], [1], [1], [0, 0, 0, 1, 1, 1], [0], [0]>} : vector<2x8x64xbf16>, vector<2x8x64xbf16>, vector<2x8x8xf32> -> vector<2x8x8xf32>
    "tpu.trace_stop"() : () -> ()
    %cst_26 = arith.constant dense<0xFF800000> : vector<2x8xf32>
    %66 = vector.multi_reduction <maximumf>, %65, %cst_26 [2] : vector<2x8x8xf32> to vector<2x8xf32>
    %67 = vector.shape_cast %66 : vector<2x8xf32> to vector<2x8x1xf32>
    %68 = vector.broadcast %67 : vector<2x8x1xf32> to vector<2x8x8xf32>
    %69 = arith.subf %65, %68 : vector<2x8x8xf32>
    %70 = math.exp %69 : vector<2x8x8xf32>
    %cst_27 = arith.constant dense<0.000000e+00> : vector<2x8xf32>
    %71 = vector.multi_reduction <add>, %70, %cst_27 [2] : vector<2x8x8xf32> to vector<2x8xf32>
    %72 = vector.shape_cast %71 : vector<2x8xf32> to vector<2x8x1xf32>
    %73 = tpu.reciprocal %72 {approx = true} : vector<2x8x1xf32> -> vector<2x8x1xf32>
    %74 = vector.broadcast %73 : vector<2x8x1xf32> to vector<2x8x8xf32>
    %75 = arith.mulf %70, %74 : vector<2x8x8xf32>
    %76 = arith.truncf %75 : vector<2x8x8xf32> to vector<2x8x8xbf16>
    %77 = vector.extract_strided_slice %26 {offsets = [0, 0, 128], sizes = [2, 8, 64], strides = [1, 1, 1]} : vector<2x8x256xbf16> to vector<2x8x64xbf16>
    "tpu.trace_start"() <{level = 10 : i32, message = "bqk,bkd->bqd"}> : () -> ()
    %cst_28 = arith.constant dense<0.000000e+00> : vector<2x8x64xf32>
    %78 = tpu.matmul %76, %77, %cst_28 {dimension_numbers = #tpu.dot_dimension_numbers<[2], [1], [1], [2], [0, 0, 0, 1, 1, 2], [0], [0]>} : vector<2x8x8xbf16>, vector<2x8x64xbf16>, vector<2x8x64xf32> -> vector<2x8x64xf32>
    "tpu.trace_stop"() : () -> ()
    %79 = arith.truncf %78 : vector<2x8x64xf32> to vector<2x8x64xbf16>
    %c0_29 = arith.constant 0 : index
    %c0_30 = arith.constant 0 : index
    %c128 = arith.constant 128 : index
    %80 = vector.load %arg16[%c0_29, %c0_30, %c128] : memref<2x8x256xbf16, #tpu.memory_space<vmem>>, vector<2x8x64xbf16>
    tpu.vector_store %arg16[%c0_29, %c0_30, %c128], %79 {strides = array<i32>} : memref<2x8x256xbf16, #tpu.memory_space<vmem>>, vector<2x8x64xbf16>,
    %81 = vector.extract_strided_slice %22 {offsets = [0, 0, 192], sizes = [2, 8, 64], strides = [1, 1, 1]} : vector<2x8x256xbf16> to vector<2x8x64xbf16>
    %82 = vector.extract_strided_slice %24 {offsets = [0, 0, 192], sizes = [2, 8, 64], strides = [1, 1, 1]} : vector<2x8x256xbf16> to vector<2x8x64xbf16>
    "tpu.trace_start"() <{level = 10 : i32, message = "bqd,bkd->bqk"}> : () -> ()
    %cst_31 = arith.constant dense<0.000000e+00> : vector<2x8x8xf32>
    %83 = tpu.matmul %81, %82, %cst_31 {dimension_numbers = #tpu.dot_dimension_numbers<[2], [2], [1], [1], [0, 0, 0, 1, 1, 1], [0], [0]>} : vector<2x8x64xbf16>, vector<2x8x64xbf16>, vector<2x8x8xf32> -> vector<2x8x8xf32>
    "tpu.trace_stop"() : () -> ()
    %cst_32 = arith.constant dense<0xFF800000> : vector<2x8xf32>
    %84 = vector.multi_reduction <maximumf>, %83, %cst_32 [2] : vector<2x8x8xf32> to vector<2x8xf32>
    %85 = vector.shape_cast %84 : vector<2x8xf32> to vector<2x8x1xf32>
    %86 = vector.broadcast %85 : vector<2x8x1xf32> to vector<2x8x8xf32>
    %87 = arith.subf %83, %86 : vector<2x8x8xf32>
    %88 = math.exp %87 : vector<2x8x8xf32>
    %cst_33 = arith.constant dense<0.000000e+00> : vector<2x8xf32>
    %89 = vector.multi_reduction <add>, %88, %cst_33 [2] : vector<2x8x8xf32> to vector<2x8xf32>
    %90 = vector.shape_cast %89 : vector<2x8xf32> to vector<2x8x1xf32>
    %91 = tpu.reciprocal %90 {approx = true} : vector<2x8x1xf32> -> vector<2x8x1xf32>
    %92 = vector.broadcast %91 : vector<2x8x1xf32> to vector<2x8x8xf32>
    %93 = arith.mulf %88, %92 : vector<2x8x8xf32>
    %94 = arith.truncf %93 : vector<2x8x8xf32> to vector<2x8x8xbf16>
    %95 = vector.extract_strided_slice %26 {offsets = [0, 0, 192], sizes = [2, 8, 64], strides = [1, 1, 1]} : vector<2x8x256xbf16> to vector<2x8x64xbf16>
    "tpu.trace_start"() <{level = 10 : i32, message = "bqk,bkd->bqd"}> : () -> ()
    %cst_34 = arith.constant dense<0.000000e+00> : vector<2x8x64xf32>
    %96 = tpu.matmul %94, %95, %cst_34 {dimension_numbers = #tpu.dot_dimension_numbers<[2], [1], [1], [2], [0, 0, 0, 1, 1, 2], [0], [0]>} : vector<2x8x8xbf16>, vector<2x8x64xbf16>, vector<2x8x64xf32> -> vector<2x8x64xf32>
    "tpu.trace_stop"() : () -> ()
    %97 = arith.truncf %96 : vector<2x8x64xf32> to vector<2x8x64xbf16>
    %c0_35 = arith.constant 0 : index
    %c0_36 = arith.constant 0 : index
    %c192 = arith.constant 192 : index
    %98 = vector.load %arg16[%c0_35, %c0_36, %c192] : memref<2x8x256xbf16, #tpu.memory_space<vmem>>, vector<2x8x64xbf16>
    tpu.vector_store %arg16[%c0_35, %c0_36, %c192], %97 {strides = array<i32>} : memref<2x8x256xbf16, #tpu.memory_space<vmem>>, vector<2x8x64xbf16>,
    %c0_37 = arith.constant 0 : index
    %c0_38 = arith.constant 0 : index
    %c0_39 = arith.constant 0 : index
    %99 = vector.load %arg16[%c0_37, %c0_38, %c0_39] : memref<2x8x256xbf16, #tpu.memory_space<vmem>>, vector<2x8x256xbf16>
    %100 = vector.shape_cast %99 : vector<2x8x256xbf16> to vector<16x256xbf16>
    %c0_40 = arith.constant 0 : index
    %c0_41 = arith.constant 0 : index
    %101 = vector.load %arg5[%c0_40, %c0_41] : memref<256x256xbf16, #tpu.memory_space<vmem>>, vector<256x256xbf16>
    %cst_42 = arith.constant dense<0.000000e+00> : vector<16x256xf32>
    %102 = tpu.matmul %100, %101, %cst_42 {dimension_numbers = #tpu.dot_dimension_numbers<[1], [0], [0], [1], [0, 0, 1, 1], [], []>} : vector<16x256xbf16>, vector<256x256xbf16>, vector<16x256xf32> -> vector<16x256xf32>
    %103 = arith.addf %102, %19 : vector<16x256xf32>
    %cst_43 = arith.constant dense<0.000000e+00> : vector<16xf32>
    %104 = vector.multi_reduction <add>, %103, %cst_43 [1] : vector<16x256xf32> to vector<16xf32>
    %105 = vector.shape_cast %104 : vector<16xf32> to vector<16x1xf32>
    %cst_44 = arith.constant 2.560000e+02 : f32
    %106 = vector.broadcast %cst_44 : f32 to vector<16x1xf32>
    %107 = arith.divf %105, %106 : vector<16x1xf32>
    %108 = vector.broadcast %107 : vector<16x1xf32> to vector<16x256xf32>
    %109 = arith.subf %103, %108 : vector<16x256xf32>
    %110 = arith.mulf %109, %109 : vector<16x256xf32>
    %cst_45 = arith.constant dense<0.000000e+00> : vector<16xf32>
    %111 = vector.multi_reduction <add>, %110, %cst_45 [1] : vector<16x256xf32> to vector<16xf32>
    %112 = vector.shape_cast %111 : vector<16xf32> to vector<16x1xf32>
    %cst_46 = arith.constant 2.560000e+02 : f32
    %113 = vector.broadcast %cst_46 : f32 to vector<16x1xf32>
    %114 = arith.divf %112, %113 : vector<16x1xf32>
    %cst_47 = arith.constant 9.99999974E-6 : f32
    %115 = vector.broadcast %cst_47 : f32 to vector<16x1xf32>
    %116 = arith.addf %114, %115 : vector<16x1xf32>
    %117 = math.rsqrt %116 : vector<16x1xf32>
    %118 = vector.broadcast %117 : vector<16x1xf32> to vector<16x256xf32>
    %119 = arith.mulf %109, %118 : vector<16x256xf32>
    %120 = vector.broadcast %1 : vector<1x256xf32> to vector<16x256xf32>
    %121 = arith.mulf %119, %120 : vector<16x256xf32>
    %122 = vector.broadcast %2 : vector<1x256xf32> to vector<16x256xf32>
    %123 = arith.addf %121, %122 : vector<16x256xf32>
    %124 = arith.truncf %123 : vector<16x256xf32> to vector<16x256xbf16>
    %c0_48 = arith.constant 0 : index
    %c0_49 = arith.constant 0 : index
    %125 = vector.load %arg6[%c0_48, %c0_49] : memref<256x512xbf16, #tpu.memory_space<vmem>>, vector<256x512xbf16>
    %cst_50 = arith.constant dense<0.000000e+00> : vector<16x512xf32>
    %126 = tpu.matmul %124, %125, %cst_50 {dimension_numbers = #tpu.dot_dimension_numbers<[1], [0], [0], [1], [0, 0, 1, 1], [], []>} : vector<16x256xbf16>, vector<256x512xbf16>, vector<16x512xf32> -> vector<16x512xf32>
    %cst_51 = arith.constant 0.000000e+00 : f32
    %127 = vector.broadcast %cst_51 : f32 to vector<16x512xf32>
    %128 = arith.maximumf %126, %127 : vector<16x512xf32>
    %129 = arith.truncf %128 : vector<16x512xf32> to vector<16x512xbf16>
    %c0_52 = arith.constant 0 : index
    %c0_53 = arith.constant 0 : index
    %130 = vector.load %arg7[%c0_52, %c0_53] : memref<512x256xbf16, #tpu.memory_space<vmem>>, vector<512x256xbf16>
    %cst_54 = arith.constant dense<0.000000e+00> : vector<16x256xf32>
    %131 = tpu.matmul %129, %130, %cst_54 {dimension_numbers = #tpu.dot_dimension_numbers<[1], [0], [0], [1], [0, 0, 1, 1], [], []>} : vector<16x512xbf16>, vector<512x256xbf16>, vector<16x256xf32> -> vector<16x256xf32>
    %132 = arith.addf %123, %131 : vector<16x256xf32>
    %cst_55 = arith.constant dense<0.000000e+00> : vector<16xf32>
    %133 = vector.multi_reduction <add>, %132, %cst_55 [1] : vector<16x256xf32> to vector<16xf32>
    %134 = vector.shape_cast %133 : vector<16xf32> to vector<16x1xf32>
    %cst_56 = arith.constant 2.560000e+02 : f32
    %135 = vector.broadcast %cst_56 : f32 to vector<16x1xf32>
    %136 = arith.divf %134, %135 : vector<16x1xf32>
    %137 = vector.broadcast %136 : vector<16x1xf32> to vector<16x256xf32>
    %138 = arith.subf %132, %137 : vector<16x256xf32>
    %139 = arith.mulf %138, %138 : vector<16x256xf32>
    %cst_57 = arith.constant dense<0.000000e+00> : vector<16xf32>
    %140 = vector.multi_reduction <add>, %139, %cst_57 [1] : vector<16x256xf32> to vector<16xf32>
    %141 = vector.shape_cast %140 : vector<16xf32> to vector<16x1xf32>
    %cst_58 = arith.constant 2.560000e+02 : f32
    %142 = vector.broadcast %cst_58 : f32 to vector<16x1xf32>
    %143 = arith.divf %141, %142 : vector<16x1xf32>
    %cst_59 = arith.constant 9.99999974E-6 : f32
    %144 = vector.broadcast %cst_59 : f32 to vector<16x1xf32>
    %145 = arith.addf %143, %144 : vector<16x1xf32>
    %146 = math.rsqrt %145 : vector<16x1xf32>
    %147 = vector.broadcast %146 : vector<16x1xf32> to vector<16x256xf32>
    %148 = arith.mulf %138, %147 : vector<16x256xf32>
    %149 = vector.broadcast %3 : vector<1x256xf32> to vector<16x256xf32>
    %150 = arith.mulf %148, %149 : vector<16x256xf32>
    %151 = vector.broadcast %4 : vector<1x256xf32> to vector<16x256xf32>
    %152 = arith.addf %150, %151 : vector<16x256xf32>
    %153 = arith.truncf %152 : vector<16x256xf32> to vector<16x256xbf16>
    %c0_60 = arith.constant 0 : index
    %c0_61 = arith.constant 0 : index
    %154 = vector.load %arg8[%c0_60, %c0_61] : memref<256x256xbf16, #tpu.memory_space<vmem>>, vector<256x256xbf16>
    %cst_62 = arith.constant dense<0.000000e+00> : vector<16x256xf32>
    %155 = tpu.matmul %153, %154, %cst_62 {dimension_numbers = #tpu.dot_dimension_numbers<[1], [0], [0], [1], [0, 0, 1, 1], [], []>} : vector<16x256xbf16>, vector<256x256xbf16>, vector<16x256xf32> -> vector<16x256xf32>
    %156 = arith.addf %155, %20 : vector<16x256xf32>
    %157 = vector.broadcast %5 : vector<1x256xf32> to vector<16x256xf32>
    %158 = arith.addf %156, %157 : vector<16x256xf32>
    %159 = arith.negf %158 : vector<16x256xf32>
    %160 = math.exp %159 : vector<16x256xf32>
    %cst_63 = arith.constant 1.000000e+00 : f32
    %161 = vector.broadcast %cst_63 : f32 to vector<16x256xf32>
    %162 = arith.addf %161, %160 : vector<16x256xf32>
    %163 = arith.divf %161, %162 : vector<16x256xf32>
    %164 = arith.mulf %152, %163 : vector<16x256xf32>
    %c0_64 = arith.constant 0 : index
    %c0_65 = arith.constant 0 : index
    %165 = vector.load %arg9[%c0_64, %c0_65] : memref<256x128xbf16, #tpu.memory_space<vmem>>, vector<256x128xbf16>
    %cst_66 = arith.constant dense<0.000000e+00> : vector<16x128xf32>
    %166 = tpu.matmul %153, %165, %cst_66 {dimension_numbers = #tpu.dot_dimension_numbers<[1], [0], [0], [1], [0, 0, 1, 1], [], []>} : vector<16x256xbf16>, vector<256x128xbf16>, vector<16x128xf32> -> vector<16x128xf32>
    %167 = vector.extract_strided_slice %166 {offsets = [0, 0], sizes = [16, 64], strides = [1, 1]} : vector<16x128xf32> to vector<16x64xf32>
    %168 = vector.extract_strided_slice %166 {offsets = [0, 64], sizes = [16, 64], strides = [1, 1]} : vector<16x128xf32> to vector<16x64xf32>
    %169 = arith.truncf %164 : vector<16x256xf32> to vector<16x256xbf16>
    %c0_67 = arith.constant 0 : index
    %c0_68 = arith.constant 0 : index
    %170 = vector.load %arg10[%c0_67, %c0_68] : memref<256x64xbf16, #tpu.memory_space<vmem>>, vector<256x64xbf16>
    %cst_69 = arith.constant dense<0.000000e+00> : vector<16x64xf32>
    %171 = tpu.matmul %169, %170, %cst_69 {dimension_numbers = #tpu.dot_dimension_numbers<[1], [0], [0], [1], [0, 0, 1, 1], [], []>} : vector<16x256xbf16>, vector<256x64xbf16>, vector<16x64xf32> -> vector<16x64xf32>
    %172 = arith.truncf %167 : vector<16x64xf32> to vector<16x64xbf16>
    %173 = vector.shape_cast %172 : vector<16x64xbf16> to vector<2x8x64xbf16>
    %174 = arith.truncf %168 : vector<16x64xf32> to vector<16x64xbf16>
    %175 = vector.shape_cast %174 : vector<16x64xbf16> to vector<2x8x64xbf16>
    %176 = arith.truncf %171 : vector<16x64xf32> to vector<16x64xbf16>
    %177 = vector.shape_cast %176 : vector<16x64xbf16> to vector<2x8x64xbf16>
    %178 = vector.extract_strided_slice %173 {offsets = [0, 0, 0], sizes = [2, 8, 32], strides = [1, 1, 1]} : vector<2x8x64xbf16> to vector<2x8x32xbf16>
    %179 = vector.extract_strided_slice %175 {offsets = [0, 0, 0], sizes = [2, 8, 32], strides = [1, 1, 1]} : vector<2x8x64xbf16> to vector<2x8x32xbf16>
    "tpu.trace_start"() <{level = 10 : i32, message = "bqd,bkd->bqk"}> : () -> ()
    %cst_70 = arith.constant dense<0.000000e+00> : vector<2x8x8xf32>
    %180 = tpu.matmul %178, %179, %cst_70 {dimension_numbers = #tpu.dot_dimension_numbers<[2], [2], [1], [1], [0, 0, 0, 1, 1, 1], [0], [0]>} : vector<2x8x32xbf16>, vector<2x8x32xbf16>, vector<2x8x8xf32> -> vector<2x8x8xf32>
    "tpu.trace_stop"() : () -> ()
    %cst_71 = arith.constant dense<0xFF800000> : vector<2x8xf32>
    %181 = vector.multi_reduction <maximumf>, %180, %cst_71 [2] : vector<2x8x8xf32> to vector<2x8xf32>
    %182 = vector.shape_cast %181 : vector<2x8xf32> to vector<2x8x1xf32>
    %183 = vector.broadcast %182 : vector<2x8x1xf32> to vector<2x8x8xf32>
    %184 = arith.subf %180, %183 : vector<2x8x8xf32>
    %185 = math.exp %184 : vector<2x8x8xf32>
    %cst_72 = arith.constant dense<0.000000e+00> : vector<2x8xf32>
    %186 = vector.multi_reduction <add>, %185, %cst_72 [2] : vector<2x8x8xf32> to vector<2x8xf32>
    %187 = vector.shape_cast %186 : vector<2x8xf32> to vector<2x8x1xf32>
    %188 = tpu.reciprocal %187 {approx = true} : vector<2x8x1xf32> -> vector<2x8x1xf32>
    %189 = vector.broadcast %188 : vector<2x8x1xf32> to vector<2x8x8xf32>
    %190 = arith.mulf %185, %189 : vector<2x8x8xf32>
    %191 = arith.truncf %190 : vector<2x8x8xf32> to vector<2x8x8xbf16>
    %192 = vector.extract_strided_slice %177 {offsets = [0, 0, 0], sizes = [2, 8, 32], strides = [1, 1, 1]} : vector<2x8x64xbf16> to vector<2x8x32xbf16>
    "tpu.trace_start"() <{level = 10 : i32, message = "bqk,bkd->bqd"}> : () -> ()
    %cst_73 = arith.constant dense<0.000000e+00> : vector<2x8x32xf32>
    %193 = tpu.matmul %191, %192, %cst_73 {dimension_numbers = #tpu.dot_dimension_numbers<[2], [1], [1], [2], [0, 0, 0, 1, 1, 2], [0], [0]>} : vector<2x8x8xbf16>, vector<2x8x32xbf16>, vector<2x8x32xf32> -> vector<2x8x32xf32>
    "tpu.trace_stop"() : () -> ()
    %194 = arith.truncf %193 : vector<2x8x32xf32> to vector<2x8x32xbf16>
    %c0_74 = arith.constant 0 : index
    %c0_75 = arith.constant 0 : index
    %c0_76 = arith.constant 0 : index
    %195 = vector.load %arg17[%c0_74, %c0_75, %c0_76] : memref<2x8x64xbf16, #tpu.memory_space<vmem>>, vector<2x8x32xbf16>
    tpu.vector_store %arg17[%c0_74, %c0_75, %c0_76], %194 {strides = array<i32>} : memref<2x8x64xbf16, #tpu.memory_space<vmem>>, vector<2x8x32xbf16>,
    %196 = vector.extract_strided_slice %173 {offsets = [0, 0, 32], sizes = [2, 8, 32], strides = [1, 1, 1]} : vector<2x8x64xbf16> to vector<2x8x32xbf16>
    %197 = vector.extract_strided_slice %175 {offsets = [0, 0, 32], sizes = [2, 8, 32], strides = [1, 1, 1]} : vector<2x8x64xbf16> to vector<2x8x32xbf16>
    "tpu.trace_start"() <{level = 10 : i32, message = "bqd,bkd->bqk"}> : () -> ()
    %cst_77 = arith.constant dense<0.000000e+00> : vector<2x8x8xf32>
    %198 = tpu.matmul %196, %197, %cst_77 {dimension_numbers = #tpu.dot_dimension_numbers<[2], [2], [1], [1], [0, 0, 0, 1, 1, 1], [0], [0]>} : vector<2x8x32xbf16>, vector<2x8x32xbf16>, vector<2x8x8xf32> -> vector<2x8x8xf32>
    "tpu.trace_stop"() : () -> ()
    %cst_78 = arith.constant dense<0xFF800000> : vector<2x8xf32>
    %199 = vector.multi_reduction <maximumf>, %198, %cst_78 [2] : vector<2x8x8xf32> to vector<2x8xf32>
    %200 = vector.shape_cast %199 : vector<2x8xf32> to vector<2x8x1xf32>
    %201 = vector.broadcast %200 : vector<2x8x1xf32> to vector<2x8x8xf32>
    %202 = arith.subf %198, %201 : vector<2x8x8xf32>
    %203 = math.exp %202 : vector<2x8x8xf32>
    %cst_79 = arith.constant dense<0.000000e+00> : vector<2x8xf32>
    %204 = vector.multi_reduction <add>, %203, %cst_79 [2] : vector<2x8x8xf32> to vector<2x8xf32>
    %205 = vector.shape_cast %204 : vector<2x8xf32> to vector<2x8x1xf32>
    %206 = tpu.reciprocal %205 {approx = true} : vector<2x8x1xf32> -> vector<2x8x1xf32>
    %207 = vector.broadcast %206 : vector<2x8x1xf32> to vector<2x8x8xf32>
    %208 = arith.mulf %203, %207 : vector<2x8x8xf32>
    %209 = arith.truncf %208 : vector<2x8x8xf32> to vector<2x8x8xbf16>
    %210 = vector.extract_strided_slice %177 {offsets = [0, 0, 32], sizes = [2, 8, 32], strides = [1, 1, 1]} : vector<2x8x64xbf16> to vector<2x8x32xbf16>
    "tpu.trace_start"() <{level = 10 : i32, message = "bqk,bkd->bqd"}> : () -> ()
    %cst_80 = arith.constant dense<0.000000e+00> : vector<2x8x32xf32>
    %211 = tpu.matmul %209, %210, %cst_80 {dimension_numbers = #tpu.dot_dimension_numbers<[2], [1], [1], [2], [0, 0, 0, 1, 1, 2], [0], [0]>} : vector<2x8x8xbf16>, vector<2x8x32xbf16>, vector<2x8x32xf32> -> vector<2x8x32xf32>
    "tpu.trace_stop"() : () -> ()
    %212 = arith.truncf %211 : vector<2x8x32xf32> to vector<2x8x32xbf16>
    %c0_81 = arith.constant 0 : index
    %c0_82 = arith.constant 0 : index
    %c32 = arith.constant 32 : index
    %213 = vector.load %arg17[%c0_81, %c0_82, %c32] : memref<2x8x64xbf16, #tpu.memory_space<vmem>>, vector<2x8x32xbf16>
    tpu.vector_store %arg17[%c0_81, %c0_82, %c32], %212 {strides = array<i32>} : memref<2x8x64xbf16, #tpu.memory_space<vmem>>, vector<2x8x32xbf16>,
    %c0_83 = arith.constant 0 : index
    %c0_84 = arith.constant 0 : index
    %c0_85 = arith.constant 0 : index
    %214 = vector.load %arg17[%c0_83, %c0_84, %c0_85] : memref<2x8x64xbf16, #tpu.memory_space<vmem>>, vector<2x8x64xbf16>
    %215 = vector.shape_cast %214 : vector<2x8x64xbf16> to vector<16x64xbf16>
    %c0_86 = arith.constant 0 : index
    %c0_87 = arith.constant 0 : index
    %216 = vector.load %arg11[%c0_86, %c0_87] : memref<64x64xbf16, #tpu.memory_space<vmem>>, vector<64x64xbf16>
    %cst_88 = arith.constant dense<0.000000e+00> : vector<16x64xf32>
    %217 = tpu.matmul %215, %216, %cst_88 {dimension_numbers = #tpu.dot_dimension_numbers<[1], [0], [0], [1], [0, 0, 1, 1], [], []>} : vector<16x64xbf16>, vector<64x64xbf16>, vector<16x64xf32> -> vector<16x64xf32>
    %218 = arith.addf %217, %171 : vector<16x64xf32>
    %cst_89 = arith.constant dense<0.000000e+00> : vector<16xf32>
    %219 = vector.multi_reduction <add>, %218, %cst_89 [1] : vector<16x64xf32> to vector<16xf32>
    %220 = vector.shape_cast %219 : vector<16xf32> to vector<16x1xf32>
    %cst_90 = arith.constant 6.400000e+01 : f32
    %221 = vector.broadcast %cst_90 : f32 to vector<16x1xf32>
    %222 = arith.divf %220, %221 : vector<16x1xf32>
    %223 = vector.broadcast %222 : vector<16x1xf32> to vector<16x64xf32>
    %224 = arith.subf %218, %223 : vector<16x64xf32>
    %225 = arith.mulf %224, %224 : vector<16x64xf32>
    %cst_91 = arith.constant dense<0.000000e+00> : vector<16xf32>
    %226 = vector.multi_reduction <add>, %225, %cst_91 [1] : vector<16x64xf32> to vector<16xf32>
    %227 = vector.shape_cast %226 : vector<16xf32> to vector<16x1xf32>
    %cst_92 = arith.constant 6.400000e+01 : f32
    %228 = vector.broadcast %cst_92 : f32 to vector<16x1xf32>
    %229 = arith.divf %227, %228 : vector<16x1xf32>
    %cst_93 = arith.constant 9.99999974E-6 : f32
    %230 = vector.broadcast %cst_93 : f32 to vector<16x1xf32>
    %231 = arith.addf %229, %230 : vector<16x1xf32>
    %232 = math.rsqrt %231 : vector<16x1xf32>
    %233 = vector.broadcast %232 : vector<16x1xf32> to vector<16x64xf32>
    %234 = arith.mulf %224, %233 : vector<16x64xf32>
    %235 = vector.broadcast %6 : vector<1x64xf32> to vector<16x64xf32>
    %236 = arith.mulf %234, %235 : vector<16x64xf32>
    %237 = vector.broadcast %7 : vector<1x64xf32> to vector<16x64xf32>
    %238 = arith.addf %236, %237 : vector<16x64xf32>
    %239 = arith.truncf %238 : vector<16x64xf32> to vector<16x64xbf16>
    %c0_94 = arith.constant 0 : index
    %c0_95 = arith.constant 0 : index
    %240 = vector.load %arg12[%c0_94, %c0_95] : memref<64x128xbf16, #tpu.memory_space<vmem>>, vector<64x128xbf16>
    %cst_96 = arith.constant dense<0.000000e+00> : vector<16x128xf32>
    %241 = tpu.matmul %239, %240, %cst_96 {dimension_numbers = #tpu.dot_dimension_numbers<[1], [0], [0], [1], [0, 0, 1, 1], [], []>} : vector<16x64xbf16>, vector<64x128xbf16>, vector<16x128xf32> -> vector<16x128xf32>
    %cst_97 = arith.constant 0.000000e+00 : f32
    %242 = vector.broadcast %cst_97 : f32 to vector<16x128xf32>
    %243 = arith.maximumf %241, %242 : vector<16x128xf32>
    %244 = arith.truncf %243 : vector<16x128xf32> to vector<16x128xbf16>
    %c0_98 = arith.constant 0 : index
    %c0_99 = arith.constant 0 : index
    %245 = vector.load %arg13[%c0_98, %c0_99] : memref<128x64xbf16, #tpu.memory_space<vmem>>, vector<128x64xbf16>
    %cst_100 = arith.constant dense<0.000000e+00> : vector<16x64xf32>
    %246 = tpu.matmul %244, %245, %cst_100 {dimension_numbers = #tpu.dot_dimension_numbers<[1], [0], [0], [1], [0, 0, 1, 1], [], []>} : vector<16x128xbf16>, vector<128x64xbf16>, vector<16x64xf32> -> vector<16x64xf32>
    %247 = arith.addf %238, %246 : vector<16x64xf32>
    %248 = vector.shape_cast %247 : vector<16x64xf32> to vector<2x8x64xf32>
    %c0_101 = arith.constant 0 : index
    %c0_102 = arith.constant 0 : index
    %c0_103 = arith.constant 0 : index
    %249 = vector.load %arg15[%c0_101, %c0_102, %c0_103] : memref<2x8x64xf32, #tpu.memory_space<vmem>>, vector<2x8x64xf32>
    tpu.vector_store %arg15[%c0_101, %c0_102, %c0_103], %248 {strides = array<i32>} : memref<2x8x64xf32, #tpu.memory_space<vmem>>, vector<2x8x64xf32>,
    return
  }
  func.func @transform_0(%arg0: i32) -> (i32, i32, i32) {
    %c0_i32 = arith.constant 0 : i32
    %c0_i32_0 = arith.constant 0 : i32
    %c0_i32_1 = arith.constant 0 : i32
    return %arg0, %c0_i32, %c0_i32_0 : i32, i32, i32
  }
  func.func @transform_1(%arg0: i32) -> (i32, i32) {
    %c0_i32 = arith.constant 0 : i32
    %c0_i32_0 = arith.constant 0 : i32
    %c0_i32_1 = arith.constant 0 : i32
    return %c0_i32, %c0_i32_0 : i32, i32
  }
  func.func @transform_2(%arg0: i32) -> (i32, i32) {
    %c0_i32 = arith.constant 0 : i32
    %c0_i32_0 = arith.constant 0 : i32
    %c0_i32_1 = arith.constant 0 : i32
    return %c0_i32, %c0_i32_0 : i32, i32
  }
  func.func @transform_3(%arg0: i32) -> (i32, i32) {
    %c0_i32 = arith.constant 0 : i32
    %c0_i32_0 = arith.constant 0 : i32
    %c0_i32_1 = arith.constant 0 : i32
    return %c0_i32, %c0_i32_0 : i32, i32
  }
  func.func @transform_4(%arg0: i32) -> (i32, i32) {
    %c0_i32 = arith.constant 0 : i32
    %c0_i32_0 = arith.constant 0 : i32
    %c0_i32_1 = arith.constant 0 : i32
    return %c0_i32, %c0_i32_0 : i32, i32
  }
  func.func @transform_5(%arg0: i32) -> (i32, i32) {
    %c0_i32 = arith.constant 0 : i32
    %c0_i32_0 = arith.constant 0 : i32
    %c0_i32_1 = arith.constant 0 : i32
    return %c0_i32, %c0_i32_0 : i32, i32
  }
  func.func @transform_6(%arg0: i32) -> (i32, i32) {
    %c0_i32 = arith.constant 0 : i32
    %c0_i32_0 = arith.constant 0 : i32
    %c0_i32_1 = arith.constant 0 : i32
    return %c0_i32, %c0_i32_0 : i32, i32
  }
  func.func @transform_7(%arg0: i32) -> (i32, i32) {
    %c0_i32 = arith.constant 0 : i32
    %c0_i32_0 = arith.constant 0 : i32
    %c0_i32_1 = arith.constant 0 : i32
    return %c0_i32, %c0_i32_0 : i32, i32
  }
  func.func @transform_8(%arg0: i32) -> (i32, i32) {
    %c0_i32 = arith.constant 0 : i32
    %c0_i32_0 = arith.constant 0 : i32
    %c0_i32_1 = arith.constant 0 : i32
    return %c0_i32, %c0_i32_0 : i32, i32
  }
  func.func @transform_9(%arg0: i32) -> (i32, i32) {
    %c0_i32 = arith.constant 0 : i32
    %c0_i32_0 = arith.constant 0 : i32
    %c0_i32_1 = arith.constant 0 : i32
    return %c0_i32, %c0_i32_0 : i32, i32
  }
  func.func @transform_10(%arg0: i32) -> (i32, i32) {
    %c0_i32 = arith.constant 0 : i32
    %c0_i32_0 = arith.constant 0 : i32
    %c0_i32_1 = arith.constant 0 : i32
    return %c0_i32, %c0_i32_0 : i32, i32
  }
  func.func @transform_11(%arg0: i32) -> (i32, i32) {
    %c0_i32 = arith.constant 0 : i32
    %c0_i32_0 = arith.constant 0 : i32
    %c0_i32_1 = arith.constant 0 : i32
    return %c0_i32, %c0_i32_0 : i32, i32
  }
  func.func @transform_12(%arg0: i32) -> (i32, i32) {
    %c0_i32 = arith.constant 0 : i32
    %c0_i32_0 = arith.constant 0 : i32
    %c0_i32_1 = arith.constant 0 : i32
    return %c0_i32, %c0_i32_0 : i32, i32
  }
  func.func @transform_13(%arg0: i32) -> (i32, i32) {
    %c0_i32 = arith.constant 0 : i32
    %c0_i32_0 = arith.constant 0 : i32
    %c0_i32_1 = arith.constant 0 : i32
    return %c0_i32, %c0_i32_0 : i32, i32
  }
  func.func @transform_14(%arg0: i32) -> (i32, i32, i32) {
    %c0_i32 = arith.constant 0 : i32
    %c0_i32_0 = arith.constant 0 : i32
    %c0_i32_1 = arith.constant 0 : i32
    return %arg0, %c0_i32, %c0_i32_0 : i32, i32, i32
  }
}

</mosaic_0001>

<bundles_post_ra>
// kernel: tpu_custom_call.1
= control target key start
LH: loop header
LB: loop body
LE: loop exit
PB: predicated region body
PF: predicated region fallthrough
CT: control target
= control target key end

     0   :  { %s10687_s0 = inlined_call_operand.vmem [shape: f32[4,8,1024], index: 0, kind: input, shape index: {}]   ;;  %s10688_s1 = inlined_call_operand.hbm [shape: bf16[512,256], index: 1, kind: input, shape index: {}]   ;;  %s10689_s2 = inlined_call_operand.hbm [shape: bf16[512,256], index: 2, kind: input, shape index: {}]   ;;  %s10690_s3 = inlined_call_operand.hbm [shape: bf16[1024,512], index: 3, kind: input, shape index: {}]   ;;  %s10691_s4 = inlined_call_operand.hbm [shape: bf16[256,256], index: 4, kind: input, shape index: {}]   ;;  %s10692_s5 = inlined_call_operand.hbm [shape: bf16[256,512], index: 5, kind: input, shape index: {}]   ;;  %s10693_s6 = inlined_call_operand.hbm [shape: bf16[512,256], index: 6, kind: input, shape index: {}]   ;;  %s10694_s7 = inlined_call_operand.hbm [shape: bf16[256,256], index: 7, kind: input, shape index: {}]   ;;  %s10695_s8 = inlined_call_operand.hbm [shape: bf16[256,128], index: 8, kind: input, shape index: {}]   ;;  %s10696_s9 = inlined_call_operand.vmem [shape: bf16[256,64], index: 9, kind: input, shape index: {}]   ;;  %s10697_s10 = inlined_call_operand.vmem [shape: bf16[64,64], index: 10, kind: input, shape index: {}]   ;;  %s10698_s11 = inlined_call_operand.hbm [shape: bf16[64,128], index: 11, kind: input, shape index: {}]   ;;  %s10699_s12 = inlined_call_operand.vmem [shape: bf16[128,64], index: 12, kind: input, shape index: {}]   ;;  %s10700_s13 = inlined_call_operand.vmem [shape: f32[7,256], index: 13, kind: input, shape index: {}]   ;;  %s10701_s14 = inlined_call_operand.hbm [shape: f32[4,8,64], index: 14, kind: output, shape index: {}]  }
   0x1   :  { %10717 = sst [smem:[#allocation32_spill]] %s10688_s1 }
   0x2   :  { %10718 = sst [smem:[#allocation33_spill]] %s10689_s2 }
   0x3   :  { %10719 = sst [smem:[#allocation34_spill]] %s10691_s4 }
   0x4   :  { %19 = vsyncpa [#allocation5], 0 }
   0x5   :  { %20 = vsyncpa [#allocation8], 0 }
   0x6   :  { %21 = vsyncpa [#allocation11], 0 }
   0x7   :  { %22 = vsyncpa [#allocation14], 0 }
   0x8   :  { %23 = vsyncpa [#allocation17], 0 }
   0x9   :  { %24 = vsyncpa [#allocation6], 0 }
   0xa   :  { %26 = vsyncpa [#allocation6 + $0x1], 0  ;;  %s9859_s29 = smov 0   ;;  %s9861_s30 = smov 0  }
   0xb   :  { %s9863_s15 = smov 0   ;;  %s9865_s16 = smov 0  }
   0xc LB: > { %10720 = sst [smem:[#allocation26_spill]] %s9747_s29  ;;  %s9880_s17 = sadd.s32 4294967295, %s9759_s16   ;;  %s9759_s16 = sphi %s9865_s16, %s10754_s16   ;;  %s9755_s15 = sphi %s9863_s15, %s10756_s15   ;;  %s9751_s30 = sphi %s9861_s30, %s10758_s30   ;;  %s9747_s29 = sphi %s9859_s29, %s10757_s29  }
   0xd   : > { %10721 = sst [smem:[#allocation27_spill]] %s9755_s15  ;;  %s7276_s18 = sadd.s32 4294967294, %s9759_s16  }
   0xe   : > { %10722 = sst [smem:[#allocation28_spill]] %s9759_s16  ;;  %s9884_s19 = sadd.s32 1, %s9759_s16  }
   0xf   : > { %10723 = sst [smem:[#allocation29_spill]] %s9884_s19  ;;  %s338_s20 = sadd.s32 1, %s9755_s15 }
  0x10   : > { %s335_s21 = ssub.s32 %s9759_s16, %s9884_s19  ;;  %p348_p0 = scmp.ne.s32.totalorder %s9755_s15, %s9751_s30 }
  0x11   : > { %p336_p1 = scmp.eq.s32.totalorder %s335_s21, 0  ;;  %p349_p2 = scmp.eq.s32.totalorder %s9880_s17, 1 }
  0x12   : > { %p354_p3 = scmp.ne.s32.totalorder %s9751_s30, %s9747_s29  ;;  %p355_p4 = scmp.eq.s32.totalorder %s7276_s18, 1 }
  0x13   : > { %s9895_s22 = scalar_select %p336_p1, %s9755_s15, %s338_s20  }
  0x14   : > { %p9897_p5 = por %p349_p2, %p348_p0  ;;  %p9901_p6 = por %p355_p4, %p354_p3 }
  0x15   : > { %10724 = sst [smem:[#allocation30_spill]] %s9895_s22  ;;  %p7277_p7 = scmp.ge.s32.totalorder %s9759_s16, 1 }
  0x16   : > { %s10725_s23 = scalar_select %p9897_p5, 1, 0 }
  0x17   : > { %s10726_s24 = scalar_select %p9901_p6, 1, 0 }
  0x18   : > { %p362_p8 = scmp.lt.s32.totalorder %s9759_s16, 3  ;;  %p10708_p9 = scmp.eq.s32.totalorder %s9880_s17, 0 }
  0x19   : > { %10727 = sst [smem:[#allocation31_spill]] %s10726_s24  ;;  %s9761_s26 = smov [#allocation7]  }
  0x1a   : > { %p9908_p10 = pnand %p7277_p7, %p362_p8  ;;  %s387_s27 = sshll.u32 %s9761_s26, 4  ;;  %s388_s27 = int_to_ptr.vmem [resolvable:$true] %s387_s27 }
  0x1b   : > { %s9762_s18 = smov [#allocation10]   ;;  %s9763_s21 = smov [#allocation13]  }
  0x1c   : > { %s10728_s25 = scalar_select %p9908_p10, 1, 0 }
  0x1d   : > { %p8347_p11 = pneg %p9908_p10  ;;  %s413_s20 = sshll.u32 %s9762_s18, 4  ;;  %s414_s20 = int_to_ptr.vmem [resolvable:$true] %s413_s20 }
  0x1e   : > { %s439_s22 = sshll.u32 %s9763_s21, 4  ;;  %s9456_s19 = scalar_lea.vmem %s388_s27, 8192  ;;  %s440_s22 = int_to_ptr.vmem [resolvable:$true] %s439_s22 }
  0x1f   : > { %p9916_p12 = pnand %p10708_p9, %p8347_p11  ;;  %p9457_p0 = scmp.ne.s32.totalorder %s388_s27, %s9456_s19 }
  0x20   : > { %p9464_p3 = scmp.lt.s32.totalorder %s388_s27, %s388_s27  ;;  %p9465_p4 = scmp.lt.s32.totalorder %s9456_s19, %s9456_s19 }
  0x21   : > { %p9922_p13 = pneg %p9916_p12 }
  0x22   : > { %p9466_p7 = por %p9465_p4, %p9464_p3 }
  0x23   : > { %p9459_p1 = pnand %p9457_p0, %p9922_p13 }
  0x25   : > { %p9460_p2 = pneg %p9459_p1 }
  0x27   : > { %p9467_p8 = pnand %p9466_p7, %p9460_p2 }
  0x29   : > { %9470 = shalt.err (!%p9467_p8)
}
  0x2a   : > { %s10709_s26 = smov 128   ;;  %s10711_s18 = smov 8  }
  0x2b   : > { %s10731_s2 = sld [smem:[#allocation33_spill]]  ;;  %s9482_s29 = scalar_lea.vmem %s414_s20, 4096 }
  0x2c   : > { %p9483_p11 = scmp.ne.s32.totalorder %s414_s20, %s9482_s29  ;;  %p9490_p3 = scmp.lt.s32.totalorder %s414_s20, %s414_s20 }
  0x2d   : > { %p9491_p2 = scmp.lt.s32.totalorder %s9482_s29, %s9482_s29 }
  0x2e   : > { %p9485_p0 = pnand %p9483_p11, %p9922_p13 }
  0x2f   : > { %p9492_p4 = por %p9491_p2, %p9490_p3 }
  0x30   : > { %p9486_p1 = pneg %p9485_p0 }
  0x31   : > { %8353 = dma.hbm_to_vmem [thread:$0]  (!%p9916_p12), %s10731_s2, 8192, %s388_s27, [#allocation8], %s10709_s26, %s10709_s26, %s10711_s18  }
  0x32   : > { %p9493_p7 = pnand %p9492_p4, %p9486_p1 }
  0x34   : > { %9496 = shalt.err (!%p9493_p7)
}
  0x35   : > { %s10732_s4 = sld [smem:[#allocation34_spill]]  ;;  %s9508_s24 = scalar_lea.vmem %s440_s22, 8192 }
  0x36   : > { %p9509_p8 = scmp.ne.s32.totalorder %s440_s22, %s9508_s24  ;;  %p9516_p9 = scmp.lt.s32.totalorder %s440_s22, %s440_s22 }
  0x37   : > { %p9517_p3 = scmp.lt.s32.totalorder %s9508_s24, %s9508_s24 }
  0x38   : > { %p9511_p11 = pnand %p9509_p8, %p9922_p13 }
  0x39   : > { %p9518_p1 = por %p9517_p3, %p9516_p9 }
  0x3a   : > { %p9512_p0 = pneg %p9511_p11 }
  0x3b   : > { %8359 = dma.hbm_to_vmem [thread:$0]  (!%p9916_p12), %s10732_s4, 4096, %s414_s20, [#allocation11], %s10709_s26, %s10709_s26, %s10711_s18  }
  0x3c   : > { %p9519_p2 = pnand %p9518_p1, %p9512_p0 }
  0x3e   : > { %9522 = shalt.err (!%p9519_p2)
}
  0x3f   : > { %8365 = dma.hbm_to_vmem [thread:$0]  (!%p9916_p12), %s10693_s6, 8192, %s440_s22, [#allocation14], %s10709_s26, %s10709_s26, %s10711_s18  }
  0x40   : > { %s9766_s27 = smov [#allocation16]  }
  0x41   : > { %s465_s20 = sshll.u32 %s9766_s27, 4  ;;  %s466_s20 = int_to_ptr.vmem [resolvable:$true] %s465_s20 }
  0x42   : > { %s9534_s21 = scalar_lea.vmem %s466_s20, 2048  ;;  %p9542_p8 = scmp.lt.s32.totalorder %s466_s20, %s466_s20 }
  0x43   : > { %p9535_p4 = scmp.ne.s32.totalorder %s466_s20, %s9534_s21  ;;  %p9543_p11 = scmp.lt.s32.totalorder %s9534_s21, %s9534_s21 }
  0x45   : > { %p9537_p7 = pnand %p9535_p4, %p9922_p13  ;;  %p9544_p0 = por %p9543_p11, %p9542_p8 }
  0x47   : > { %p9538_p9 = pneg %p9537_p7 }
  0x49   : > { %p9545_p3 = pnand %p9544_p0, %p9538_p9 }
  0x4b   : > { %9548 = shalt.err (!%p9545_p3)
}
  0x4c   : > { %s10713_s19 = smov 64   ;;  %s10714_s24 = smov 4  }
  0x4d   : > { %8371 = dma.hbm_to_vmem [thread:$0]  (!%p9916_p12), %s10695_s8, 2048, %s466_s20, [#allocation17], %s10713_s19, %s10713_s19, %s10714_s24  }
  0x4e   : > { %s9769_s16 = smov [#allocation4]   ;;  %s9770_s26 = smov [#allocation9]  }
  0x4f   : > { %s374_s27 = sshll.u32 %s9769_s16, 4  ;;  %s400_s18 = sshll.u32 %s9770_s26, 4  ;;  %s375_s27 = int_to_ptr.vmem [resolvable:$true] %s374_s27  ;;  %s401_s18 = int_to_ptr.vmem [resolvable:$true] %s400_s18 }
  0x50   : > { %s9560_s21 = scalar_lea.vmem %s375_s27, 8192  ;;  %p9568_p7 = scmp.lt.s32.totalorder %s375_s27, %s375_s27 }
  0x51   : > { %p9561_p1 = scmp.ne.s32.totalorder %s375_s27, %s9560_s21  ;;  %p9569_p9 = scmp.lt.s32.totalorder %s9560_s21, %s9560_s21 }
  0x53   : > { %p9563_p2 = pnand %p9561_p1, %p9922_p13  ;;  %p9570_p8 = por %p9569_p9, %p9568_p7 }
  0x55   : > { %p9564_p4 = pneg %p9563_p2 }
  0x57   : > { %p9571_p11 = pnand %p9570_p8, %p9564_p4 }
  0x59   : > { %9574 = shalt.err (!%p9571_p11)
}
  0x5a   : > { %s10733_s22 = smov 8   ;;  %s10734_s20 = smov 128  }
  0x5b   : > { %s10735_s1 = sld [smem:[#allocation32_spill]]  ;;  %s9586_s26 = scalar_lea.vmem %s401_s18, 32768 }
  0x5c   : > { %p9587_p0 = scmp.ne.s32.totalorder %s401_s18, %s9586_s26  ;;  %p9594_p2 = scmp.lt.s32.totalorder %s401_s18, %s401_s18 }
  0x5d   : > { %p9595_p6 = scmp.lt.s32.totalorder %s9586_s26, %s9586_s26 }
  0x5e   : > { %p9589_p3 = pnand %p9587_p0, %p9922_p13 }
  0x5f   : > { %p9596_p7 = por %p9595_p6, %p9594_p2 }
  0x60   : > { %p9590_p1 = pneg %p9589_p3 }
  0x61   : > { %8350 = dma.hbm_to_vmem [thread:$0]  (!%p9916_p12), %s10735_s1, 8192, %s375_s27, [#allocation5], %s10734_s20, %s10734_s20, %s10733_s22  }
  0x62   : > { %p9597_p4 = pnand %p9596_p7, %p9590_p1 }
  0x64   : > { %9600 = shalt.err (!%p9597_p4)
}
  0x65   : > { %s9771_s21 = smov 256   ;;  %s9772_s19 = smov 16  }
  0x66   : > { %8356 = dma.hbm_to_vmem [thread:$0]  (!%p9916_p12), %s10690_s3, 32768, %s401_s18, [#allocation8], %s9771_s21, %s9771_s21, %s9772_s19  }
  0x67   : > { %s9773_s27 = smov [#allocation12]   ;;  %s9774_s16 = smov [#allocation15]  }
  0x68   : > { %s426_s29 = sshll.u32 %s9773_s27, 4  ;;  %s452_s1 = sshll.u32 %s9774_s16, 4  ;;  %s427_s29 = int_to_ptr.vmem [resolvable:$true] %s426_s29  ;;  %s453_s1 = int_to_ptr.vmem [resolvable:$true] %s452_s1 }
  0x69   : > { %s9612_s4 = scalar_lea.vmem %s427_s29, 8192  ;;  %p9620_p11 = scmp.lt.s32.totalorder %s427_s29, %s427_s29 }
  0x6a   : > { %p9613_p9 = scmp.ne.s32.totalorder %s427_s29, %s9612_s4  ;;  %p9621_p0 = scmp.lt.s32.totalorder %s9612_s4, %s9612_s4 }
  0x6c   : > { %p9615_p6 = pnand %p9613_p9, %p9922_p13  ;;  %p9622_p3 = por %p9621_p0, %p9620_p11 }
  0x6e   : > { %p9616_p8 = pneg %p9615_p6 }
  0x70   : > { %p9623_p1 = pnand %p9622_p3, %p9616_p8 }
  0x72   : > { %9626 = shalt.err (!%p9623_p1)
}
  0x73   : > { %8362 = dma.hbm_to_vmem [thread:$0]  (!%p9916_p12), %s10692_s5, 8192, %s427_s29, [#allocation11], %s9771_s21, %s9771_s21, %s9772_s19  }
  0x74   : > { %s9638_s24 = scalar_lea.vmem %s453_s1, 4096  ;;  %p9646_p5 = scmp.lt.s32.totalorder %s453_s1, %s453_s1 }
  0x75   : > { %p9639_p2 = scmp.ne.s32.totalorder %s453_s1, %s9638_s24  ;;  %p9647_p9 = scmp.lt.s32.totalorder %s9638_s24, %s9638_s24 }
  0x77   : > { %p9641_p7 = pnand %p9639_p2, %p9922_p13  ;;  %p9648_p6 = por %p9647_p9, %p9646_p5 }
  0x79   : > { %p9642_p4 = pneg %p9641_p7 }
  0x7b   : > { %p9649_p10 = pnand %p9648_p6, %p9642_p4 }
  0x7d   : > { %9652 = shalt.err (!%p9649_p10)
}
  0x7e   : > { %8368 = dma.hbm_to_vmem [thread:$0]  (!%p9916_p12), %s10694_s7, 4096, %s453_s1, [#allocation14], %s10734_s20, %s10734_s20, %s10733_s22  }
  0x7f   : > { %s9775_s19 = smov [#allocation18]  }
  0x80   : > { %s484_s21 = sshll.u32 %s9775_s19, 4  ;;  %s485_s21 = int_to_ptr.vmem [resolvable:$true] %s484_s21 }
  0x81   : > { %s9664_s27 = scalar_lea.vmem %s485_s21, 512  ;;  %p9672_p0 = scmp.lt.s32.totalorder %s485_s21, %s485_s21 }
  0x82   : > { %p9665_p8 = scmp.ne.s32.totalorder %s485_s21, %s9664_s27  ;;  %p9673_p10 = scmp.lt.s32.totalorder %s9664_s27, %s9664_s27 }
  0x84   : > { %p9667_p11 = pnand %p9665_p8, %p9922_p13  ;;  %p9674_p3 = por %p9673_p10, %p9672_p0 }
  0x86   : > { %p9668_p5 = pneg %p9667_p11 }
  0x88   : > { %p9675_p1 = pnand %p9674_p3, %p9668_p5 }
  0x8a   : > { %9678 = shalt.err (!%p9675_p1)
}
  0x8b   : > { %s10736_s29 = smov 4   ;;  %s10737_s16 = smov 64  }
  0x8c   : > { %8374 = dma.hbm_to_vmem [thread:$0]  (!%p9916_p12), %s10698_s11, 512, %s485_s21, [#allocation17], %s10737_s16, %s10737_s16, %s10736_s29  }
  0x8d   : > { %p10738_p2 = scmp.ne.s32.totalorder %s10728_s25, 0 }
  0x8e   : > { %p10739_p13 = scmp.eq.s32.totalorder (!%p10738_p2), %s9880_s17, 0 }
  0x8f   : > { %516 = sbr.rel (%p10738_p2) target bundleno = 6754 (0x1a62), region = 76 }
  0x94   : > { %9722 = dma.done.wait (%p10739_p13), [#allocation5], 8192   ;;  %p10740_p7 = pmov %p10739_p13 }
  0x96   : > { %9724 = vsyncadd (%p10740_p7), [#allocation5], 4294959104  ;;  %p10741_p4 = pmov %p10740_p7 }
  0x98   : > { %9726 = dma.done.wait (%p10741_p4), [#allocation8], 40960   ;;  %p10742_p9 = pmov %p10741_p4 }
  0x99   : > { %p10743_p6 = pmov %p10741_p4 }
  0x9a   : > { %9728 = vsyncadd (%p10742_p9), [#allocation8], 4294926336 }
  0x9b   : > { %9730 = dma.done.wait (%p10743_p6), [#allocation11], 12288   ;;  %p10744_p12 = pmov %p10741_p4 }
  0x9c   : > { %p10745_p8 = pmov %p10741_p4 }
  0x9d   : > { %9732 = vsyncadd (%p10744_p12), [#allocation11], 4294955008 }
  0x9e   : > { %9734 = dma.done.wait (%p10745_p8), [#allocation14], 12288   ;;  %p10746_p11 = pmov %p10741_p4 }
  0x9f   : > { %p10747_p5 = pmov %p10741_p4 }
  0xa0   : > { %9736 = vsyncadd (%p10746_p11), [#allocation14], 4294955008 }
  0xa1   : > { %9738 = dma.done.wait (%p10747_p5), [#allocation17], 2560   ;;  %p10748_p0 = pmov %p10741_p4 }
  0xa2   : > { %v8452_v0 = vld [vmem:[#allocation4 + $0x74] ss:$8 sps:$4 sm:$0xff]   ;;  %v8456_v2 = vld [vmem:[#allocation4 + $0x70] ss:$8 sps:$4 sm:$0xff]   ;;  %v8458_v4 = vld [vmem:[#allocation4 + $0x64] ss:$8 sps:$4 sm:$0xff]  }
  0xa3   : > { %9740 = vsyncadd (%p10748_p0), [#allocation17], 4294964736  ;;  %v8454_v1 = vld [vmem:[#allocation4 + $0x174] ss:$8 sps:$4 sm:$0xff]   ;;  %1014 = vmatprep.subr.bf16.mxu0 %v8452_v0  ;;  %v8457_v3 = vld [vmem:[#allocation4 + $0x170] ss:$8 sps:$4 sm:$0xff]  }
  0xa4   : > { %1057 = vmatprep.subr.bf16.mxu1 %v8454_v1  ;;  %1015 = vmatpush1.bf16.msra.mxu0 %v8456_v2  ;;  %v8460_v5 = vld [vmem:[#allocation4 + $0x164] ss:$8 sps:$4 sm:$0xff]   ;;  %v8462_v6 = vld [vmem:[#allocation4 + $0x60] ss:$8 sps:$4 sm:$0xff]   ;;  %v8464_v8 = vld [vmem:[#allocation4 + $0x54] ss:$8 sps:$4 sm:$0xff]  }
  0xa5   : > { %1058 = vmatpush1.bf16.msra.mxu1 %v8457_v3  ;;  %1016 = vmatprep.subr.bf16.mxu0 %v8458_v4  ;;  %v8463_v7 = vld [vmem:[#allocation4 + $0x160] ss:$8 sps:$4 sm:$0xff]   ;;  %v8466_v9 = vld [vmem:[#allocation4 + $0x154] ss:$8 sps:$4 sm:$0xff]   ;;  %v8468_v10 = vld [vmem:[#allocation4 + $0x50] ss:$8 sps:$4 sm:$0xff]  }
  0xa6   : > { %1059 = vmatprep.subr.bf16.mxu1 %v8460_v5  ;;  %v8469_v11 = vld [vmem:[#allocation4 + $0x150] ss:$8 sps:$4 sm:$0xff]   ;;  %v8470_v12 = vld [vmem:[#allocation4 + $0x44] ss:$8 sps:$4 sm:$0xff]   ;;  %v8474_v14 = vld [vmem:[#allocation4 + $0x40] ss:$8 sps:$4 sm:$0xff]  }
  0xa7   : > { %v8472_v13 = vld [vmem:[#allocation4 + $0x144] ss:$8 sps:$4 sm:$0xff]   ;;  %v8475_v15 = vld [vmem:[#allocation4 + $0x140] ss:$8 sps:$4 sm:$0xff]   ;;  %v8476_v16 = vld [vmem:[#allocation4 + $0x34] ss:$8 sps:$4 sm:$0xff]  }
  0xa8   : > { %1017 = vmatpush1.bf16.msra.mxu0 %v8462_v6  ;;  %v8478_v17 = vld [vmem:[#allocation4 + $0x134] ss:$8 sps:$4 sm:$0xff]   ;;  %v8480_v18 = vld [vmem:[#allocation4 + $0x30] ss:$8 sps:$4 sm:$0xff]   ;;  %v8482_v20 = vld [vmem:[#allocation4 + $0x24] ss:$8 sps:$4 sm:$0xff]  }
  0xa9   : > { %1060 = vmatpush1.bf16.msra.mxu1 %v8463_v7  ;;  %1018 = vmatprep.subr.bf16.mxu0 %v8464_v8  ;;  %v8481_v19 = vld [vmem:[#allocation4 + $0x130] ss:$8 sps:$4 sm:$0xff]   ;;  %v8484_v21 = vld [vmem:[#allocation4 + $0x124] ss:$8 sps:$4 sm:$0xff]   ;;  %v8486_v22 = vld [vmem:[#allocation4 + $0x20] ss:$8 sps:$4 sm:$0xff]  }
  0xaa   : > { %1061 = vmatprep.subr.bf16.mxu1 %v8466_v9  ;;  %v8487_v23 = vld [vmem:[#allocation4 + $0x120] ss:$8 sps:$4 sm:$0xff]   ;;  %v8488_v24 = vld [vmem:[#allocation4 + $0x14] ss:$8 sps:$4 sm:$0xff]   ;;  %v8492_v26 = vld [vmem:[#allocation4 + $0x10] ss:$8 sps:$4 sm:$0xff]  }
  0xab   : > { %v8490_v25 = vld [vmem:[#allocation4 + $0x114] ss:$8 sps:$4 sm:$0xff]   ;;  %v8493_v27 = vld [vmem:[#allocation4 + $0x110] ss:$8 sps:$4 sm:$0xff]   ;;  %v8494_v28 = vld [vmem:[#allocation4 + $0x4] ss:$8 sps:$4 sm:$0xff]  }
  0xac   : > { %1019 = vmatpush1.bf16.msra.mxu0 %v8468_v10  ;;  %v8496_v29 = vld [vmem:[#allocation4 + $0x104] ss:$8 sps:$4 sm:$0xff]   ;;  %s7299_s15 = sshll.u32 %s9880_s17, 1  ;;  %v8498_v30 = vld [vmem:[#allocation4] ss:$8 sps:$4 sm:$0xff]   ;;  %s9776_s18 = smov 64  }
  0xad   : > { %1062 = vmatpush1.bf16.msra.mxu1 %v8469_v11  ;;  %1020 = vmatprep.subr.bf16.mxu0 %v8470_v12  ;;  %v8499_v31 = vld [vmem:[#allocation4 + $0x100] ss:$8 sps:$4 sm:$0xff]   ;;  %v8500_v32 = vld [vmem:[#allocation4 + $0xf4] ss:$8 sps:$4 sm:$0xff]   ;;  %p596_p10 = scmp.lt.s32.totalorder %s7299_s15, 3  ;;  %vm3480_vm0 = vcmask 523264  }
  0xae   : > { %1063 = vmatprep.subr.bf16.mxu1 %v8472_v13  ;;  %v8502_v33 = vld [vmem:[#allocation4 + $0x1f4] ss:$8 sps:$4 sm:$0xff]   ;;  %v8504_v34 = vld [vmem:[#allocation4 + $0xf0] ss:$8 sps:$4 sm:$0xff]   ;;  %v8506_v36 = vld [vmem:[#allocation4 + $0xe4] ss:$8 sps:$4 sm:$0xff]  }
  0xaf   : > { %v8505_v35 = vld [vmem:[#allocation4 + $0x1f0] ss:$8 sps:$4 sm:$0xff]   ;;  %s10760_s15 = smov (!%p596_p10, %s7299_s15), 3  ;;  %v8508_v37 = vld [vmem:[#allocation4 + $0x1e4] ss:$8 sps:$4 sm:$0xff]   ;;  %vm9778_vm1 = vmmov 0  }
  0xb0   : > { %1021 = vmatpush1.bf16.msra.mxu0 %v8474_v14  ;;  %v8510_v38 = vld [vmem:[#allocation4 + $0xe0] ss:$8 sps:$4 sm:$0xff]   ;;  %v8512_v40 = vld [vmem:[#allocation4 + $0xd4] ss:$8 sps:$4 sm:$0xff]   ;;  %s7986_s25 = sshll.u32 %s10760_s15, 6  ;;  %vm3601_vm2 = vcmask 1043456  }
  0xb1   : > { %1064 = vmatpush1.bf16.msra.mxu1 %v8475_v15  ;;  %1022 = vmatprep.subr.bf16.mxu0 %v8476_v16  ;;  %v8511_v39 = vld [vmem:[#allocation4 + $0x1e0] ss:$8 sps:$4 sm:$0xff]   ;;  %v8514_v41 = vld [vmem:[#allocation4 + $0x1d4] ss:$8 sps:$4 sm:$0xff]   ;;  %v8516_v42 = vld [vmem:[#allocation4 + $0xd0] ss:$8 sps:$4 sm:$0xff]   ;;  %s10036_s20 = scalar_lea.vmem %s10687_s0, %s7986_s25 }
  0xb2   : > { %1065 = vmatprep.subr.bf16.mxu1 %v8478_v17  ;;  %v8517_v43 = vld [vmem:[#allocation4 + $0x1d0] ss:$8 sps:$4 sm:$0xff]   ;;  %v8518_v44 = vld [vmem:[#allocation4 + $0xc4] ss:$8 sps:$4 sm:$0xff]   ;;  %v8522_v50 = vld [vmem:[#allocation4 + $0xc0] ss:$8 sps:$4 sm:$0xff]  }
  0xb3   : > { %v8520_v45 = vld [vmem:[#allocation4 + $0x1c4] ss:$8 sps:$4 sm:$0xff]   ;;  %v607_v46 = vld [vmem:[%s10036_s20 + $0x8] sm:$0xff]  ;;  %v8523_v51 = vld [vmem:[#allocation4 + $0x1c0] ss:$8 sps:$4 sm:$0xff]   ;;  %vm3573_vm3 = vcmask 64512  }
  0xb4   : > { %1023 = vmatpush1.bf16.msra.mxu0 %v8480_v18  ;;  %v615_v47 = vld [vmem:[%s10036_s20 + $0x48] sm:$0xff]  ;;  %v609_v48 = vld [vmem:[%s10036_s20 + $0x18] sm:$0xff]  ;;  %v606_v6 = vld [vmem:[%s10036_s20] sm:$0xff]  ;;  %vm3693_vm4 = vcmask 519168   ;;  %vm3936_vm5 = vcmask 1043968   ;;  %vm6348_vm6 = vcmask 261120  }
  0xb5   : > { %1066 = vmatpush1.bf16.msra.mxu1 %v8481_v19  ;;  %1024 = vmatprep.subr.bf16.mxu0 %v8482_v20  ;;  %v617_v49 = vld [vmem:[%s10036_s20 + $0x58] sm:$0xff]  ;;  %v8524_v52 = vld [vmem:[#allocation4 + $0xb4] ss:$8 sps:$4 sm:$0xff]   ;;  %v10042_v53 = vpack.c.bf16 %v615_v47, %v607_v46  ;;  %v8528_v56 = vld [vmem:[#allocation4 + $0xb0] ss:$8 sps:$4 sm:$0xff]   ;;  %s9780_s29 = smov 96  }
  0xb6   : > { %1067 = vmatprep.subr.bf16.mxu1 %v8484_v21  ;;  %v10044_v54 = vpack.c.bf16 %v617_v49, %v609_v48  ;;  %v8526_v55 = vld [vmem:[#allocation4 + $0x1b4] ss:$8 sps:$4 sm:$0xff]   ;;  %v8529_v57 = vld [vmem:[#allocation4 + $0x1b0] ss:$8 sps:$4 sm:$0xff]   ;;  %v8530_v58 = vld [vmem:[#allocation4 + $0xa4] ss:$8 sps:$4 sm:$0xff]  }
  0xb7   : > { %1046 = vmatprep.mubr.bf16.mxu0 %v10042_v53  ;;  %v8532_v59 = vld [vmem:[#allocation4 + $0x1a4] ss:$8 sps:$4 sm:$0xff]   ;;  %v8534_v60 = vld [vmem:[#allocation4 + $0xa0] ss:$8 sps:$4 sm:$0xff]   ;;  %v8536_v62 = vld [vmem:[#allocation4 + $0x94] ss:$8 sps:$4 sm:$0xff]  }
  0xb8   : > { %1025 = vmatpush1.bf16.msra.mxu0 %v8486_v22  ;;  %1089 = vmatprep.mubr.bf16.mxu1 %v10044_v54  ;;  %v8535_v61 = vld [vmem:[#allocation4 + $0x1a0] ss:$8 sps:$4 sm:$0xff]   ;;  %v8538_v63 = vld [vmem:[#allocation4 + $0x194] ss:$8 sps:$4 sm:$0xff]   ;;  %v8540_v0 = vld [vmem:[#allocation4 + $0x90] ss:$8 sps:$4 sm:$0xff]  }
  0xb9   : > { %1068 = vmatpush1.bf16.msra.mxu1 %v8487_v23  ;;  %1026 = vmatprep.subr.bf16.mxu0 %v8488_v24  ;;  %v8541_v1 = vld [vmem:[#allocation4 + $0x190] ss:$8 sps:$4 sm:$0xff]   ;;  %v8542_v2 = vld [vmem:[#allocation4 + $0x84] ss:$8 sps:$4 sm:$0xff]   ;;  %v8546_v4 = vld [vmem:[#allocation4 + $0x80] ss:$8 sps:$4 sm:$0xff]  }
  0xba   : > { %1069 = vmatprep.subr.bf16.mxu1 %v8490_v25  ;;  %v8544_v3 = vld [vmem:[#allocation4 + $0x184] ss:$8 sps:$4 sm:$0xff]   ;;  %v8547_v5 = vld [vmem:[#allocation4 + $0x180] ss:$8 sps:$4 sm:$0xff]   ;;  %v608_v8 = vld [vmem:[%s10036_s20 + $0x10] sm:$0xff]  ;;  %vm6561_vm7 = vcmask 257024  }
  0xbb   : > { %v614_v7 = vld [vmem:[%s10036_s20 + $0x40] sm:$0xff]  ;;  %v616_v9 = vld [vmem:[%s10036_s20 + $0x50] sm:$0xff]  ;;  %v621_v46 = vld [vmem:[%s10036_s20 + $0x78] sm:$0xff]  ;;  %vm6798_vm8 = vcmask 519424   ;;  %s592_s26 = sand.u32 1, %s9751_s30   ;;  %p10749_p1 = scmp.ne.s32.totalorder %s10725_s23, 0 }
  0xbc   : > { %1027 = vmatpush1.bf16.msra.mxu0 %v8492_v26  ;;  %v8550_v10 = vld [vmem:[#allocation7 + $0x74] ss:$8 sps:$4 sm:$0xff]   ;;  %v10052_v12 = vpack.c.bf16 %v614_v7, %v606_v6  ;;  %v10054_v13 = vpack.c.bf16 %v616_v9, %v608_v8  ;;  %v8548_v14 = vld [vmem:[#allocation7 + $0x70] ss:$8 sps:$4 sm:$0xff]   ;;  %v8556_v16 = vld [vmem:[#allocation7 + $0x64] ss:$8 sps:$4 sm:$0xff]  }
  0xbd   : > { %1070 = vmatpush1.bf16.msra.mxu1 %v8493_v27  ;;  %1028 = vmatprep.subr.bf16.mxu0 %v8494_v28  ;;  %v8553_v11 = vld [vmem:[#allocation7 + $0x174] ss:$8 sps:$4 sm:$0xff]   ;;  %v8551_v15 = vld [vmem:[#allocation7 + $0x170] ss:$8 sps:$4 sm:$0xff]   ;;  %v8559_v17 = vld [vmem:[#allocation7 + $0x164] ss:$8 sps:$4 sm:$0xff]  }
  0xbe   : > { %1071 = vmatprep.subr.bf16.mxu1 %v8496_v29  ;;  %v8554_v18 = vld [vmem:[#allocation7 + $0x60] ss:$8 sps:$4 sm:$0xff]   ;;  %v8562_v20 = vld [vmem:[#allocation7 + $0x54] ss:$8 sps:$4 sm:$0xff]   ;;  %v8560_v22 = vld [vmem:[#allocation7 + $0x50] ss:$8 sps:$4 sm:$0xff]  }
  0xbf   : > { %v8557_v19 = vld [vmem:[#allocation7 + $0x160] ss:$8 sps:$4 sm:$0xff]   ;;  %v8565_v21 = vld [vmem:[#allocation7 + $0x154] ss:$8 sps:$4 sm:$0xff]   ;;  %v8563_v23 = vld [vmem:[#allocation7 + $0x150] ss:$8 sps:$4 sm:$0xff]  }
  0xc0   : > { %1029 = vmatpush1.bf16.msra.mxu0 %v8498_v30  ;;  %v8568_v24 = vld [vmem:[#allocation7 + $0x44] ss:$8 sps:$4 sm:$0xff]   ;;  %v8566_v26 = vld [vmem:[#allocation7 + $0x40] ss:$8 sps:$4 sm:$0xff]   ;;  %v8574_v28 = vld [vmem:[#allocation7 + $0x34] ss:$8 sps:$4 sm:$0xff]  }
  0xc1   : > { %1072 = vmatpush1.bf16.msra.mxu1 %v8499_v31  ;;  %1030 = vmatprep.subr.bf16.mxu0 %v8500_v32  ;;  %v8571_v25 = vld [vmem:[#allocation7 + $0x144] ss:$8 sps:$4 sm:$0xff]   ;;  %v8569_v27 = vld [vmem:[#allocation7 + $0x140] ss:$8 sps:$4 sm:$0xff]   ;;  %v8577_v29 = vld [vmem:[#allocation7 + $0x134] ss:$8 sps:$4 sm:$0xff]  }
  0xc2   : > { %1073 = vmatprep.subr.bf16.mxu1 %v8502_v33  ;;  %v8572_v30 = vld [vmem:[#allocation7 + $0x30] ss:$8 sps:$4 sm:$0xff]   ;;  %v8580_v32 = vld [vmem:[#allocation7 + $0x24] ss:$8 sps:$4 sm:$0xff]   ;;  %v8590_v48 = vld [vmem:[#allocation7] ss:$8 sps:$4 sm:$0xff]  }
  0xc3   : > { %v8575_v31 = vld [vmem:[#allocation7 + $0x130] ss:$8 sps:$4 sm:$0xff]   ;;  %v8583_v33 = vld [vmem:[#allocation7 + $0x124] ss:$8 sps:$4 sm:$0xff]   ;;  %v8593_v49 = vld [vmem:[#allocation7 + $0x100] ss:$8 sps:$4 sm:$0xff]  }
  0xc4   : > { %1031 = vmatpush2.bf16.msra.mxu0 %v8504_v34  ;;  %v8578_v34 = vld [vmem:[#allocation7 + $0x20] ss:$8 sps:$4 sm:$0xff]   ;;  %v8620_v6 = vld [vmem:[#allocation7 + $0xb0] ss:$8 sps:$4 sm:$0xff]   ;;  %v8628_v8 = vld [vmem:[#allocation7 + $0xa4] ss:$8 sps:$4 sm:$0xff]  }
  0xc5   : > { %1074 = vmatpush2.bf16.msra.mxu1 %v8505_v35  ;;  %1032 = vmatprep.subr.bf16.mxu0 %v8506_v36  ;;  %v8581_v35 = vld [vmem:[#allocation7 + $0x120] ss:$8 sps:$4 sm:$0xff]   ;;  %v8586_v36 = vld [vmem:[#allocation7 + $0x14] ss:$8 sps:$4 sm:$0xff]   ;;  %v8623_v7 = vld [vmem:[#allocation7 + $0x1b0] ss:$8 sps:$4 sm:$0xff]  }
  0xc6   : > { %1075 = vmatprep.subr.bf16.mxu1 %v8508_v37  ;;  %v8589_v37 = vld [vmem:[#allocation7 + $0x114] ss:$8 sps:$4 sm:$0xff]   ;;  %v8631_v9 = vld [vmem:[#allocation7 + $0x1a4] ss:$8 sps:$4 sm:$0xff]   ;;  %s7298_s19 = sshll.u32 %s592_s26, 4  ;;  %s10647_s1 = scalar_lea.sflag [#allocation6], %s592_s26 }
  0xc7   : > { %s594_s21 = scalar_lea.vmem [#allocation19], %s7298_s19  ;;  %s9781_s15 = smov [#allocation19]  }
  0xc8   : > { %1033 = vmatpush2.bf16.msra.mxu0 %v8510_v38  ;;  %v8584_v38 = vld [vmem:[#allocation7 + $0x10] ss:$8 sps:$4 sm:$0xff]   ;;  %s7126_s27 = sshll.u32 %s594_s21, 4  ;;  %s9683_s25 = sshll.u32 %s9781_s15, 4  ;;  %s10639_s27 = int_to_ptr.vmem [resolvable:$true] %s7126_s27  ;;  %s9684_s25 = int_to_ptr.vmem [resolvable:$false] %s9683_s25 }
  0xc9   : > { %1076 = vmatpush2.bf16.msra.mxu1 %v8511_v39  ;;  %1034 = vmatprep.subr.bf16.mxu0 %v8512_v40  ;;  %v8587_v39 = vld [vmem:[#allocation7 + $0x110] ss:$8 sps:$4 sm:$0xff]   ;;  %s9685_s28 = scalar_lea.vmem %s9684_s25, 512  ;;  %p9686_p7 = scmp.lt.s32.totalorder %s10639_s27, %s9684_s25 }
  0xca   : > { %1077 = vmatprep.subr.bf16.mxu1 %v8514_v41  ;;  %v611_v40 = vld [vmem:[%s10036_s20 + $0x28] sm:$0xff] }
  0xcb   : > { %v619_v41 = vld [vmem:[%s10036_s20 + $0x68] sm:$0xff] }
  0xcc   : > { %1035 = vmatpush2.bf16.msra.mxu0 %v8516_v42  ;;  %v613_v42 = vld [vmem:[%s10036_s20 + $0x38] sm:$0xff] }
  0xcd   : > { %1078 = vmatpush2.bf16.msra.mxu1 %v8517_v43  ;;  %1036 = vmatprep.subr.bf16.mxu0 %v8518_v44  ;;  %v8592_v43 = vld [vmem:[#allocation7 + $0x4] ss:$8 sps:$4 sm:$0xff]   ;;  %v10064_v47 = vpack.c.bf16 %v621_v46, %v613_v42  ;;  %v8662_v42 = vld [vmem:[#allocation9 + $0x80] ss:$16 sps:$4 sm:$0xff]  }
  0xce   : > { %1079 = vmatprep.subr.bf16.mxu1 %v8520_v45  ;;  %v8595_v44 = vld [vmem:[#allocation7 + $0x104] ss:$8 sps:$4 sm:$0xff]   ;;  %v10061_v45 = vpack.c.bf16 %v619_v41, %v611_v40 }
  0xcf   : > { %v8664_v40 = vld [vmem:[#allocation9 + $0x84] ss:$16 sps:$4 sm:$0xff]  }
  0xd0   : > { %1037 = vmatpush2.bf16.msra.mxu0 %v8522_v50  ;;  %v8598_v50 = vld [vmem:[#allocation7 + $0xf4] ss:$8 sps:$4 sm:$0xff]  }
  0xd1   : > { %1080 = vmatpush2.bf16.msra.mxu1 %v8523_v51  ;;  %1038 = vmatprep.subr.bf16.mxu0 %v8524_v52  ;;  %v8601_v51 = vld [vmem:[#allocation7 + $0x1f4] ss:$8 sps:$4 sm:$0xff]   ;;  %v8596_v52 = vld [vmem:[#allocation7 + $0xf0] ss:$8 sps:$4 sm:$0xff]  }
  0xd2   : > { %1081 = vmatprep.subr.bf16.mxu1 %v8526_v55  ;;  %v8599_v55 = vld [vmem:[#allocation7 + $0x1f0] ss:$8 sps:$4 sm:$0xff]   ;;  %v8667_v41 = vld [vmem:[#allocation9 + $0x284] ss:$16 sps:$4 sm:$0xff]  }
  0xd3   : > { %v8673_v46 = vld [vmem:[#allocation9 + $0x264] ss:$16 sps:$4 sm:$0xff]  }
  0xd4   : > { %1039 = vmatpush2.bf16.msra.mxu0 %v8528_v56  ;;  %v8604_v56 = vld [vmem:[#allocation7 + $0xe4] ss:$8 sps:$4 sm:$0xff]  }
  0xd5   : > { %1082 = vmatpush2.bf16.msra.mxu1 %v8529_v57  ;;  %1040 = vmatprep.subr.bf16.mxu0 %v8530_v58  ;;  %v8607_v57 = vld [vmem:[#allocation7 + $0x1e4] ss:$8 sps:$4 sm:$0xff]   ;;  %v8602_v58 = vld [vmem:[#allocation7 + $0xe0] ss:$8 sps:$4 sm:$0xff]  }
  0xd6   : > { %1083 = vmatprep.subr.bf16.mxu1 %v8532_v59  ;;  %v8605_v59 = vld [vmem:[#allocation7 + $0x1e0] ss:$8 sps:$4 sm:$0xff]  }
  0xd8   : > { %1041 = vmatpush2.bf16.msra.mxu0 %v8534_v60  ;;  %v8610_v60 = vld [vmem:[#allocation7 + $0xd4] ss:$8 sps:$4 sm:$0xff]  }
  0xd9   : > { %1084 = vmatpush2.bf16.msra.mxu1 %v8535_v61  ;;  %1042 = vmatprep.subr.bf16.mxu0 %v8536_v62  ;;  %v8613_v61 = vld [vmem:[#allocation7 + $0x1d4] ss:$8 sps:$4 sm:$0xff]   ;;  %v8608_v62 = vld [vmem:[#allocation7 + $0xd0] ss:$8 sps:$4 sm:$0xff]  }
  0xda   : > { %1085 = vmatprep.subr.bf16.mxu1 %v8538_v63  ;;  %v8611_v63 = vld [vmem:[#allocation7 + $0x1d0] ss:$8 sps:$4 sm:$0xff]  }
  0xdc   : > { %1043 = vmatpush2.bf16.msra.mxu0 %v8540_v0  ;;  %v8616_v0 = vld [vmem:[#allocation7 + $0xc4] ss:$8 sps:$4 sm:$0xff]  }
  0xdd   : > { %1086 = vmatpush2.bf16.msra.mxu1 %v8541_v1  ;;  %1044 = vmatprep.subr.bf16.mxu0 %v8542_v2  ;;  %v8619_v1 = vld [vmem:[#allocation7 + $0x1c4] ss:$8 sps:$4 sm:$0xff]   ;;  %v8614_v2 = vld [vmem:[#allocation7 + $0xc0] ss:$8 sps:$4 sm:$0xff]  }
  0xde   : > { %1087 = vmatprep.subr.bf16.mxu1 %v8544_v3  ;;  %v8617_v3 = vld [vmem:[#allocation7 + $0x1c0] ss:$8 sps:$4 sm:$0xff]  }
  0xe0   : > { %1045 = vmatpush2.bf16.msra.mxu0 %v8546_v4  ;;  %v8622_v4 = vld [vmem:[#allocation7 + $0xb4] ss:$8 sps:$4 sm:$0xff]  }
  0xe1   : > { %1088 = vmatpush2.bf16.msra.mxu1 %v8547_v5  ;;  %1484 = vmatprep.subr.bf16.mxu0 %v8550_v10  ;;  %v8625_v5 = vld [vmem:[#allocation7 + $0x1b4] ss:$8 sps:$4 sm:$0xff]   ;;  %v8626_v10 = vld [vmem:[#allocation7 + $0xa0] ss:$8 sps:$4 sm:$0xff]  }
  0xe2   : > { %1527 = vmatprep.subr.bf16.mxu1 %v8553_v11  ;;  %v8629_v11 = vld [vmem:[#allocation7 + $0x1a0] ss:$8 sps:$4 sm:$0xff]  }
  0xe3   : > { %1047 = vmatmul.mubr.bf16.vlgmr.msra.gmra.mxu0 %v10052_v12 }
  0xe4   : > { %1090 = vmatmul.mubr.bf16.vlgmr.msra.gmra.mxu1 %v10054_v13  ;;  %1485 = vmatpush1.bf16.msra.mxu0 %v8548_v14  ;;  %v8634_v14 = vld [vmem:[#allocation7 + $0x94] ss:$8 sps:$4 sm:$0xff]  }
  0xe5   : > { %1528 = vmatpush1.bf16.msra.mxu1 %v8551_v15  ;;  %1486 = vmatprep.subr.bf16.mxu0 %v8556_v16  ;;  %v8637_v15 = vld [vmem:[#allocation7 + $0x194] ss:$8 sps:$4 sm:$0xff]   ;;  %v8632_v16 = vld [vmem:[#allocation7 + $0x90] ss:$8 sps:$4 sm:$0xff]  }
  0xe6   : > { %1529 = vmatprep.subr.bf16.mxu1 %v8559_v17  ;;  %1516 = vmatprep.mubr.bf16.mxu0 %v10061_v45  ;;  %v8635_v17 = vld [vmem:[#allocation7 + $0x190] ss:$8 sps:$4 sm:$0xff]  }
  0xe7   : > { %1559 = vmatprep.mubr.bf16.mxu1 %v10064_v47 }
  0xe8   : > { %1487 = vmatpush1.bf16.msra.mxu0 %v8554_v18  ;;  %v8640_v18 = vld [vmem:[#allocation7 + $0x84] ss:$8 sps:$4 sm:$0xff]  }
  0xe9   : > { %1530 = vmatpush1.bf16.msra.mxu1 %v8557_v19  ;;  %1488 = vmatprep.subr.bf16.mxu0 %v8562_v20  ;;  %v8643_v19 = vld [vmem:[#allocation7 + $0x184] ss:$8 sps:$4 sm:$0xff]   ;;  %v8638_v20 = vld [vmem:[#allocation7 + $0x80] ss:$8 sps:$4 sm:$0xff]  }
  0xea   : > { %1531 = vmatprep.subr.bf16.mxu1 %v8565_v21  ;;  %v8641_v21 = vld [vmem:[#allocation7 + $0x180] ss:$8 sps:$4 sm:$0xff]  }
  0xec   : > { %1489 = vmatpush1.bf16.msra.mxu0 %v8560_v22  ;;  %v610_v22 = vld [vmem:[%s10036_s20 + $0x20] sm:$0xff] }
  0xed   : > { %1532 = vmatpush1.bf16.msra.mxu1 %v8563_v23  ;;  %1490 = vmatprep.subr.bf16.mxu0 %v8568_v24  ;;  %v618_v23 = vld [vmem:[%s10036_s20 + $0x60] sm:$0xff]  ;;  %v612_v24 = vld [vmem:[%s10036_s20 + $0x30] sm:$0xff] }
  0xee   : > { %1533 = vmatprep.subr.bf16.mxu1 %v8571_v25  ;;  %v620_v25 = vld [vmem:[%s10036_s20 + $0x70] sm:$0xff] }
  0xf0   : > { %1491 = vmatpush1.bf16.msra.mxu0 %v8566_v26  ;;  %v8646_v26 = vld [vmem:[#allocation9 + $0xe4] ss:$16 sps:$4 sm:$0xff]  }
  0xf1   : > { %1534 = vmatpush1.bf16.msra.mxu1 %v8569_v27  ;;  %1492 = vmatprep.subr.bf16.mxu0 %v8574_v28  ;;  %v8649_v27 = vld [vmem:[#allocation9 + $0x2e4] ss:$16 sps:$4 sm:$0xff]   ;;  %v10072_v28 = vpack.c.bf16 %v618_v23, %v610_v22 }
  0xf2   : > { %1535 = vmatprep.subr.bf16.mxu1 %v8577_v29  ;;  %v10074_v29 = vpack.c.bf16 %v620_v25, %v612_v24  ;;  %v8724_v22 = vld [vmem:[#allocation9 + $0x144] ss:$16 sps:$4 sm:$0xff]   ;;  %v8722_v24 = vld [vmem:[#allocation9 + $0x140] ss:$16 sps:$4 sm:$0xff]  }
  0xf3   : > { %v8727_v23 = vld [vmem:[#allocation9 + $0x344] ss:$16 sps:$4 sm:$0xff]   ;;  %v8725_v25 = vld [vmem:[#allocation9 + $0x340] ss:$16 sps:$4 sm:$0xff]  }
  0xf4   : > { %1493 = vmatpush1.bf16.msra.mxu0 %v8572_v30  ;;  %v8644_v30 = vld [vmem:[#allocation9 + $0xe0] ss:$16 sps:$4 sm:$0xff]  }
  0xf5   : > { %1536 = vmatpush1.bf16.msra.mxu1 %v8575_v31  ;;  %1494 = vmatprep.subr.bf16.mxu0 %v8580_v32  ;;  %v8647_v31 = vld [vmem:[#allocation9 + $0x2e0] ss:$16 sps:$4 sm:$0xff]   ;;  %v8652_v32 = vld [vmem:[#allocation9 + $0xc4] ss:$16 sps:$4 sm:$0xff]  }
  0xf6   : > { %1537 = vmatprep.subr.bf16.mxu1 %v8583_v33  ;;  %v8655_v33 = vld [vmem:[#allocation9 + $0x2c4] ss:$16 sps:$4 sm:$0xff]  }
  0xf8   : > { %1495 = vmatpush1.bf16.msra.mxu0 %v8578_v34  ;;  %v8650_v34 = vld [vmem:[#allocation9 + $0xc0] ss:$16 sps:$4 sm:$0xff]  }
  0xf9   : > { %1538 = vmatpush1.bf16.msra.mxu1 %v8581_v35  ;;  %1496 = vmatprep.subr.bf16.mxu0 %v8586_v36  ;;  %v8653_v35 = vld [vmem:[#allocation9 + $0x2c0] ss:$16 sps:$4 sm:$0xff]   ;;  %v8658_v36 = vld [vmem:[#allocation9 + $0xa4] ss:$16 sps:$4 sm:$0xff]  }
  0xfa   : > { %1539 = vmatprep.subr.bf16.mxu1 %v8589_v37  ;;  %v8661_v37 = vld [vmem:[#allocation9 + $0x2a4] ss:$16 sps:$4 sm:$0xff]  }
  0xfc   : > { %1497 = vmatpush1.bf16.msra.mxu0 %v8584_v38  ;;  %v8656_v38 = vld [vmem:[#allocation9 + $0xa0] ss:$16 sps:$4 sm:$0xff]  }
  0xfd   : > { %1540 = vmatpush1.bf16.msra.mxu1 %v8587_v39  ;;  %1498 = vmatprep.subr.bf16.mxu0 %v8592_v43  ;;  %v8659_v39 = vld [vmem:[#allocation9 + $0x2a0] ss:$16 sps:$4 sm:$0xff]  }
  0xfe   : > { %1541 = vmatprep.subr.bf16.mxu1 %v8595_v44  ;;  %v8665_v43 = vld [vmem:[#allocation9 + $0x280] ss:$16 sps:$4 sm:$0xff]   ;;  %v8670_v44 = vld [vmem:[#allocation9 + $0x64] ss:$16 sps:$4 sm:$0xff]  }
 0x100   : > { %1499 = vmatpush1.bf16.msra.mxu0 %v8590_v48  ;;  %v8668_v48 = vld [vmem:[#allocation9 + $0x60] ss:$16 sps:$4 sm:$0xff]  }
 0x101   : > { %1542 = vmatpush1.bf16.msra.mxu1 %v8593_v49  ;;  %1500 = vmatprep.subr.bf16.mxu0 %v8598_v50  ;;  %v8671_v49 = vld [vmem:[#allocation9 + $0x260] ss:$16 sps:$4 sm:$0xff]   ;;  %v8676_v50 = vld [vmem:[#allocation9 + $0x44] ss:$16 sps:$4 sm:$0xff]  }
 0x102   : > { %1543 = vmatprep.subr.bf16.mxu1 %v8601_v51  ;;  %v8679_v51 = vld [vmem:[#allocation9 + $0x244] ss:$16 sps:$4 sm:$0xff]  }
 0x104   : > { %1501 = vmatpush2.bf16.msra.mxu0 %v8596_v52  ;;  %v8674_v52 = vld [vmem:[#allocation9 + $0x40] ss:$16 sps:$4 sm:$0xff]  }
 0x105   : > { %1544 = vmatpush2.bf16.msra.mxu1 %v8599_v55  ;;  %1502 = vmatprep.subr.bf16.mxu0 %v8604_v56  ;;  %v8677_v55 = vld [vmem:[#allocation9 + $0x240] ss:$16 sps:$4 sm:$0xff]   ;;  %v8682_v56 = vld [vmem:[#allocation9 + $0x24] ss:$16 sps:$4 sm:$0xff]  }
 0x106   : > { %1545 = vmatprep.subr.bf16.mxu1 %v8607_v57  ;;  %v8685_v57 = vld [vmem:[#allocation9 + $0x224] ss:$16 sps:$4 sm:$0xff]  }
 0x108   : > { %1503 = vmatpush2.bf16.msra.mxu0 %v8602_v58  ;;  %v8680_v58 = vld [vmem:[#allocation9 + $0x20] ss:$16 sps:$4 sm:$0xff]  }
 0x109   : > { %1546 = vmatpush2.bf16.msra.mxu1 %v8605_v59  ;;  %1504 = vmatprep.subr.bf16.mxu0 %v8610_v60  ;;  %v8683_v59 = vld [vmem:[#allocation9 + $0x220] ss:$16 sps:$4 sm:$0xff]   ;;  %v8688_v60 = vld [vmem:[#allocation9 + $0x4] ss:$16 sps:$4 sm:$0xff]  }
 0x10a   : > { %1547 = vmatprep.subr.bf16.mxu1 %v8613_v61  ;;  %v8691_v61 = vld [vmem:[#allocation9 + $0x204] ss:$16 sps:$4 sm:$0xff]  }
 0x10c   : > { %1505 = vmatpush2.bf16.msra.mxu0 %v8608_v62  ;;  %v8686_v62 = vld [vmem:[#allocation9] ss:$16 sps:$4 sm:$0xff]  }
 0x10d   : > { %1548 = vmatpush2.bf16.msra.mxu1 %v8611_v63  ;;  %1506 = vmatprep.subr.bf16.mxu0 %v8616_v0  ;;  %v8689_v63 = vld [vmem:[#allocation9 + $0x200] ss:$16 sps:$4 sm:$0xff]   ;;  %v8694_v0 = vld [vmem:[#allocation9 + $0x1e4] ss:$16 sps:$4 sm:$0xff]  }
 0x10e   : > { %1549 = vmatprep.subr.bf16.mxu1 %v8619_v1  ;;  %v8697_v1 = vld [vmem:[#allocation9 + $0x3e4] ss:$16 sps:$4 sm:$0xff]  }
 0x110   : > { %1507 = vmatpush2.bf16.msra.mxu0 %v8614_v2  ;;  %v8692_v2 = vld [vmem:[#allocation9 + $0x1e0] ss:$16 sps:$4 sm:$0xff]  }
 0x111   : > { %1550 = vmatpush2.bf16.msra.mxu1 %v8617_v3  ;;  %1508 = vmatprep.subr.bf16.mxu0 %v8622_v4  ;;  %v8695_v3 = vld [vmem:[#allocation9 + $0x3e0] ss:$16 sps:$4 sm:$0xff]   ;;  %v8700_v4 = vld [vmem:[#allocation9 + $0x1c4] ss:$16 sps:$4 sm:$0xff]  }
 0x112   : > { %1551 = vmatprep.subr.bf16.mxu1 %v8625_v5  ;;  %v8703_v5 = vld [vmem:[#allocation9 + $0x3c4] ss:$16 sps:$4 sm:$0xff]  }
 0x114   : > { %1509 = vmatpush2.bf16.msra.mxu0 %v8620_v6  ;;  %v8698_v6 = vld [vmem:[#allocation9 + $0x1c0] ss:$16 sps:$4 sm:$0xff]  }
 0x115   : > { %1552 = vmatpush2.bf16.msra.mxu1 %v8623_v7  ;;  %1510 = vmatprep.subr.bf16.mxu0 %v8628_v8  ;;  %v8701_v7 = vld [vmem:[#allocation9 + $0x3c0] ss:$16 sps:$4 sm:$0xff]   ;;  %v8706_v8 = vld [vmem:[#allocation9 + $0x1a4] ss:$16 sps:$4 sm:$0xff]  }
 0x116   : > { %1553 = vmatprep.subr.bf16.mxu1 %v8631_v9  ;;  %v8709_v9 = vld [vmem:[#allocation9 + $0x3a4] ss:$16 sps:$4 sm:$0xff]  }
 0x118   : > { %1511 = vmatpush2.bf16.msra.mxu0 %v8626_v10  ;;  %v8704_v10 = vld [vmem:[#allocation9 + $0x1a0] ss:$16 sps:$4 sm:$0xff]  }
 0x119   : > { %1554 = vmatpush2.bf16.msra.mxu1 %v8629_v11  ;;  %1512 = vmatprep.subr.bf16.mxu0 %v8634_v14  ;;  %v8707_v11 = vld [vmem:[#allocation9 + $0x3a0] ss:$16 sps:$4 sm:$0xff]   ;;  %v8712_v14 = vld [vmem:[#allocation9 + $0x184] ss:$16 sps:$4 sm:$0xff]  }
 0x11a   : > { %1555 = vmatprep.subr.bf16.mxu1 %v8637_v15  ;;  %v8715_v15 = vld [vmem:[#allocation9 + $0x384] ss:$16 sps:$4 sm:$0xff]  }
 0x11c   : > { %1513 = vmatpush2.bf16.msra.mxu0 %v8632_v16  ;;  %v8710_v16 = vld [vmem:[#allocation9 + $0x180] ss:$16 sps:$4 sm:$0xff]  }
 0x11d   : > { %1556 = vmatpush2.bf16.msra.mxu1 %v8635_v17  ;;  %1514 = vmatprep.subr.bf16.mxu0 %v8640_v18  ;;  %v8713_v17 = vld [vmem:[#allocation9 + $0x380] ss:$16 sps:$4 sm:$0xff]   ;;  %v8718_v18 = vld [vmem:[#allocation9 + $0x164] ss:$16 sps:$4 sm:$0xff]  }
 0x11e   : > { %1557 = vmatprep.subr.bf16.mxu1 %v8643_v19  ;;  %v8721_v19 = vld [vmem:[#allocation9 + $0x364] ss:$16 sps:$4 sm:$0xff]  }
 0x120   : > { %1515 = vmatpush2.bf16.msra.mxu0 %v8638_v20  ;;  %v8716_v20 = vld [vmem:[#allocation9 + $0x160] ss:$16 sps:$4 sm:$0xff]  }
 0x121   : > { %1558 = vmatpush2.bf16.msra.mxu1 %v8641_v21  ;;  %3106 = vmatprep.subr.bf16.mxu0 %v8646_v26  ;;  %v8719_v21 = vld [vmem:[#allocation9 + $0x360] ss:$16 sps:$4 sm:$0xff]   ;;  %v8730_v26 = vld [vmem:[#allocation9 + $0x124] ss:$16 sps:$4 sm:$0xff]  }
 0x122   : > { %3149 = vmatprep.subr.bf16.mxu1 %v8649_v27  ;;  %v8733_v27 = vld [vmem:[#allocation9 + $0x324] ss:$16 sps:$4 sm:$0xff]  }
 0x123   : > { %1517 = vmatmul.mubr.bf16.vlgmr.msra.gmra.mxu0 %v10072_v28 }
 0x124   : > { %1560 = vmatmul.mubr.bf16.vlgmr.msra.gmra.mxu1 %v10074_v29  ;;  %3107 = vmatpush1.bf16.msra.mxu0 %v8644_v30  ;;  %v8728_v30 = vld [vmem:[#allocation9 + $0x120] ss:$16 sps:$4 sm:$0xff]  }
 0x125   : > { %3150 = vmatpush1.bf16.msra.mxu1 %v8647_v31  ;;  %3108 = vmatprep.subr.bf16.mxu0 %v8652_v32  ;;  %v8731_v31 = vld [vmem:[#allocation9 + $0x320] ss:$16 sps:$4 sm:$0xff]   ;;  %v8736_v32 = vld [vmem:[#allocation9 + $0x104] ss:$16 sps:$4 sm:$0xff]  }
 0x126   : > { %3151 = vmatprep.subr.bf16.mxu1 %v8655_v33  ;;  %3138 = vmatprep.mubr.bf16.mxu0 %v10042_v53  ;;  %v8739_v33 = vld [vmem:[#allocation9 + $0x304] ss:$16 sps:$4 sm:$0xff]  }
 0x127   : > { %3181 = vmatprep.mubr.bf16.mxu1 %v10044_v54 }
 0x128   : > { %3109 = vmatpush1.bf16.msra.mxu0 %v8650_v34  ;;  %v8734_v34 = vld [vmem:[#allocation9 + $0x100] ss:$16 sps:$4 sm:$0xff]  }
 0x129   : > { %3152 = vmatpush1.bf16.msra.mxu1 %v8653_v35  ;;  %3110 = vmatprep.subr.bf16.mxu0 %v8658_v36  ;;  %v8737_v35 = vld [vmem:[#allocation9 + $0x300] ss:$16 sps:$4 sm:$0xff]   ;;  %v8742_v36 = vld [vmem:[#allocation9 + $0x4e4] ss:$16 sps:$4 sm:$0xff]  }
 0x12a   : > { %3153 = vmatprep.subr.bf16.mxu1 %v8661_v37  ;;  %v8745_v37 = vld [vmem:[#allocation9 + $0x6e4] ss:$16 sps:$4 sm:$0xff]  }
 0x12c   : > { %3111 = vmatpush1.bf16.msra.mxu0 %v8656_v38  ;;  %v8740_v38 = vld [vmem:[#allocation9 + $0x4e0] ss:$16 sps:$4 sm:$0xff]  }
 0x12d   : > { %3154 = vmatpush1.bf16.msra.mxu1 %v8659_v39  ;;  %3112 = vmatprep.subr.bf16.mxu0 %v8664_v40  ;;  %v8743_v39 = vld [vmem:[#allocation9 + $0x6e0] ss:$16 sps:$4 sm:$0xff]   ;;  %v8748_v40 = vld [vmem:[#allocation9 + $0x4c4] ss:$16 sps:$4 sm:$0xff]  }
 0x12e   : > { %3155 = vmatprep.subr.bf16.mxu1 %v8667_v41  ;;  %v8751_v41 = vld [vmem:[#allocation9 + $0x6c4] ss:$16 sps:$4 sm:$0xff]  }
 0x130   : > { %3113 = vmatpush1.bf16.msra.mxu0 %v8662_v42  ;;  %v8746_v42 = vld [vmem:[#allocation9 + $0x4c0] ss:$16 sps:$4 sm:$0xff]  }
 0x131   : > { %3156 = vmatpush1.bf16.msra.mxu1 %v8665_v43  ;;  %3114 = vmatprep.subr.bf16.mxu0 %v8670_v44  ;;  %v8749_v43 = vld [vmem:[#allocation9 + $0x6c0] ss:$16 sps:$4 sm:$0xff]   ;;  %v8754_v44 = vld [vmem:[#allocation9 + $0x4a4] ss:$16 sps:$4 sm:$0xff]  }
 0x132   : > { %3157 = vmatprep.subr.bf16.mxu1 %v8673_v46  ;;  %v8757_v46 = vld [vmem:[#allocation9 + $0x6a4] ss:$16 sps:$4 sm:$0xff]  }
 0x134   : > { %3115 = vmatpush1.bf16.msra.mxu0 %v8668_v48  ;;  %v8752_v48 = vld [vmem:[#allocation9 + $0x4a0] ss:$16 sps:$4 sm:$0xff]  }
 0x135   : > { %3158 = vmatpush1.bf16.msra.mxu1 %v8671_v49  ;;  %3116 = vmatprep.subr.bf16.mxu0 %v8676_v50  ;;  %v8755_v49 = vld [vmem:[#allocation9 + $0x6a0] ss:$16 sps:$4 sm:$0xff]   ;;  %v8760_v50 = vld [vmem:[#allocation9 + $0x484] ss:$16 sps:$4 sm:$0xff]  }
 0x136   : > { %3159 = vmatprep.subr.bf16.mxu1 %v8679_v51  ;;  %v8763_v51 = vld [vmem:[#allocation9 + $0x684] ss:$16 sps:$4 sm:$0xff]  }
 0x138   : > { %3117 = vmatpush1.bf16.msra.mxu0 %v8674_v52  ;;  %v8758_v52 = vld [vmem:[#allocation9 + $0x480] ss:$16 sps:$4 sm:$0xff]  }
 0x139   : > { %3160 = vmatpush1.bf16.msra.mxu1 %v8677_v55  ;;  %3118 = vmatprep.subr.bf16.mxu0 %v8682_v56  ;;  %v8761_v55 = vld [vmem:[#allocation9 + $0x680] ss:$16 sps:$4 sm:$0xff]   ;;  %v8766_v56 = vld [vmem:[#allocation9 + $0x464] ss:$16 sps:$4 sm:$0xff]  }
 0x13a   : > { %3161 = vmatprep.subr.bf16.mxu1 %v8685_v57  ;;  %v8769_v57 = vld [vmem:[#allocation9 + $0x664] ss:$16 sps:$4 sm:$0xff]  }
 0x13c   : > { %3119 = vmatpush1.bf16.msra.mxu0 %v8680_v58  ;;  %v8764_v58 = vld [vmem:[#allocation9 + $0x460] ss:$16 sps:$4 sm:$0xff]  }
 0x13d   : > { %3162 = vmatpush1.bf16.msra.mxu1 %v8683_v59  ;;  %3120 = vmatprep.subr.bf16.mxu0 %v8688_v60  ;;  %v8767_v59 = vld [vmem:[#allocation9 + $0x660] ss:$16 sps:$4 sm:$0xff]   ;;  %v8772_v60 = vld [vmem:[#allocation9 + $0x444] ss:$16 sps:$4 sm:$0xff]  }
 0x13e   : > { %3163 = vmatprep.subr.bf16.mxu1 %v8691_v61  ;;  %v8775_v61 = vld [vmem:[#allocation9 + $0x644] ss:$16 sps:$4 sm:$0xff]  }
 0x140   : > { %3121 = vmatpush1.bf16.msra.mxu0 %v8686_v62  ;;  %v8770_v62 = vld [vmem:[#allocation9 + $0x440] ss:$16 sps:$4 sm:$0xff]  }
 0x141   : > { %3164 = vmatpush1.bf16.msra.mxu1 %v8689_v63  ;;  %3122 = vmatprep.subr.bf16.mxu0 %v8694_v0  ;;  %v8773_v63 = vld [vmem:[#allocation9 + $0x640] ss:$16 sps:$4 sm:$0xff]   ;;  %v8778_v0 = vld [vmem:[#allocation9 + $0x424] ss:$16 sps:$4 sm:$0xff]  }
 0x142   : > { %3165 = vmatprep.subr.bf16.mxu1 %v8697_v1  ;;  %v8781_v1 = vld [vmem:[#allocation9 + $0x624] ss:$16 sps:$4 sm:$0xff]  }
 0x144   : > { %3123 = vmatpush2.bf16.msra.mxu0 %v8692_v2  ;;  %v8776_v2 = vld [vmem:[#allocation9 + $0x420] ss:$16 sps:$4 sm:$0xff]  }
 0x145   : > { %3166 = vmatpush2.bf16.msra.mxu1 %v8695_v3  ;;  %3124 = vmatprep.subr.bf16.mxu0 %v8700_v4  ;;  %v8779_v3 = vld [vmem:[#allocation9 + $0x620] ss:$16 sps:$4 sm:$0xff]   ;;  %v8784_v4 = vld [vmem:[#allocation9 + $0x404] ss:$16 sps:$4 sm:$0xff]  }
 0x146   : > { %3167 = vmatprep.subr.bf16.mxu1 %v8703_v5  ;;  %v8787_v5 = vld [vmem:[#allocation9 + $0x604] ss:$16 sps:$4 sm:$0xff]  }
 0x148   : > { %3125 = vmatpush2.bf16.msra.mxu0 %v8698_v6  ;;  %v8782_v6 = vld [vmem:[#allocation9 + $0x400] ss:$16 sps:$4 sm:$0xff]  }
 0x149   : > { %3168 = vmatpush2.bf16.msra.mxu1 %v8701_v7  ;;  %3126 = vmatprep.subr.bf16.mxu0 %v8706_v8  ;;  %v8785_v7 = vld [vmem:[#allocation9 + $0x600] ss:$16 sps:$4 sm:$0xff]   ;;  %v8790_v8 = vld [vmem:[#allocation9 + $0x5e4] ss:$16 sps:$4 sm:$0xff]  }
 0x14a   : > { %3169 = vmatprep.subr.bf16.mxu1 %v8709_v9  ;;  %v8793_v9 = vld [vmem:[#allocation9 + $0x7e4] ss:$16 sps:$4 sm:$0xff]  }
 0x14c   : > { %3127 = vmatpush2.bf16.msra.mxu0 %v8704_v10  ;;  %v8788_v10 = vld [vmem:[#allocation9 + $0x5e0] ss:$16 sps:$4 sm:$0xff]  }
 0x14d   : > { %3170 = vmatpush2.bf16.msra.mxu1 %v8707_v11  ;;  %3128 = vmatprep.subr.bf16.mxu0 %v8712_v14  ;;  %v8791_v11 = vld [vmem:[#allocation9 + $0x7e0] ss:$16 sps:$4 sm:$0xff]   ;;  %v8796_v14 = vld [vmem:[#allocation9 + $0x5c4] ss:$16 sps:$4 sm:$0xff]  }
 0x14e   : > { %3171 = vmatprep.subr.bf16.mxu1 %v8715_v15  ;;  %v8799_v15 = vld [vmem:[#allocation9 + $0x7c4] ss:$16 sps:$4 sm:$0xff]  }
 0x150   : > { %3129 = vmatpush2.bf16.msra.mxu0 %v8710_v16  ;;  %v8794_v16 = vld [vmem:[#allocation9 + $0x5c0] ss:$16 sps:$4 sm:$0xff]  }
 0x151   : > { %3172 = vmatpush2.bf16.msra.mxu1 %v8713_v17  ;;  %3130 = vmatprep.subr.bf16.mxu0 %v8718_v18  ;;  %v8797_v17 = vld [vmem:[#allocation9 + $0x7c0] ss:$16 sps:$4 sm:$0xff]   ;;  %v8802_v18 = vld [vmem:[#allocation9 + $0x5a4] ss:$16 sps:$4 sm:$0xff]  }
 0x152   : > { %3173 = vmatprep.subr.bf16.mxu1 %v8721_v19  ;;  %v8805_v19 = vld [vmem:[#allocation9 + $0x7a4] ss:$16 sps:$4 sm:$0xff]  }
 0x154   : > { %3131 = vmatpush2.bf16.msra.mxu0 %v8716_v20  ;;  %v8800_v20 = vld [vmem:[#allocation9 + $0x5a0] ss:$16 sps:$4 sm:$0xff]  }
 0x155   : > { %3174 = vmatpush2.bf16.msra.mxu1 %v8719_v21  ;;  %3132 = vmatprep.subr.bf16.mxu0 %v8724_v22  ;;  %v8803_v21 = vld [vmem:[#allocation9 + $0x7a0] ss:$16 sps:$4 sm:$0xff]   ;;  %v8808_v22 = vld [vmem:[#allocation9 + $0x584] ss:$16 sps:$4 sm:$0xff]  }
 0x156   : > { %3175 = vmatprep.subr.bf16.mxu1 %v8727_v23  ;;  %v8811_v23 = vld [vmem:[#allocation9 + $0x784] ss:$16 sps:$4 sm:$0xff]  }
 0x158   : > { %3133 = vmatpush2.bf16.msra.mxu0 %v8722_v24  ;;  %v8806_v24 = vld [vmem:[#allocation9 + $0x580] ss:$16 sps:$4 sm:$0xff]  }
 0x159   : > { %3176 = vmatpush2.bf16.msra.mxu1 %v8725_v25  ;;  %3134 = vmatprep.subr.bf16.mxu0 %v8730_v26  ;;  %v8809_v25 = vld [vmem:[#allocation9 + $0x780] ss:$16 sps:$4 sm:$0xff]   ;;  %v8814_v26 = vld [vmem:[#allocation9 + $0x564] ss:$16 sps:$4 sm:$0xff]  }
 0x15a   : > { %3177 = vmatprep.subr.bf16.mxu1 %v8733_v27  ;;  %v8817_v27 = vld [vmem:[#allocation9 + $0x764] ss:$16 sps:$4 sm:$0xff]  }
 0x15c   : > { %3135 = vmatpush2.bf16.msra.mxu0 %v8728_v30  ;;  %v8812_v30 = vld [vmem:[#allocation9 + $0x560] ss:$16 sps:$4 sm:$0xff]  }
 0x15d   : > { %3178 = vmatpush2.bf16.msra.mxu1 %v8731_v31  ;;  %3136 = vmatprep.subr.bf16.mxu0 %v8736_v32  ;;  %v8815_v31 = vld [vmem:[#allocation9 + $0x760] ss:$16 sps:$4 sm:$0xff]   ;;  %v8820_v32 = vld [vmem:[#allocation9 + $0x544] ss:$16 sps:$4 sm:$0xff]  }
 0x15e   : > { %3179 = vmatprep.subr.bf16.mxu1 %v8739_v33  ;;  %v8823_v33 = vld [vmem:[#allocation9 + $0x744] ss:$16 sps:$4 sm:$0xff]  }
 0x160   : > { %3137 = vmatpush2.bf16.msra.mxu0 %v8734_v34  ;;  %v8818_v34 = vld [vmem:[#allocation9 + $0x540] ss:$16 sps:$4 sm:$0xff]  }
 0x161   : > { %3180 = vmatpush2.bf16.msra.mxu1 %v8737_v35  ;;  %3192 = vmatprep.subr.bf16.mxu0 %v8742_v36  ;;  %v8821_v35 = vld [vmem:[#allocation9 + $0x740] ss:$16 sps:$4 sm:$0xff]   ;;  %v8826_v36 = vld [vmem:[#allocation9 + $0x524] ss:$16 sps:$4 sm:$0xff]  }
 0x162   : > { %3235 = vmatprep.subr.bf16.mxu1 %v8745_v37  ;;  %v8829_v37 = vld [vmem:[#allocation9 + $0x724] ss:$16 sps:$4 sm:$0xff]  }
 0x163   : > { %3139 = vmatmul.mubr.bf16.vlgmr.msra.gmra.mxu0 %v10052_v12 }
 0x164   : > { %3182 = vmatmul.mubr.bf16.vlgmr.msra.gmra.mxu1 %v10054_v13  ;;  %3193 = vmatpush1.bf16.msra.mxu0 %v8740_v38  ;;  %v8824_v38 = vld [vmem:[#allocation9 + $0x520] ss:$16 sps:$4 sm:$0xff]  }
 0x165   : > { %3236 = vmatpush1.bf16.msra.mxu1 %v8743_v39  ;;  %3194 = vmatprep.subr.bf16.mxu0 %v8748_v40  ;;  %v8827_v39 = vld [vmem:[#allocation9 + $0x720] ss:$16 sps:$4 sm:$0xff]   ;;  %v8832_v40 = vld [vmem:[#allocation9 + $0x504] ss:$16 sps:$4 sm:$0xff]  }
 0x166   : > { %3237 = vmatprep.subr.bf16.mxu1 %v8751_v41  ;;  %3224 = vmatprep.mubr.bf16.mxu0 %v10061_v45  ;;  %v8835_v41 = vld [vmem:[#allocation9 + $0x704] ss:$16 sps:$4 sm:$0xff]  }
 0x167   : > { %3267 = vmatprep.mubr.bf16.mxu1 %v10064_v47 }
 0x168   : > { %3195 = vmatpush1.bf16.msra.mxu0 %v8746_v42  ;;  %v8830_v42 = vld [vmem:[#allocation9 + $0x500] ss:$16 sps:$4 sm:$0xff]  }
 0x169   : > { %3238 = vmatpush1.bf16.msra.mxu1 %v8749_v43  ;;  %3196 = vmatprep.subr.bf16.mxu0 %v8754_v44  ;;  %v8833_v43 = vld [vmem:[#allocation9 + $0x700] ss:$16 sps:$4 sm:$0xff]   ;;  %v8838_v44 = vld [vmem:[#allocation9 + $0xec] ss:$16 sps:$4 sm:$0xff]  }
 0x16a   : > { %3239 = vmatprep.subr.bf16.mxu1 %v8757_v46  ;;  %v8841_v46 = vld [vmem:[#allocation9 + $0x2ec] ss:$16 sps:$4 sm:$0xff]  }
 0x16c   : > { %3197 = vmatpush1.bf16.msra.mxu0 %v8752_v48  ;;  %v8836_v48 = vld [vmem:[#allocation9 + $0xe8] ss:$16 sps:$4 sm:$0xff]  }
 0x16d   : > { %3240 = vmatpush1.bf16.msra.mxu1 %v8755_v49  ;;  %3198 = vmatprep.subr.bf16.mxu0 %v8760_v50  ;;  %v8839_v49 = vld [vmem:[#allocation9 + $0x2e8] ss:$16 sps:$4 sm:$0xff]   ;;  %v8844_v50 = vld [vmem:[#allocation9 + $0xcc] ss:$16 sps:$4 sm:$0xff]  }
 0x16e   : > { %3241 = vmatprep.subr.bf16.mxu1 %v8763_v51  ;;  %v8847_v51 = vld [vmem:[#allocation9 + $0x2cc] ss:$16 sps:$4 sm:$0xff]  }
 0x170   : > { %3199 = vmatpush1.bf16.msra.mxu0 %v8758_v52 }
 0x171   : > { %3242 = vmatpush1.bf16.msra.mxu1 %v8761_v55  ;;  %3200 = vmatprep.subr.bf16.mxu0 %v8766_v56  ;;  %v8842_v56 = vld [vmem:[#allocation9 + $0xc8] ss:$16 sps:$4 sm:$0xff]  }
 0x172   : > { %3243 = vmatprep.subr.bf16.mxu1 %v8769_v57  ;;  %v8845_v57 = vld [vmem:[#allocation9 + $0x2c8] ss:$16 sps:$4 sm:$0xff]  }
 0x174   : > { %3201 = vmatpush1.bf16.msra.mxu0 %v8764_v58 }
 0x175   : > { %3244 = vmatpush1.bf16.msra.mxu1 %v8767_v59  ;;  %3202 = vmatprep.subr.bf16.mxu0 %v8772_v60  ;;  %v8850_v59 = vld [vmem:[#allocation9 + $0xac] ss:$16 sps:$4 sm:$0xff]  }
 0x176   : > { %3245 = vmatprep.subr.bf16.mxu1 %v8775_v61 }
 0x178   : > { %3203 = vmatpush1.bf16.msra.mxu0 %v8770_v62  ;;  %v8853_v62 = vld [vmem:[#allocation9 + $0x2ac] ss:$16 sps:$4 sm:$0xff]  }
 0x179   : > { %3246 = vmatpush1.bf16.msra.mxu1 %v8773_v63  ;;  %3204 = vmatprep.subr.bf16.mxu0 %v8778_v0  ;;  %v8848_v0 = vld [vmem:[#allocation9 + $0xa8] ss:$16 sps:$4 sm:$0xff]  }
 0x17a   : > { %3247 = vmatprep.subr.bf16.mxu1 %v8781_v1  ;;  %v8851_v1 = vld [vmem:[#allocation9 + $0x2a8] ss:$16 sps:$4 sm:$0xff]  }
 0x17c   : > { %3205 = vmatpush1.bf16.msra.mxu0 %v8776_v2 }
 0x17d   : > { %3248 = vmatpush1.bf16.msra.mxu1 %v8779_v3  ;;  %3206 = vmatprep.subr.bf16.mxu0 %v8784_v4  ;;  %v8856_v4 = vld [vmem:[#allocation9 + $0x8c] ss:$16 sps:$4 sm:$0xff]  }
 0x17e   : > { %3249 = vmatprep.subr.bf16.mxu1 %v8787_v5  ;;  %v8859_v5 = vld [vmem:[#allocation9 + $0x28c] ss:$16 sps:$4 sm:$0xff]  }
 0x180   : > { %3207 = vmatpush1.bf16.msra.mxu0 %v8782_v6 }
 0x181   : > { %3250 = vmatpush1.bf16.msra.mxu1 %v8785_v7  ;;  %3208 = vmatprep.subr.bf16.mxu0 %v8790_v8 }
 0x182   : > { %3251 = vmatprep.subr.bf16.mxu1 %v8793_v9 }
 0x184   : > { %3209 = vmatpush2.bf16.msra.mxu0 %v8788_v10 }
 0x185   : > { %3252 = vmatpush2.bf16.msra.mxu1 %v8791_v11  ;;  %3210 = vmatprep.subr.bf16.mxu0 %v8796_v14  ;;  %v8854_v11 = vld [vmem:[#allocation9 + $0x88] ss:$16 sps:$4 sm:$0xff]   ;;  %v8862_v14 = vld [vmem:[#allocation9 + $0x6c] ss:$16 sps:$4 sm:$0xff]  }
 0x186   : > { %3253 = vmatprep.subr.bf16.mxu1 %v8799_v15 }
 0x188   : > { %3211 = vmatpush2.bf16.msra.mxu0 %v8794_v16  ;;  %v8860_v16 = vld [vmem:[#allocation9 + $0x68] ss:$16 sps:$4 sm:$0xff]  }
 0x189   : > { %3254 = vmatpush2.bf16.msra.mxu1 %v8797_v17  ;;  %3212 = vmatprep.subr.bf16.mxu0 %v8802_v18  ;;  %v8863_v17 = vld [vmem:[#allocation9 + $0x268] ss:$16 sps:$4 sm:$0xff]   ;;  %v8868_v18 = vld [vmem:[#allocation9 + $0x4c] ss:$16 sps:$4 sm:$0xff]  }
 0x18a   : > { %3255 = vmatprep.subr.bf16.mxu1 %v8805_v19  ;;  %v8871_v19 = vld [vmem:[#allocation9 + $0x24c] ss:$16 sps:$4 sm:$0xff]  }
 0x18c   : > { %3213 = vmatpush2.bf16.msra.mxu0 %v8800_v20  ;;  %v8866_v20 = vld [vmem:[#allocation9 + $0x48] ss:$16 sps:$4 sm:$0xff]  }
 0x18d   : > { %3256 = vmatpush2.bf16.msra.mxu1 %v8803_v21  ;;  %3214 = vmatprep.subr.bf16.mxu0 %v8808_v22  ;;  %v8869_v21 = vld [vmem:[#allocation9 + $0x248] ss:$16 sps:$4 sm:$0xff]   ;;  %v8874_v22 = vld [vmem:[#allocation9 + $0x2c] ss:$16 sps:$4 sm:$0xff]  }
 0x18e   : > { %3257 = vmatprep.subr.bf16.mxu1 %v8811_v23  ;;  %v8877_v23 = vld [vmem:[#allocation9 + $0x22c] ss:$16 sps:$4 sm:$0xff]  }
 0x190   : > { %3215 = vmatpush2.bf16.msra.mxu0 %v8806_v24  ;;  %v8872_v24 = vld [vmem:[#allocation9 + $0x28] ss:$16 sps:$4 sm:$0xff]  }
 0x191   : > { %3258 = vmatpush2.bf16.msra.mxu1 %v8809_v25  ;;  %3216 = vmatprep.subr.bf16.mxu0 %v8814_v26  ;;  %v8875_v25 = vld [vmem:[#allocation9 + $0x228] ss:$16 sps:$4 sm:$0xff]   ;;  %v8880_v26 = vld [vmem:[#allocation9 + $0xc] ss:$16 sps:$4 sm:$0xff]  }
 0x192   : > { %3259 = vmatprep.subr.bf16.mxu1 %v8817_v27  ;;  %v8883_v27 = vld [vmem:[#allocation9 + $0x20c] ss:$16 sps:$4 sm:$0xff]  }
 0x194   : > { %3217 = vmatpush2.bf16.msra.mxu0 %v8812_v30  ;;  %v8878_v30 = vld [vmem:[#allocation9 + $0x8] ss:$16 sps:$4 sm:$0xff]  }
 0x195   : > { %3260 = vmatpush2.bf16.msra.mxu1 %v8815_v31  ;;  %3218 = vmatprep.subr.bf16.mxu0 %v8820_v32  ;;  %v8881_v31 = vld [vmem:[#allocation9 + $0x208] ss:$16 sps:$4 sm:$0xff]   ;;  %v8886_v32 = vld [vmem:[#allocation9 + $0x1ec] ss:$16 sps:$4 sm:$0xff]  }
 0x196   : > { %3261 = vmatprep.subr.bf16.mxu1 %v8823_v33  ;;  %v8889_v33 = vld [vmem:[#allocation9 + $0x3ec] ss:$16 sps:$4 sm:$0xff]  }
 0x198   : > { %3219 = vmatpush2.bf16.msra.mxu0 %v8818_v34  ;;  %v8884_v34 = vld [vmem:[#allocation9 + $0x1e8] ss:$16 sps:$4 sm:$0xff]  }
 0x199   : > { %3262 = vmatpush2.bf16.msra.mxu1 %v8821_v35  ;;  %3220 = vmatprep.subr.bf16.mxu0 %v8826_v36  ;;  %v8887_v35 = vld [vmem:[#allocation9 + $0x3e8] ss:$16 sps:$4 sm:$0xff]   ;;  %v8892_v36 = vld [vmem:[#allocation9 + $0x1cc] ss:$16 sps:$4 sm:$0xff]  }
 0x19a   : > { %3263 = vmatprep.subr.bf16.mxu1 %v8829_v37  ;;  %v8895_v37 = vld [vmem:[#allocation9 + $0x3cc] ss:$16 sps:$4 sm:$0xff]  }
 0x19c   : > { %3221 = vmatpush2.bf16.msra.mxu0 %v8824_v38  ;;  %v8890_v38 = vld [vmem:[#allocation9 + $0x1c8] ss:$16 sps:$4 sm:$0xff]  }
 0x19d   : > { %3264 = vmatpush2.bf16.msra.mxu1 %v8827_v39  ;;  %3222 = vmatprep.subr.bf16.mxu0 %v8832_v40  ;;  %v8893_v39 = vld [vmem:[#allocation9 + $0x3c8] ss:$16 sps:$4 sm:$0xff]   ;;  %v8898_v40 = vld [vmem:[#allocation9 + $0x1ac] ss:$16 sps:$4 sm:$0xff]  }
 0x19e   : > { %3265 = vmatprep.subr.bf16.mxu1 %v8835_v41  ;;  %v8901_v41 = vld [vmem:[#allocation9 + $0x3ac] ss:$16 sps:$4 sm:$0xff]  }
 0x1a0   : > { %3223 = vmatpush2.bf16.msra.mxu0 %v8830_v42  ;;  %v8896_v42 = vld [vmem:[#allocation9 + $0x1a8] ss:$16 sps:$4 sm:$0xff]  }
 0x1a1   : > { %3266 = vmatpush2.bf16.msra.mxu1 %v8833_v43  ;;  %3278 = vmatprep.subr.bf16.mxu0 %v8838_v44  ;;  %v8899_v43 = vld [vmem:[#allocation9 + $0x3a8] ss:$16 sps:$4 sm:$0xff]   ;;  %v8904_v44 = vld [vmem:[#allocation9 + $0x18c] ss:$16 sps:$4 sm:$0xff]  }
 0x1a2   : > { %3321 = vmatprep.subr.bf16.mxu1 %v8841_v46  ;;  %v8907_v46 = vld [vmem:[#allocation9 + $0x38c] ss:$16 sps:$4 sm:$0xff]  }
 0x1a3   : > { %v1048_v52 = vpop.f32.mrf.mxu0  ;;  %3225 = vmatmul.mubr.bf16.vlgmr.msra.gmra.mxu0 %v10072_v28 }
 0x1a4   : > { %v1091_v55 = vpop.f32.mrf.mxu1  ;;  %3268 = vmatmul.mubr.bf16.vlgmr.msra.gmra.mxu1 %v10074_v29  ;;  %3279 = vmatpush1.bf16.msra.mxu0 %v8836_v48  ;;  %v8902_v48 = vld [vmem:[#allocation9 + $0x188] ss:$16 sps:$4 sm:$0xff]  }
 0x1a5   : > { %v10086_v58 = vadd.f32 %v1091_v55, %v1048_v52  ;;  %3322 = vmatpush1.bf16.msra.mxu1 %v8839_v49  ;;  %v1050_v60 = vpop.f32.mrf.mxu0  ;;  %3280 = vmatprep.subr.bf16.mxu0 %v8844_v50  ;;  %v8905_v49 = vld [vmem:[#allocation9 + $0x388] ss:$16 sps:$4 sm:$0xff]   ;;  %v8910_v50 = vld [vmem:[#allocation9 + $0x16c] ss:$16 sps:$4 sm:$0xff]  }
 0x1a6   : > { %v1093_v61 = vpop.f32.mrf.mxu1  ;;  %3323 = vmatprep.subr.bf16.mxu1 %v8847_v51  ;;  %3310 = vmatprep.mubr.bf16.mxu0 %v10042_v53  ;;  %v8857_v53 = vld [vmem:[#allocation9 + $0x288] ss:$16 sps:$4 sm:$0xff]   ;;  %v8913_v51 = vld [vmem:[#allocation9 + $0x36c] ss:$16 sps:$4 sm:$0xff]  }
 0x1a7   : > { %v1094_v63 = vadd.f32 %v1093_v61, %v1050_v60  ;;  %3353 = vmatprep.mubr.bf16.mxu1 %v10044_v54  ;;  %v1052_v2 = vpop.f32.mrf.mxu0  ;;  %v8865_v54 = vld [vmem:[#allocation9 + $0x26c] ss:$16 sps:$4 sm:$0xff]   ;;  %v8908_v52 = vld [vmem:[#allocation9 + $0x168] ss:$16 sps:$4 sm:$0xff]  }
 0x1a8   : > { %v1095_v3 = vpop.f32.mrf.mxu1  ;;  %3281 = vmatpush1.bf16.msra.mxu0 %v8842_v56  ;;  %v8911_v55 = vld [vmem:[#allocation9 + $0x368] ss:$16 sps:$4 sm:$0xff]   ;;  %v8916_v56 = vld [vmem:[#allocation9 + $0x14c] ss:$16 sps:$4 sm:$0xff]  }
 0x1a9   : > { %v10091_v6 = vpack.c.bf16 %v1094_v63, %v10086_v58  ;;  %v10093_v7 = vadd.f32 %v1095_v3, %v1052_v2  ;;  %3324 = vmatpush1.bf16.msra.mxu1 %v8845_v57  ;;  %v1054_v8 = vpop.f32.mrf.mxu0  ;;  %3282 = vmatprep.subr.bf16.mxu0 %v8850_v59  ;;  %v8919_v57 = vld [vmem:[#allocation9 + $0x34c] ss:$16 sps:$4 sm:$0xff]   ;;  %v8914_v59 = vld [vmem:[#allocation9 + $0x148] ss:$16 sps:$4 sm:$0xff]  }
 0x1aa   : > { %v1097_v9 = vpop.f32.mrf.mxu1  ;;  %3325 = vmatprep.subr.bf16.mxu1 %v8853_v62  ;;  %v8917_v60 = vld [vmem:[#allocation9 + $0x348] ss:$16 sps:$4 sm:$0xff]   ;;  %v8922_v61 = vld [vmem:[#allocation9 + $0x12c] ss:$16 sps:$4 sm:$0xff]  }
 0x1ab   : > { %v1098_v10 = vadd.f32 %v1097_v9, %v1054_v8  ;;  %v8925_v62 = vld [vmem:[#allocation9 + $0x32c] ss:$16 sps:$4 sm:$0xff]   ;;  %v8920_v63 = vld [vmem:[#allocation9 + $0x128] ss:$16 sps:$4 sm:$0xff]  }
 0x1ac   : > { %3283 = vmatpush1.bf16.msra.mxu0 %v8848_v0  ;;  %v8923_v0 = vld [vmem:[#allocation9 + $0x328] ss:$16 sps:$4 sm:$0xff]   ;;  %v8931_v2 = vld [vmem:[#allocation9 + $0x30c] ss:$16 sps:$4 sm:$0xff]  }
 0x1ad   : > { %v10096_v15 = vpack.c.bf16 %v1098_v10, %v10093_v7  ;;  %3326 = vmatpush1.bf16.msra.mxu1 %v8851_v1  ;;  %3284 = vmatprep.subr.bf16.mxu0 %v8856_v4  ;;  %v8928_v1 = vld [vmem:[#allocation9 + $0x10c] ss:$16 sps:$4 sm:$0xff]   ;;  %v8926_v3 = vld [vmem:[#allocation9 + $0x108] ss:$16 sps:$4 sm:$0xff]  }
 0x1ae   : > { %3327 = vmatprep.subr.bf16.mxu1 %v8859_v5  ;;  %v8929_v4 = vld [vmem:[#allocation9 + $0x308] ss:$16 sps:$4 sm:$0xff]   ;;  %v8934_v5 = vld [vmem:[#allocation9 + $0x4ec] ss:$16 sps:$4 sm:$0xff]  }
 0x1af   : > { %v8937_v8 = vld [vmem:[#allocation9 + $0x6ec] ss:$16 sps:$4 sm:$0xff]   ;;  %v8932_v9 = vld [vmem:[#allocation9 + $0x4e8] ss:$16 sps:$4 sm:$0xff]  }
 0x1b0   : > { %3285 = vmatpush1.bf16.msra.mxu0 %v8854_v11  ;;  %v8935_v10 = vld [vmem:[#allocation9 + $0x6e8] ss:$16 sps:$4 sm:$0xff]   ;;  %v8940_v11 = vld [vmem:[#allocation9 + $0x4cc] ss:$16 sps:$4 sm:$0xff]  }
 0x1b1   : > { %3328 = vmatpush1.bf16.msra.mxu1 %v8857_v53  ;;  %3286 = vmatprep.subr.bf16.mxu0 %v8862_v14  ;;  %v8943_v53 = vld [vmem:[#allocation9 + $0x6cc] ss:$16 sps:$4 sm:$0xff]   ;;  %v8938_v14 = vld [vmem:[#allocation9 + $0x4c8] ss:$16 sps:$4 sm:$0xff]  }
 0x1b2   : > { %3329 = vmatprep.subr.bf16.mxu1 %v8865_v54  ;;  %v8941_v54 = vld [vmem:[#allocation9 + $0x6c8] ss:$16 sps:$4 sm:$0xff]  }
 0x1b4   : > { %3287 = vmatpush1.bf16.msra.mxu0 %v8860_v16 }
 0x1b5   : > { %3330 = vmatpush1.bf16.msra.mxu1 %v8863_v17  ;;  %3288 = vmatprep.subr.bf16.mxu0 %v8868_v18  ;;  %v8946_v18 = vld [vmem:[#allocation9 + $0x4ac] ss:$16 sps:$4 sm:$0xff]  }
 0x1b6   : > { %3331 = vmatprep.subr.bf16.mxu1 %v8871_v19  ;;  %v8949_v19 = vld [vmem:[#allocation9 + $0x6ac] ss:$16 sps:$4 sm:$0xff]  }
 0x1b8   : > { %3289 = vmatpush1.bf16.msra.mxu0 %v8866_v20 }
 0x1b9   : > { %3332 = vmatpush1.bf16.msra.mxu1 %v8869_v21  ;;  %3290 = vmatprep.subr.bf16.mxu0 %v8874_v22  ;;  %v8944_v22 = vld [vmem:[#allocation9 + $0x4a8] ss:$16 sps:$4 sm:$0xff]  }
 0x1ba   : > { %3333 = vmatprep.subr.bf16.mxu1 %v8877_v23  ;;  %v8947_v23 = vld [vmem:[#allocation9 + $0x6a8] ss:$16 sps:$4 sm:$0xff]  }
 0x1bc   : > { %3291 = vmatpush1.bf16.msra.mxu0 %v8872_v24 }
 0x1bd   : > { %3334 = vmatpush1.bf16.msra.mxu1 %v8875_v25  ;;  %3292 = vmatprep.subr.bf16.mxu0 %v8880_v26  ;;  %v8952_v25 = vld [vmem:[#allocation9 + $0x48c] ss:$16 sps:$4 sm:$0xff]  }
 0x1be   : > { %3335 = vmatprep.subr.bf16.mxu1 %v8883_v27  ;;  %v8955_v26 = vld [vmem:[#allocation9 + $0x68c] ss:$16 sps:$4 sm:$0xff]  }
 0x1c0   : > { %3293 = vmatpush1.bf16.msra.mxu0 %v8878_v30  ;;  %v8950_v30 = vld [vmem:[#allocation9 + $0x488] ss:$16 sps:$4 sm:$0xff]  }
 0x1c1   : > { %3336 = vmatpush1.bf16.msra.mxu1 %v8881_v31  ;;  %3294 = vmatprep.subr.bf16.mxu0 %v8886_v32  ;;  %v8953_v31 = vld [vmem:[#allocation9 + $0x688] ss:$16 sps:$4 sm:$0xff]   ;;  %v8958_v32 = vld [vmem:[#allocation9 + $0x46c] ss:$16 sps:$4 sm:$0xff]  }
 0x1c2   : > { %3337 = vmatprep.subr.bf16.mxu1 %v8889_v33  ;;  %v8961_v33 = vld [vmem:[#allocation9 + $0x66c] ss:$16 sps:$4 sm:$0xff]  }
 0x1c4   : > { %3295 = vmatpush2.bf16.msra.mxu0 %v8884_v34  ;;  %v8964_v34 = vld [vmem:[#allocation9 + $0x44c] ss:$16 sps:$4 sm:$0xff]  }
 0x1c5   : > { %3338 = vmatpush2.bf16.msra.mxu1 %v8887_v35  ;;  %3296 = vmatprep.subr.bf16.mxu0 %v8892_v36  ;;  %v8967_v35 = vld [vmem:[#allocation9 + $0x64c] ss:$16 sps:$4 sm:$0xff]   ;;  %v8962_v36 = vld [vmem:[#allocation9 + $0x448] ss:$16 sps:$4 sm:$0xff]  }
 0x1c6   : > { %3339 = vmatprep.subr.bf16.mxu1 %v8895_v37  ;;  %v8965_v37 = vld [vmem:[#allocation9 + $0x648] ss:$16 sps:$4 sm:$0xff]  }
 0x1c8   : > { %3297 = vmatpush2.bf16.msra.mxu0 %v8890_v38  ;;  %v8970_v38 = vld [vmem:[#allocation9 + $0x42c] ss:$16 sps:$4 sm:$0xff]  }
 0x1c9   : > { %3340 = vmatpush2.bf16.msra.mxu1 %v8893_v39  ;;  %3298 = vmatprep.subr.bf16.mxu0 %v8898_v40  ;;  %v8973_v39 = vld [vmem:[#allocation9 + $0x62c] ss:$16 sps:$4 sm:$0xff]   ;;  %v8968_v40 = vld [vmem:[#allocation9 + $0x428] ss:$16 sps:$4 sm:$0xff]  }
 0x1ca   : > { %3341 = vmatprep.subr.bf16.mxu1 %v8901_v41  ;;  %v8971_v41 = vld [vmem:[#allocation9 + $0x628] ss:$16 sps:$4 sm:$0xff]  }
 0x1cc   : > { %3299 = vmatpush2.bf16.msra.mxu0 %v8896_v42  ;;  %v8976_v42 = vld [vmem:[#allocation9 + $0x40c] ss:$16 sps:$4 sm:$0xff]  }
 0x1cd   : > { %3342 = vmatpush2.bf16.msra.mxu1 %v8899_v43  ;;  %3300 = vmatprep.subr.bf16.mxu0 %v8904_v44  ;;  %v8979_v43 = vld [vmem:[#allocation9 + $0x60c] ss:$16 sps:$4 sm:$0xff]   ;;  %v8974_v44 = vld [vmem:[#allocation9 + $0x408] ss:$16 sps:$4 sm:$0xff]  }
 0x1ce   : > { %3343 = vmatprep.subr.bf16.mxu1 %v8907_v46  ;;  %v8977_v46 = vld [vmem:[#allocation9 + $0x608] ss:$16 sps:$4 sm:$0xff]  }
 0x1d0   : > { %3301 = vmatpush2.bf16.msra.mxu0 %v8902_v48  ;;  %v8982_v48 = vld [vmem:[#allocation9 + $0x5ec] ss:$16 sps:$4 sm:$0xff]  }
 0x1d1   : > { %3344 = vmatpush2.bf16.msra.mxu1 %v8905_v49  ;;  %3302 = vmatprep.subr.bf16.mxu0 %v8910_v50  ;;  %v8985_v49 = vld [vmem:[#allocation9 + $0x7ec] ss:$16 sps:$4 sm:$0xff]   ;;  %v8980_v50 = vld [vmem:[#allocation9 + $0x5e8] ss:$16 sps:$4 sm:$0xff]  }
 0x1d2   : > { %3345 = vmatprep.subr.bf16.mxu1 %v8913_v51  ;;  %v8983_v51 = vld [vmem:[#allocation9 + $0x7e8] ss:$16 sps:$4 sm:$0xff]  }
 0x1d4   : > { %3303 = vmatpush2.bf16.msra.mxu0 %v8908_v52  ;;  %v8988_v52 = vld [vmem:[#allocation9 + $0x5cc] ss:$16 sps:$4 sm:$0xff]  }
 0x1d5   : > { %3346 = vmatpush2.bf16.msra.mxu1 %v8911_v55  ;;  %3304 = vmatprep.subr.bf16.mxu0 %v8916_v56  ;;  %v8991_v55 = vld [vmem:[#allocation9 + $0x7cc] ss:$16 sps:$4 sm:$0xff]   ;;  %v8986_v56 = vld [vmem:[#allocation9 + $0x5c8] ss:$16 sps:$4 sm:$0xff]  }
 0x1d6   : > { %3347 = vmatprep.subr.bf16.mxu1 %v8919_v57  ;;  %v8989_v57 = vld [vmem:[#allocation9 + $0x7c8] ss:$16 sps:$4 sm:$0xff]  }
 0x1d8   : > { %3305 = vmatpush2.bf16.msra.mxu0 %v8914_v59  ;;  %v8994_v59 = vld [vmem:[#allocation9 + $0x5ac] ss:$16 sps:$4 sm:$0xff]  }
 0x1d9   : > { %3348 = vmatpush2.bf16.msra.mxu1 %v8917_v60  ;;  %3306 = vmatprep.subr.bf16.mxu0 %v8922_v61  ;;  %v8997_v60 = vld [vmem:[#allocation9 + $0x7ac] ss:$16 sps:$4 sm:$0xff]   ;;  %v8992_v61 = vld [vmem:[#allocation9 + $0x5a8] ss:$16 sps:$4 sm:$0xff]  }
 0x1da   : > { %3349 = vmatprep.subr.bf16.mxu1 %v8925_v62  ;;  %v8995_v62 = vld [vmem:[#allocation9 + $0x7a8] ss:$16 sps:$4 sm:$0xff]  }
 0x1dc   : > { %3307 = vmatpush2.bf16.msra.mxu0 %v8920_v63  ;;  %v9000_v63 = vld [vmem:[#allocation9 + $0x58c] ss:$16 sps:$4 sm:$0xff]  }
 0x1dd   : > { %3350 = vmatpush2.bf16.msra.mxu1 %v8923_v0  ;;  %3308 = vmatprep.subr.bf16.mxu0 %v8928_v1  ;;  %v9003_v0 = vld [vmem:[#allocation9 + $0x78c] ss:$16 sps:$4 sm:$0xff]   ;;  %v8998_v1 = vld [vmem:[#allocation9 + $0x588] ss:$16 sps:$4 sm:$0xff]  }
 0x1de   : > { %3351 = vmatprep.subr.bf16.mxu1 %v8931_v2  ;;  %v9001_v2 = vld [vmem:[#allocation9 + $0x788] ss:$16 sps:$4 sm:$0xff]  }
 0x1e0   : > { %3309 = vmatpush2.bf16.msra.mxu0 %v8926_v3  ;;  %v9006_v3 = vld [vmem:[#allocation9 + $0x56c] ss:$16 sps:$4 sm:$0xff]  }
 0x1e1   : > { %3352 = vmatpush2.bf16.msra.mxu1 %v8929_v4  ;;  %3364 = vmatprep.subr.bf16.mxu0 %v8934_v5  ;;  %v9009_v4 = vld [vmem:[#allocation9 + $0x76c] ss:$16 sps:$4 sm:$0xff]   ;;  %v9004_v5 = vld [vmem:[#allocation9 + $0x568] ss:$16 sps:$4 sm:$0xff]  }
 0x1e2   : > { %3407 = vmatprep.subr.bf16.mxu1 %v8937_v8  ;;  %v9007_v8 = vld [vmem:[#allocation9 + $0x768] ss:$16 sps:$4 sm:$0xff]  }
 0x1e3   : > { %v10098_v16 = vpop.f32.mrf.mxu0  ;;  %3311 = vmatmul.mubr.bf16.vlgmr.msra.gmra.mxu0 %v10052_v12 }
 0x1e4   : > { %v10100_v17 = vpop.f32.mrf.mxu1  ;;  %3354 = vmatmul.mubr.bf16.vlgmr.msra.gmra.mxu1 %v10054_v13  ;;  %3365 = vmatpush1.bf16.msra.mxu0 %v8932_v9  ;;  %v9012_v9 = vld [vmem:[#allocation9 + $0x54c] ss:$16 sps:$4 sm:$0xff]  }
 0x1e5   : > { %3408 = vmatpush1.bf16.msra.mxu1 %v8935_v10  ;;  %v10104_v20 = vpop.f32.mrf.mxu0  ;;  %3366 = vmatprep.subr.bf16.mxu0 %v8940_v11  ;;  %v9015_v10 = vld [vmem:[#allocation9 + $0x74c] ss:$16 sps:$4 sm:$0xff]   ;;  %v9010_v11 = vld [vmem:[#allocation9 + $0x548] ss:$16 sps:$4 sm:$0xff]  }
 0x1e6   : > { %v10106_v21 = vpop.f32.mrf.mxu1  ;;  %3409 = vmatprep.subr.bf16.mxu1 %v8943_v53  ;;  %3396 = vmatprep.mubr.bf16.mxu0 %v10061_v45  ;;  %v8956_v45 = vld [vmem:[#allocation9 + $0x468] ss:$16 sps:$4 sm:$0xff]  }
 0x1e7   : > { %3439 = vmatprep.mubr.bf16.mxu1 %v10064_v47  ;;  %v1522_v24 = vpop.f32.mrf.mxu0  ;;  %v8959_v47 = vld [vmem:[#allocation9 + $0x668] ss:$16 sps:$4 sm:$0xff]  }
 0x1e8   : > { %v1565_v12 = vpop.f32.mrf.mxu1  ;;  %3367 = vmatpush1.bf16.msra.mxu0 %v8938_v14  ;;  %v9013_v53 = vld [vmem:[#allocation9 + $0x748] ss:$16 sps:$4 sm:$0xff]   ;;  %v9018_v14 = vld [vmem:[#allocation9 + $0x52c] ss:$16 sps:$4 sm:$0xff]  }
 0x1e9   : > { %v10110_v13 = vadd.f32 %v1565_v12, %v1522_v24  ;;  %3410 = vmatpush1.bf16.msra.mxu1 %v8941_v54  ;;  %3368 = vmatprep.subr.bf16.mxu0 %v8946_v18  ;;  %v9021_v54 = vld [vmem:[#allocation9 + $0x72c] ss:$16 sps:$4 sm:$0xff]   ;;  %v1524_v18 = vpop.f32.mrf.mxu0 }
 0x1ea   : > { %3411 = vmatprep.subr.bf16.mxu1 %v8949_v19  ;;  %v1567_v19 = vpop.f32.mrf.mxu1  ;;  %v9024_v24 = vld [vmem:[#allocation9 + $0x50c] ss:$16 sps:$4 sm:$0xff]  }
 0x1eb   : > { %v7996_v27 = vpack.c.bf16 %v10110_v13, %v10110_v13  ;;  %v9027_v12 = vld [vmem:[#allocation9 + $0x70c] ss:$16 sps:$4 sm:$0xff]  }
 0x1ec   : > { %3369 = vmatpush1.bf16.msra.mxu0 %v8944_v22  ;;  %v9016_v22 = vld [vmem:[#allocation9 + $0x528] ss:$16 sps:$4 sm:$0xff]  }
 0x1ed   : > { %3412 = vmatpush1.bf16.msra.mxu1 %v8947_v23  ;;  %3752 = vrot.lane.b32.xlu1 %v7996_v27, %s9776_s18  ;;  %v9019_v23 = vld [vmem:[#allocation9 + $0x728] ss:$16 sps:$4 sm:$0xff]   ;;  %v1568_v27 = vadd.f32 %v1567_v19, %v1524_v18 }
 0x1ee   : > { %3370 = vmatprep.subr.bf16.mxu0 %v8952_v25  ;;  %3413 = vmatprep.subr.bf16.mxu1 %v8955_v26  ;;  %v10117_v25 = vadd.f32 %v10100_v17, %v10098_v16  ;;  %v1564_v26 = vadd.f32 %v10106_v21, %v10104_v20  ;;  %v9777_v16 = vmov 0.0  }
 0x1f0   : > { %3371 = vmatpush1.bf16.msra.mxu0 %v8950_v30  ;;  %v9022_v30 = vld [vmem:[#allocation9 + $0x508] ss:$16 sps:$4 sm:$0xff]  }
 0x1f1   : > { %3414 = vmatpush1.bf16.msra.mxu1 %v8953_v31  ;;  %3372 = vmatprep.subr.bf16.mxu0 %v8958_v32  ;;  %v9025_v31 = vld [vmem:[#allocation9 + $0x708] ss:$16 sps:$4 sm:$0xff]   ;;  %v10122_v32 = vpack.c.bf16 %v1564_v26, %v10117_v25 }
 0x1f2   : > { %3415 = vmatprep.subr.bf16.mxu1 %v8961_v33  ;;  %v10125_v33 = vpack.c.bf16 %v1568_v27, %v10110_v13 }
 0x1f3   : > { %v3485_v17 = vsel %vm3480_vm0, %v10122_v32, 0 }
 0x1f4   : > { %3373 = vmatpush1.bf16.msra.mxu0 %v8956_v45  ;;  %v3531_v20 = vsel %vm3480_vm0, %v10125_v33, 0 }
 0x1f5   : > { %3416 = vmatpush1.bf16.msra.mxu1 %v8959_v47  ;;  %3374 = vmatprep.subr.bf16.mxu0 %v8964_v34 }
 0x1f6   : > { %3417 = vmatprep.subr.bf16.mxu1 %v8967_v35 }
 0x1f8   : > { %3375 = vmatpush1.bf16.msra.mxu0 %v8962_v36 }
 0x1f9   : > { %3418 = vmatpush1.bf16.msra.mxu1 %v8965_v37  ;;  %3376 = vmatprep.subr.bf16.mxu0 %v8970_v38 }
 0x1fa   : > { %3419 = vmatprep.subr.bf16.mxu1 %v8973_v39 }
 0x1fc   : > { %3377 = vmatpush1.bf16.msra.mxu0 %v8968_v40 }
 0x1fd   : > { %3420 = vmatpush1.bf16.msra.mxu1 %v8971_v41  ;;  %3378 = vmatprep.subr.bf16.mxu0 %v8976_v42 }
 0x1fe   : > { %3421 = vmatprep.subr.bf16.mxu1 %v8979_v43 }
 0x200   : > { %3379 = vmatpush1.bf16.msra.mxu0 %v8974_v44 }
 0x201   : > { %3422 = vmatpush1.bf16.msra.mxu1 %v8977_v46  ;;  %3380 = vmatprep.subr.bf16.mxu0 %v8982_v48 }
 0x202   : > { %3423 = vmatprep.subr.bf16.mxu1 %v8985_v49 }
 0x204   : > { %3381 = vmatpush2.bf16.msra.mxu0 %v8980_v50 }
 0x205   : > { %3424 = vmatpush2.bf16.msra.mxu1 %v8983_v51  ;;  %3382 = vmatprep.subr.bf16.mxu0 %v8988_v52 }
 0x206   : > { %3425 = vmatprep.subr.bf16.mxu1 %v8991_v55 }
 0x208   : > { %3383 = vmatpush2.bf16.msra.mxu0 %v8986_v56 }
 0x209   : > { %3426 = vmatpush2.bf16.msra.mxu1 %v8989_v57  ;;  %3384 = vmatprep.subr.bf16.mxu0 %v8994_v59 }
 0x20a   : > { %3427 = vmatprep.subr.bf16.mxu1 %v8997_v60 }
 0x20c   : > { %3385 = vmatpush2.bf16.msra.mxu0 %v8992_v61 }
 0x20d   : > { %3428 = vmatpush2.bf16.msra.mxu1 %v8995_v62  ;;  %3386 = vmatprep.subr.bf16.mxu0 %v9000_v63 }
 0x20e   : > { %3429 = vmatprep.subr.bf16.mxu1 %v9003_v0 }
 0x210   : > { %3387 = vmatpush2.bf16.msra.mxu0 %v8998_v1 }
 0x211   : > { %3430 = vmatpush2.bf16.msra.mxu1 %v9001_v2  ;;  %3388 = vmatprep.subr.bf16.mxu0 %v9006_v3 }
 0x212   : > { %3431 = vmatprep.subr.bf16.mxu1 %v9009_v4 }
 0x214   : > { %3389 = vmatpush2.bf16.msra.mxu0 %v9004_v5 }
 0x215   : > { %3432 = vmatpush2.bf16.msra.mxu1 %v9007_v8  ;;  %3390 = vmatprep.subr.bf16.mxu0 %v9012_v9 }
 0x216   : > { %3433 = vmatprep.subr.bf16.mxu1 %v9015_v10 }
 0x218   : > { %3391 = vmatpush2.bf16.msra.mxu0 %v9010_v11 }
 0x219   : > { %3434 = vmatpush2.bf16.msra.mxu1 %v9013_v53  ;;  %3392 = vmatprep.subr.bf16.mxu0 %v9018_v14 }
 0x21a   : > { %3435 = vmatprep.subr.bf16.mxu1 %v9021_v54 }
 0x21c   : > { %3393 = vmatpush2.bf16.msra.mxu0 %v9016_v22 }
 0x21d   : > { %3436 = vmatpush2.bf16.msra.mxu1 %v9019_v23  ;;  %3394 = vmatprep.subr.bf16.mxu0 %v9024_v24 }
 0x21e   : > { %3437 = vmatprep.subr.bf16.mxu1 %v9027_v12 }
 0x220   : > { %3395 = vmatpush2.bf16.msra.mxu0 %v9022_v30 }
 0x221   : > { %3438 = vmatpush2.bf16.msra.mxu1 %v9025_v31  ;;  %8121 = vmatprep.subr.bf16.mxu0 %v9777_v16 }
 0x222   : > { %8127 = vmatprep.subr.bf16.mxu1 %v9777_v16 }
 0x223   : > { %3397 = vmatmul.mubr.bf16.vlgmr.msra.gmra.mxu0 %v10072_v28  ;;  %v3140_v28 = vpop.f32.mrf.mxu0 }
 0x224   : > { %3440 = vmatmul.mubr.bf16.vlgmr.msra.gmra.mxu1 %v10074_v29  ;;  %8122 = vmatpush3.bf16.xpose.msra.mxu0 %v3485_v17  ;;  %v3183_v29 = vpop.f32.mrf.mxu1 }
 0x225   : > { %8128 = vmatpush3.bf16.xpose.msra.mxu1 %v3531_v20  ;;  %8123 = vmatprep.mubr.msk.bf16.mxu0 %vm9778_vm1, %v9777_v16  ;;  %v3142_v21 = vpop.f32.mrf.mxu0  ;;  %v3184_v36 = vadd.f32 %v3183_v29, %v3140_v28 }
 0x226   : > { %8129 = vmatprep.mubr.msk.bf16.mxu1 %vm9778_vm1, %v9777_v16  ;;  %8133 = vmatprep.subr.bf16.mxu0 %v9777_v16  ;;  %v3185_v13 = vpop.f32.mrf.mxu1 }
 0x227   : > { %8139 = vmatprep.subr.bf16.mxu1 %v9777_v16  ;;  %v3144_v45 = vpop.f32.mrf.mxu0  ;;  %v3186_v39 = vadd.f32 %v3185_v13, %v3142_v21 }
 0x228   : > { %v3187_v47 = vpop.f32.mrf.mxu1 }
 0x229   : > { %v3146_v34 = vpop.f32.mrf.mxu0  ;;  %v3188_v43 = vadd.f32 %v3187_v47, %v3144_v45 }
 0x22a   : > { %v3189_v35 = vpop.f32.mrf.mxu1 }
 0x22b   : > { %8124 = vmatmul.mubr.msk.bf16.vlgmr.msra.gmra.mxu0 %vm3480_vm0, %v10091_v6  ;;  %v3190_v49 = vadd.f32 %v3189_v35, %v3146_v34 }
 0x22c   : > { %8130 = vmatmul.mubr.msk.bf16.vlgmr.msra.gmra.mxu1 %vm3480_vm0, %v10096_v15  ;;  %8135 = vmatprep.mubr.msk.bf16.mxu0 %vm9778_vm1, %v9777_v16 }
 0x22d   : > { %8141 = vmatprep.mubr.msk.bf16.mxu1 %vm9778_vm1, %v9777_v16 }
 0x263   : > { %v3226_v37 = vpop.f32.mrf.mxu0 }
 0x264   : > { %v3269_v38 = vpop.f32.mrf.mxu1  ;;  %v3227_v40 = vadd.f32 %v3226_v37, %v3184_v36 }
 0x265   : > { %v3228_v41 = vpop.f32.mrf.mxu0 }
 0x266   : > { %v3271_v42 = vpop.f32.mrf.mxu1  ;;  %v3229_v44 = vadd.f32 %v3228_v41, %v3186_v39  ;;  %v10149_v50 = vadd.f32 %v3269_v38, %v3227_v40 }
 0x267   : > { %v3230_v46 = vpop.f32.mrf.mxu0 }
 0x268   : > { %v3273_v48 = vpop.f32.mrf.mxu1  ;;  %v10151_v51 = vadd.f32 %v3271_v42, %v3229_v44  ;;  %v3231_v52 = vadd.f32 %v3230_v46, %v3188_v43  ;;  %v7994_v42 = vpack.c.bf16 %v10117_v25, %v10117_v25  ;;  %v7993_v25 = vpack.c.bf16 %v10086_v58, %v10086_v58 }
 0x269   : > { %v3232_v55 = vpop.f32.mrf.mxu0 }
 0x26a   : > { %v10155_v56 = vpack.c.bf16 %v10151_v51, %v10149_v50  ;;  %v3233_v57 = vadd.f32 %v3232_v55, %v3190_v49  ;;  %v3275_v59 = vpop.f32.mrf.mxu1  ;;  %v10157_v60 = vadd.f32 %v3273_v48, %v3231_v52 }
 0x26c   : > { %v10159_v61 = vadd.f32 %v3275_v59, %v3233_v57  ;;  %v3603_v62 = vsel %vm3601_vm2, %v10155_v56, 0 }
 0x26d   : > { %8134 = vmatpush3.bf16.msra.mxu0 %v3603_v62 }
 0x26e   : > { %v10165_v63 = vpack.c.bf16 %v10159_v61, %v10157_v60  ;;  %8145 = vmatprep.subr.bf16.mxu0 %v9777_v16 }
 0x270   : > { %v3649_v0 = vsel %vm3601_vm2, %v10165_v63, 0 }
 0x271   : > { %8140 = vmatpush3.bf16.msra.mxu1 %v3649_v0  ;;  %v7995_v0 = vpack.c.bf16 %v10093_v7, %v10093_v7 }
 0x272   : > { %8151 = vmatprep.subr.bf16.mxu1 %v9777_v16 }
 0x2a3   : > { %v3312_v1 = vpop.f32.mrf.mxu0 }
 0x2a4   : > { %v3355_v2 = vpop.f32.mrf.mxu1 }
 0x2a5   : > { %v3356_v3 = vadd.f32 %v3355_v2, %v3312_v1  ;;  %v3314_v4 = vpop.f32.mrf.mxu0  ;;  %v3753_v1 = vpop.permute.xlu1 %3752 }
 0x2a6   : > { %v3357_v5 = vpop.f32.mrf.mxu1 }
 0x2a7   : > { %v3358_v8 = vadd.f32 %v3357_v5, %v3314_v4  ;;  %v3316_v9 = vpop.f32.mrf.mxu0 }
 0x2a8   : > { %v3359_v10 = vpop.f32.mrf.mxu1 }
 0x2a9   : > { %v3360_v11 = vadd.f32 %v3359_v10, %v3316_v9  ;;  %v3318_v53 = vpop.f32.mrf.mxu0 }
 0x2aa   : > { %v3361_v14 = vpop.f32.mrf.mxu1 }
 0x2ab   : > { %v3362_v54 = vadd.f32 %v3361_v14, %v3318_v53  ;;  %v3758_v53 = vsel %vm3480_vm0, %v3753_v1, 0 }
 0x2e3   : > { %v3398_v18 = vpop.f32.mrf.mxu0 }
 0x2e4   : > { %v3441_v19 = vpop.f32.mrf.mxu1  ;;  %v3399_v22 = vadd.f32 %v3398_v18, %v3356_v3 }
 0x2e5   : > { %v3400_v23 = vpop.f32.mrf.mxu0 }
 0x2e6   : > { %v3443_v24 = vpop.f32.mrf.mxu1  ;;  %v10171_v12 = vadd.f32 %v3441_v19, %v3399_v22  ;;  %v3401_v26 = vadd.f32 %v3400_v23, %v3358_v8 }
 0x2e7   : > { %v3402_v27 = vpop.f32.mrf.mxu0 }
 0x2e8   : > { %v3445_v30 = vpop.f32.mrf.mxu1  ;;  %v10173_v31 = vadd.f32 %v3443_v24, %v3401_v26  ;;  %v3403_v17 = vadd.f32 %v3402_v27, %v3360_v11 }
 0x2e9   : > { %v3404_v20 = vpop.f32.mrf.mxu0 }
 0x2ea   : > { %v3447_v28 = vpop.f32.mrf.mxu1  ;;  %v10175_v29 = vadd.f32 %v3445_v30, %v3403_v17  ;;  %v3405_v21 = vadd.f32 %v3404_v20, %v3362_v54 }
 0x2eb   : > { %v3521_v13 = vpop.f32.mrf.mxu0 }
 0x2ec   : > { %v3567_v45 = vpop.f32.mrf.mxu1  ;;  %v10177_v47 = vadd.f32 %v3447_v28, %v3405_v21  ;;  %v3574_v34 = vsel %vm3573_vm3, %v3521_v13, -inf }
 0x2ed   : > { %3575 = vmax.xlane.f32.xlu0 %v3574_v34  ;;  %v8125_v35 = vpop.f32.mrf.mxu0  ;;  %v3577_v39 = vsel %vm3573_vm3, %v3567_v45, -inf }
 0x2ee   : > { %v8131_v36 = vpop.f32.mrf.mxu1 }
 0x2ef   : > { %v3524_v37 = vpop.f32.mrf.mxu0 }
 0x2f0   : > { %v3570_v38 = vpop.f32.mrf.mxu1 }
 0x2f1   : > { %v8126_v40 = vpop.f32.mrf.mxu0  ;;  %3578 = vmax.xlane.f32.xlu0 %v3577_v39 }
 0x2f2   : > { %v8132_v41 = vpop.f32.mrf.mxu1  ;;  %v7998_v40 = vpack.c.bf16 %v10157_v60, %v10157_v60 }
 0x307   : > { %3700 = vrot.lane.b32.xlu0 %v7994_v42, %s9776_s18 }
 0x376   : > { %v3576_v43 = vpop.xlane.xlu0 %3575 }
 0x377   : > { %v3580_v44 = vsub.f32 %v3521_v13, %v3576_v43 }
 0x379   : > { %v3582_v46 = vmul.f32 1.442695, %v3580_v44 }
 0x37a   : > { %v3579_v48 = vpop.xlane.xlu0 %3578 }
 0x37b   : > { %9368 = vpow2.f32 %v3582_v46  ;;  %v3581_v49 = vsub.f32 %v3567_v45, %v3579_v48 }
 0x37d   : > { %v3584_v52 = vmul.f32 1.442695, %v3581_v49 }
 0x37e   : > { %v3701_v8 = vpop.permute.xlu0 %3700 }
 0x37f   : > { %9370 = vpow2.f32 %v3584_v52  ;;  %v3706_v11 = vsel %vm3480_vm0, %v3701_v8, 0  ;;  %v3940_v8 = vrot.slane %v10122_v32, 4 }
 0x388   : > { %v9369_v55 = vpop.eup %9368 }
 0x389   : > { %v3586_v57 = vsel %vm3573_vm3, %v9369_v55, 0.0 }
 0x38a   : > { %3587 = vadd.xlane.f32.xlu1 %v3586_v57 }
 0x38c   : > { %v9371_v59 = vpop.eup %9370 }
 0x38d   : > { %v3589_v62 = vsel %vm3573_vm3, %v9371_v59, 0.0 }
 0x38e   : > { %3590 = vadd.xlane.f32.xlu1 %v3589_v62 }
 0x39f   : > { %3697 = vrot.lane.b32.xlu1 %v7993_v25, %s9776_s18  ;;  %v7997_v25 = vpack.c.bf16 %v10149_v50, %v10149_v50 }
 0x3a3   : > { %3749 = vrot.lane.b32.xlu1 %v7995_v0, %s9776_s18 }
 0x413   : > { %v3588_v2 = vpop.xlane.xlu1 %3587 }
 0x414   : > { %9372 = vrcp.f32 %v3588_v2 }
 0x417   : > { %v3591_v3 = vpop.xlane.xlu1 %3590 }
 0x418   : > { %9374 = vrcp.f32 %v3591_v3 }
 0x41b   : > { %v3698_v14 = vpop.permute.xlu1 %3697 }
 0x41f   : > { %v3750_v54 = vpop.permute.xlu1 %3749 }
 0x421   : > { %v9373_v4 = vpop.eup %9372 }
 0x422   : > { %v3594_v5 = vmul.f32 %v9373_v4, %v9369_v55 }
 0x424   : > { %v3596_v9 = vpack.c.bf16 %v3594_v5, %v3594_v5 }
 0x425   : > { %v9375_v10 = vpop.eup %9374 }
 0x426   : > { %8136 = vmatmul.mubr.msk.bf16.vlgmr.msra.gmra.mxu0 %vm3573_vm3, %v3596_v9  ;;  %v3595_v58 = vmul.f32 %v9375_v10, %v9371_v59 }
 0x427   : > { %8146 = vmatpush3.bf16.xpose.msra.mxu0 %v3706_v11  ;;  %8147 = vmatprep.mubr.msk.bf16.mxu0 %vm9778_vm1, %v9777_v16  ;;  %v3945_v11 = vsel %vm3480_vm0, %v3940_v8, 0 }
 0x428   : > { %v3597_v7 = vpack.c.bf16 %v3595_v58, %v3595_v58  ;;  %8157 = vmatprep.subr.bf16.mxu0 %v9777_v16 }
 0x42a   : > { %8142 = vmatmul.mubr.msk.bf16.vlgmr.msra.gmra.mxu1 %vm3573_vm3, %v3597_v7  ;;  %v3988_v7 = vrot.slane %v10125_v33, 4 }
 0x42b   : > { %8152 = vmatpush3.bf16.xpose.msra.mxu1 %v3758_v53  ;;  %8153 = vmatprep.mubr.msk.bf16.mxu1 %vm9778_vm1, %v9777_v16 }
 0x42c   : > { %8163 = vmatprep.subr.bf16.mxu1 %v9777_v16 }
 0x42e   : > { %8148 = vmatmul.mubr.msk.bf16.vlgmr.msra.gmra.mxu0 %vm3480_vm0, %v3698_v14  ;;  %v3993_v14 = vsel %vm3480_vm0, %v3988_v7, 0 }
 0x42f   : > { %8159 = vmatprep.mubr.msk.bf16.mxu0 %vm9778_vm1, %v9777_v16 }
 0x432   : > { %8154 = vmatmul.mubr.msk.bf16.vlgmr.msra.gmra.mxu1 %vm3480_vm0, %v3750_v54  ;;  %v4059_v54 = vrot.slane %v10155_v56, 4 }
 0x433   : > { %8165 = vmatprep.mubr.msk.bf16.mxu1 %vm9778_vm1, %v9777_v16 }
 0x4e6   : > { %v3639_v18 = vpop.f32.mrf.mxu0 }
 0x4e7   : > { %v3691_v19 = vpack.c.bf16 %v3639_v18, %v3639_v18  ;;  %v3939_v18 = vrot.slane %v10091_v6, 4 }
 0x4e8   : > { %v8137_v22 = vpop.f32.mrf.mxu0 }
 0x4e9   : > { %3694 = vst.msk [vmem:[#allocation2] sm:$0xf] %vm3693_vm4, %v3691_v19  ;;  %v4064_v19 = vsel %vm3601_vm2, %v4059_v54, 0  ;;  %v4106_v22 = vrot.slane %v10165_v63, 4 }
 0x4ea   : > { %v3642_v23 = vpop.f32.mrf.mxu0  ;;  %v3685_v24 = vpop.f32.mrf.mxu1 }
 0x4eb   : > { %v3692_v26 = vpack.c.bf16 %v3685_v24, %v3685_v24  ;;  %v3987_v23 = vrot.slane %v10096_v15, 4  ;;  %v4111_v24 = vsel %vm3601_vm2, %v4106_v22, 0 }
 0x4ec   : > { %v8138_v27 = vpop.f32.mrf.mxu0  ;;  %v8143_v30 = vpop.f32.mrf.mxu1 }
 0x4ed   : > { %3695 = vst.msk [vmem:[#allocation2 + $0x8] sm:$0xf] %vm3693_vm4, %v3692_v26 }
 0x4ee   : > { %v3688_v17 = vpop.f32.mrf.mxu1  ;;  %v3742_v20 = vpop.f32.mrf.mxu0 }
 0x4ef   : > { %v3800_v28 = vsel %vm3573_vm3, %v3742_v20, -inf }
 0x4f0   : > { %3801 = vmax.xlane.f32.xlu0 %v3800_v28  ;;  %v8144_v21 = vpop.f32.mrf.mxu1  ;;  %v8149_v13 = vpop.f32.mrf.mxu0 }
 0x4f2   : > { %v3745_v45 = vpop.f32.mrf.mxu0  ;;  %v3794_v34 = vpop.f32.mrf.mxu1 }
 0x4f3   : > { %v3803_v35 = vsel %vm3573_vm3, %v3794_v34, -inf }
 0x4f4   : > { %v8150_v36 = vpop.f32.mrf.mxu0  ;;  %3804 = vmax.xlane.f32.xlu1 %v3803_v35  ;;  %v8155_v37 = vpop.f32.mrf.mxu1 }
 0x4f6   : > { %v3797_v38 = vpop.f32.mrf.mxu1 }
 0x4f8   : > { %v8156_v39 = vpop.f32.mrf.mxu1 }
 0x505   : > { %3874 = vrot.lane.b32.xlu1 %v7998_v40, %s9776_s18 }
 0x579   : > { %v3802_v41 = vpop.xlane.xlu0 %3801 }
 0x57a   : > { %v3806_v42 = vsub.f32 %v3742_v20, %v3802_v41 }
 0x57c   : > { %v3808_v43 = vmul.f32 1.442695, %v3806_v42 }
 0x57d   : > { %v3805_v44 = vpop.xlane.xlu1 %3804 }
 0x57e   : > { %9376 = vpow2.f32 %v3808_v43  ;;  %v3807_v46 = vsub.f32 %v3794_v34, %v3805_v44 }
 0x580   : > { %v3810_v48 = vmul.f32 1.442695, %v3807_v46 }
 0x581   : > { %v3875_v49 = vpop.permute.xlu1 %3874 }
 0x582   : > { %9378 = vpow2.f32 %v3810_v48  ;;  %v3880_v52 = vsel %vm3601_vm2, %v3875_v49, 0 }
 0x583   : > { %8164 = vmatpush3.bf16.msra.mxu1 %v3880_v52 }
 0x584   : > { %8175 = vmatprep.subr.bf16.mxu1 %v9777_v16 }
 0x58b   : > { %v9377_v55 = vpop.eup %9376 }
 0x58c   : > { %v3812_v57 = vsel %vm3573_vm3, %v9377_v55, 0.0 }
 0x58d   : > { %3813 = vadd.xlane.f32.xlu0 %v3812_v57 }
 0x58f   : > { %v9379_v59 = vpop.eup %9378 }
 0x590   : > { %v3815_v62 = vsel %vm3573_vm3, %v9379_v59, 0.0 }
 0x591   : > { %3816 = vadd.xlane.f32.xlu0 %v3815_v62 }
 0x5a7   : > { %3825 = vrot.lane.b32.xlu0 %v7997_v25, %s9776_s18 }
 0x616   : > { %v3814_v0 = vpop.xlane.xlu0 %3813 }
 0x617   : > { %9380 = vrcp.f32 %v3814_v0 }
 0x61a   : > { %v3817_v1 = vpop.xlane.xlu0 %3816 }
 0x61b   : > { %9382 = vrcp.f32 %v3817_v1 }
 0x61e   : > { %v3826_v2 = vpop.permute.xlu0 %3825 }
 0x61f   : > { %v3831_v3 = vsel %vm3601_vm2, %v3826_v2, 0 }
 0x620   : > { %8158 = vmatpush3.bf16.msra.mxu0 %v3831_v3 }
 0x621   : > { %8169 = vmatprep.subr.bf16.mxu0 %v9777_v16 }
 0x624   : > { %v9381_v4 = vpop.eup %9380 }
 0x625   : > { %v3820_v5 = vmul.f32 %v9381_v4, %v9377_v55 }
 0x627   : > { %v3822_v9 = vpack.c.bf16 %v3820_v5, %v3820_v5 }
 0x628   : > { %v9383_v10 = vpop.eup %9382 }
 0x629   : > { %8160 = vmatmul.mubr.msk.bf16.vlgmr.msra.gmra.mxu0 %vm3573_vm3, %v3822_v9  ;;  %v3821_v58 = vmul.f32 %v9383_v10, %v9379_v59 }
 0x62a   : > { %8170 = vmatpush3.bf16.xpose.msra.mxu0 %v3945_v11  ;;  %8171 = vmatprep.mubr.msk.bf16.mxu0 %vm9778_vm1, %v9777_v16 }
 0x62b   : > { %v3823_v53 = vpack.c.bf16 %v3821_v58, %v3821_v58  ;;  %8181 = vmatprep.subr.bf16.mxu0 %v9777_v16 }
 0x62d   : > { %8166 = vmatmul.mubr.msk.bf16.vlgmr.msra.gmra.mxu1 %vm3573_vm3, %v3823_v53 }
 0x62e   : > { %8176 = vmatpush3.bf16.xpose.msra.mxu1 %v3993_v14  ;;  %8177 = vmatprep.mubr.msk.bf16.mxu1 %vm9778_vm1, %v9777_v16 }
 0x62f   : > { %8187 = vmatprep.subr.bf16.mxu1 %v9777_v16 }
 0x631   : > { %8172 = vmatmul.mubr.msk.bf16.vlgmr.msra.gmra.mxu0 %vm3480_vm0, %v3939_v18 }
 0x632   : > { %8182 = vmatpush3.bf16.msra.mxu0 %v4064_v19  ;;  %8183 = vmatprep.mubr.msk.bf16.mxu0 %vm9778_vm1, %v9777_v16 }
 0x633   : > { %8193 = vmatprep.subr.bf16.mxu0 %v9777_v16 }
 0x635   : > { %8178 = vmatmul.mubr.msk.bf16.vlgmr.msra.gmra.mxu1 %vm3480_vm0, %v3987_v23 }
 0x636   : > { %8188 = vmatpush3.bf16.msra.mxu1 %v4111_v24  ;;  %8189 = vmatprep.mubr.msk.bf16.mxu1 %vm9778_vm1, %v9777_v16 }
 0x637   : > { %8199 = vmatprep.subr.bf16.mxu1 %v9777_v16 }
 0x6e9   : > { %v10250_v26 = vpop.f32.mrf.mxu0 }
 0x6eb   : > { %v8161_v27 = vpop.f32.mrf.mxu0 }
 0x6ed   : > { %v3870_v30 = vpop.f32.mrf.mxu0  ;;  %v10252_v17 = vpop.f32.mrf.mxu1 }
 0x6ef   : > { %v8162_v20 = vpop.f32.mrf.mxu0  ;;  %v8167_v28 = vpop.f32.mrf.mxu1 }
 0x6f1   : > { %v3919_v21 = vpop.f32.mrf.mxu1  ;;  %v3981_v13 = vpop.f32.mrf.mxu0 }
 0x6f2   : > { %v4035_v45 = vsel %vm3573_vm3, %v3981_v13, -inf }
 0x6f3   : > { %4036 = vmax.xlane.f32.xlu1 %v4035_v45  ;;  %v8168_v34 = vpop.f32.mrf.mxu1  ;;  %v8173_v35 = vpop.f32.mrf.mxu0 }
 0x6f5   : > { %v3984_v36 = vpop.f32.mrf.mxu0  ;;  %v4029_v37 = vpop.f32.mrf.mxu1 }
 0x6f6   : > { %v4038_v38 = vsel %vm3573_vm3, %v4029_v37, -inf }
 0x6f7   : > { %v8174_v39 = vpop.f32.mrf.mxu0  ;;  %4039 = vmax.xlane.f32.xlu0 %v4038_v38  ;;  %v8179_v40 = vpop.f32.mrf.mxu1 }
 0x6f8   : > { %v7999_v40 = vpack.c.bf16 %v10250_v26, %v10250_v26 }
 0x6f9   : > { %v4032_v41 = vpop.f32.mrf.mxu1 }
 0x6fa   : > { %v8000_v41 = vpack.c.bf16 %v10252_v17, %v10252_v17 }
 0x6fb   : > { %v8180_v42 = vpop.f32.mrf.mxu1 }
 0x704   : > { %4212 = vrot.lane.b32.xlu1 %v10125_v33, %s9776_s18 }
 0x708   : > { %4157 = vrot.lane.b32.xlu1 %v10091_v6, %s9776_s18 }
 0x77c   : > { %v4037_v43 = vpop.xlane.xlu1 %4036 }
 0x77d   : > { %v4041_v44 = vsub.f32 %v3981_v13, %v4037_v43 }
 0x77f   : > { %v4043_v46 = vmul.f32 1.442695, %v4041_v44 }
 0x780   : > { %v4040_v48 = vpop.xlane.xlu0 %4039  ;;  %v4213_v6 = vpop.permute.xlu1 %4212 }
 0x781   : > { %9384 = vpow2.f32 %v4043_v46  ;;  %v4042_v49 = vsub.f32 %v4029_v37, %v4040_v48  ;;  %v4214_v9 = vrot.slane %v4213_v6, 4 }
 0x783   : > { %v4045_v52 = vmul.f32 1.442695, %v4042_v49  ;;  %v4219_v11 = vsel %vm3480_vm0, %v4214_v9, 0 }
 0x784   : > { %v4158_v33 = vpop.permute.xlu1 %4157 }
 0x785   : > { %9386 = vpow2.f32 %v4045_v52  ;;  %v4159_v58 = vrot.slane %v4158_v33, 4 }
 0x78e   : > { %v9385_v55 = vpop.eup %9384 }
 0x78f   : > { %v4047_v57 = vsel %vm3573_vm3, %v9385_v55, 0.0 }
 0x790   : > { %4048 = vadd.xlane.f32.xlu0 %v4047_v57 }
 0x792   : > { %v9387_v59 = vpop.eup %9386 }
 0x793   : > { %v4050_v62 = vsel %vm3573_vm3, %v9387_v59, 0.0 }
 0x794   : > { %4051 = vadd.xlane.f32.xlu1 %v4050_v62 }
 0x7a5   : > { %4209 = vrot.lane.b32.xlu1 %v10096_v15, %s9776_s18 }
 0x7a6   : > { %4160 = vrot.lane.b32.xlu0 %v10122_v32, %s9776_s18 }
 0x819   : > { %v4049_v25 = vpop.xlane.xlu0 %4048 }
 0x81a   : > { %9388 = vrcp.f32 %v4049_v25 }
 0x81d   : > { %v4052_v0 = vpop.xlane.xlu1 %4051  ;;  %v4161_v1 = vpop.permute.xlu0 %4160 }
 0x81e   : > { %9390 = vrcp.f32 %v4052_v0  ;;  %v4162_v3 = vrot.slane %v4161_v1, 4 }
 0x820   : > { %v4167_v10 = vsel %vm3480_vm0, %v4162_v3, 0 }
 0x821   : > { %v4210_v7 = vpop.permute.xlu1 %4209 }
 0x822   : > { %v4211_v53 = vrot.slane %v4210_v7, 4  ;;  %v9034_v7 = vld [vmem:[#allocation10 + $0x50] ss:$8 sps:$4 sm:$0xff]  }
 0x827   : > { %v9389_v2 = vpop.eup %9388 }
 0x828   : > { %v4055_v4 = vmul.f32 %v9389_v2, %v9385_v55 }
 0x82a   : > { %v4057_v5 = vpack.c.bf16 %v4055_v4, %v4055_v4 }
 0x82b   : > { %v9391_v8 = vpop.eup %9390 }
 0x82c   : > { %8184 = vmatmul.mubr.msk.bf16.vlgmr.msra.gmra.mxu0 %vm3573_vm3, %v4057_v5  ;;  %v4056_v15 = vmul.f32 %v9391_v8, %v9387_v59 }
 0x82d   : > { %8194 = vmatpush3.bf16.xpose.msra.mxu0 %v4167_v10  ;;  %8195 = vmatprep.mubr.msk.bf16.mxu0 %vm9778_vm1, %v9777_v16 }
 0x82e   : > { %v4058_v32 = vpack.c.bf16 %v4056_v15, %v4056_v15  ;;  %8205 = vmatprep.subr.bf16.mxu0 %v9777_v16  ;;  %v9030_v15 = vld [vmem:[#allocation10 + $0x74] ss:$8 sps:$4 sm:$0xff]  }
 0x830   : > { %8190 = vmatmul.mubr.msk.bf16.vlgmr.msra.gmra.mxu1 %vm3573_vm3, %v4058_v32  ;;  %v9033_v32 = vld [vmem:[#allocation10 + $0x64] ss:$8 sps:$4 sm:$0xff]  }
 0x831   : > { %8200 = vmatpush3.bf16.xpose.msra.mxu1 %v4219_v11  ;;  %8201 = vmatprep.mubr.msk.bf16.mxu1 %vm9778_vm1, %v9777_v16  ;;  %v9031_v11 = vld [vmem:[#allocation10 + $0x60] ss:$8 sps:$4 sm:$0xff]  }
 0x832   : > { %8211 = vmatprep.subr.bf16.mxu1 %v9777_v16 }
 0x834   : > { %8196 = vmatmul.mubr.msk.bf16.vlgmr.msra.gmra.mxu0 %vm3480_vm0, %v4159_v58  ;;  %v9036_v58 = vld [vmem:[#allocation10 + $0x54] ss:$8 sps:$4 sm:$0xff]  }
 0x835   : > { %8207 = vmatprep.mubr.msk.bf16.mxu0 %vm9778_vm1, %v9777_v16 }
 0x838   : > { %8202 = vmatmul.mubr.msk.bf16.vlgmr.msra.gmra.mxu1 %vm3480_vm0, %v4211_v53  ;;  %v9039_v53 = vld [vmem:[#allocation10 + $0x44] ss:$8 sps:$4 sm:$0xff]  }
 0x839   : > { %8213 = vmatprep.mubr.msk.bf16.mxu1 %vm9778_vm1, %v9777_v16 }
 0x8ec   : > { %v4100_v14 = vpop.f32.mrf.mxu0 }
 0x8ed   : > { %v4153_v54 = vpack.c.bf16 %v4100_v14, %v4100_v14  ;;  %v9037_v14 = vld [vmem:[#allocation10 + $0x40] ss:$8 sps:$4 sm:$0xff]  }
 0x8ee   : > { %v8185_v18 = vpop.f32.mrf.mxu0 }
 0x8ef   : > { %4155 = vst.msk [vmem:[#allocation2 + $0x4] sm:$0xf] %vm3693_vm4, %v4153_v54  ;;  %v9042_v54 = vld [vmem:[#allocation10 + $0x34] ss:$8 sps:$4 sm:$0xff]   ;;  %v9040_v18 = vld [vmem:[#allocation10 + $0x30] ss:$8 sps:$4 sm:$0xff]  }
 0x8f0   : > { %v4103_v19 = vpop.f32.mrf.mxu0  ;;  %v4147_v22 = vpop.f32.mrf.mxu1 }
 0x8f1   : > { %v4154_v23 = vpack.c.bf16 %v4147_v22, %v4147_v22  ;;  %v9045_v19 = vld [vmem:[#allocation10 + $0x24] ss:$8 sps:$4 sm:$0xff]   ;;  %v9043_v22 = vld [vmem:[#allocation10 + $0x20] ss:$8 sps:$4 sm:$0xff]  }
 0x8f2   : > { %v8186_v24 = vpop.f32.mrf.mxu0  ;;  %v8191_v27 = vpop.f32.mrf.mxu1 }
 0x8f3   : > { %4156 = vst.msk [vmem:[#allocation2 + $0xc] sm:$0xf] %vm3693_vm4, %v4154_v23  ;;  %v9048_v23 = vld [vmem:[#allocation10 + $0x14] ss:$8 sps:$4 sm:$0xff]   ;;  %v9046_v24 = vld [vmem:[#allocation10 + $0x10] ss:$8 sps:$4 sm:$0xff]  }
 0x8f4   : > { %v4150_v30 = vpop.f32.mrf.mxu1  ;;  %v4203_v20 = vpop.f32.mrf.mxu0  ;;  %v9051_v27 = vld [vmem:[#allocation10 + $0x4] ss:$8 sps:$4 sm:$0xff]  }
 0x8f5   : > { %v4261_v28 = vsel %vm3573_vm3, %v4203_v20, -inf  ;;  %v9049_v30 = vld [vmem:[#allocation10] ss:$8 sps:$4 sm:$0xff]  }
 0x8f6   : > { %4262 = vmax.xlane.f32.xlu0 %v4261_v28  ;;  %v8192_v21 = vpop.f32.mrf.mxu1  ;;  %v8197_v13 = vpop.f32.mrf.mxu0  ;;  %v9052_v28 = vld [vmem:[#allocation10 + $0xf0] ss:$8 sps:$4 sm:$0xff]  }
 0x8f7   : > { %v9057_v21 = vld [vmem:[#allocation10 + $0xe4] ss:$8 sps:$4 sm:$0xff]   ;;  %v9055_v13 = vld [vmem:[#allocation10 + $0xe0] ss:$8 sps:$4 sm:$0xff]  }
 0x8f8   : > { %v4206_v45 = vpop.f32.mrf.mxu0  ;;  %v4255_v34 = vpop.f32.mrf.mxu1 }
 0x8f9   : > { %v4264_v35 = vsel %vm3573_vm3, %v4255_v34, -inf  ;;  %v9060_v45 = vld [vmem:[#allocation10 + $0xd4] ss:$8 sps:$4 sm:$0xff]  }
 0x8fa   : > { %v8198_v36 = vpop.f32.mrf.mxu0  ;;  %4265 = vmax.xlane.f32.xlu1 %v4264_v35  ;;  %v8203_v37 = vpop.f32.mrf.mxu1  ;;  %v9063_v35 = vld [vmem:[#allocation10 + $0xc4] ss:$8 sps:$4 sm:$0xff]  }
 0x8fb   : > { %v9061_v36 = vld [vmem:[#allocation10 + $0xc0] ss:$8 sps:$4 sm:$0xff]   ;;  %v9066_v37 = vld [vmem:[#allocation10 + $0xb4] ss:$8 sps:$4 sm:$0xff]  }
 0x8fc   : > { %v4258_v38 = vpop.f32.mrf.mxu1 }
 0x8fd   : > { %v9064_v38 = vld [vmem:[#allocation10 + $0xb0] ss:$8 sps:$4 sm:$0xff]  }
 0x8fe   : > { %v8204_v39 = vpop.f32.mrf.mxu1 }
 0x8ff   : > { %v9067_v39 = vld [vmem:[#allocation10 + $0xa0] ss:$8 sps:$4 sm:$0xff]  }
 0x90b   : > { %4334 = vrot.lane.b32.xlu1 %v10165_v63, %s9776_s18 }
 0x90f   : > { %3930 = vrot.lane.b32.xlu1 %v7999_v40, %s9776_s18  ;;  %v9069_v40 = vld [vmem:[#allocation10 + $0xa4] ss:$8 sps:$4 sm:$0xff]  }
 0x913   : > { %3932 = vrot.lane.b32.xlu1 %v8000_v41, %s9776_s18  ;;  %v9070_v41 = vld [vmem:[#allocation10 + $0x90] ss:$8 sps:$4 sm:$0xff]  }
 0x97f   : > { %v4263_v42 = vpop.xlane.xlu0 %4262 }
 0x980   : > { %v4267_v43 = vsub.f32 %v4203_v20, %v4263_v42  ;;  %v9054_v20 = vld [vmem:[#allocation10 + $0xf4] ss:$8 sps:$4 sm:$0xff]  }
 0x981   : > { %v9072_v42 = vld [vmem:[#allocation10 + $0x94] ss:$8 sps:$4 sm:$0xff]  }
 0x982   : > { %v4269_v44 = vmul.f32 1.442695, %v4267_v43  ;;  %v9075_v43 = vld [vmem:[#allocation10 + $0x84] ss:$8 sps:$4 sm:$0xff]  }
 0x983   : > { %v4266_v46 = vpop.xlane.xlu1 %4265 }
 0x984   : > { %9392 = vpow2.f32 %v4269_v44  ;;  %v4268_v48 = vsub.f32 %v4255_v34, %v4266_v46  ;;  %v9058_v34 = vld [vmem:[#allocation10 + $0xd0] ss:$8 sps:$4 sm:$0xff]   ;;  %v9073_v44 = vld [vmem:[#allocation10 + $0x80] ss:$8 sps:$4 sm:$0xff]  }
 0x986   : > { %v4271_v49 = vmul.f32 1.442695, %v4268_v48 }
 0x987   : > { %v4335_v52 = vpop.permute.xlu1 %4334 }
 0x988   : > { %9394 = vpow2.f32 %v4271_v49  ;;  %v4336_v63 = vrot.slane %v4335_v52, 4 }
 0x98a   : > { %v4341_v26 = vsel %vm3601_vm2, %v4336_v63, 0 }
 0x98b   : > { %8212 = vmatpush3.bf16.msra.mxu1 %v4341_v26  ;;  %v3931_v55 = vpop.permute.xlu1 %3930 }
 0x98c   : > { %3937 = vst.msk [vmem:[#allocation2] sm:$0xf] %vm3936_vm5, %v3931_v55 }
 0x98f   : > { %v3933_v17 = vpop.permute.xlu1 %3932 }
 0x990   : > { %3938 = vst.msk [vmem:[#allocation2 + $0x8] sm:$0xf] %vm3936_vm5, %v3933_v17 }
 0x991   : > { %v9393_v57 = vpop.eup %9392 }
 0x992   : > { %v4273_v59 = vsel %vm3573_vm3, %v9393_v57, 0.0 }
 0x993   : > { %4274 = vadd.xlane.f32.xlu0 %v4273_v59 }
 0x995   : > { %v9395_v62 = vpop.eup %9394 }
 0x996   : > { %v4276_v6 = vsel %vm3573_vm3, %v9395_v62, 0.0 }
 0x997   : > { %4277 = vadd.xlane.f32.xlu0 %v4276_v6 }
 0x9ad   : > { %4285 = vrot.lane.b32.xlu0 %v10155_v56, %s9776_s18  ;;  %v9028_v56 = vld [vmem:[#allocation10 + $0x70] ss:$8 sps:$4 sm:$0xff]  }
 0xa1c   : > { %v4275_v33 = vpop.xlane.xlu0 %4274 }
 0xa1d   : > { %9396 = vrcp.f32 %v4275_v33  ;;  %v9076_v33 = vld [vmem:[#allocation2] ss:$8 sps:$4 sm:$0xff]  }
 0xa20   : > { %v4278_v25 = vpop.xlane.xlu0 %4277 }
 0xa21   : > { %9398 = vrcp.f32 %v4278_v25 }
 0xa24   : > { %v4286_v0 = vpop.permute.xlu0 %4285 }
 0xa25   : > { %v4287_v1 = vrot.slane %v4286_v0, 4 }
 0xa27   : > { %v4292_v2 = vsel %vm3601_vm2, %v4287_v1, 0 }
 0xa28   : > { %8206 = vmatpush3.bf16.msra.mxu0 %v4292_v2 }
 0xa29   : > { %4603 = vmatprep.subr.bf16.mxu0 %v9030_v15  ;;  %v9081_v15 = vld [vmem:[#allocation12 + $0xe4] ss:$16 sps:$4 sm:$0xff]  }
 0xa2a   : > { %v9397_v3 = vpop.eup %9396  ;;  %5089 = vmatprep.subr.bf16.mxu1 %v9081_v15  ;;  %v9148_v15 = vld [vmem:[#allocation12 + $0x188] ss:$16 sps:$4 sm:$0xff]  }
 0xa2b   : > { %v4281_v4 = vmul.f32 %v9397_v3, %v9393_v57 }
 0xa2d   : > { %v4283_v5 = vpack.c.bf16 %v4281_v4, %v4281_v4 }
 0xa2e   : > { %v9399_v8 = vpop.eup %9398 }
 0xa2f   : > { %8208 = vmatmul.mubr.msk.bf16.vlgmr.msra.gmra.mxu0 %vm3573_vm3, %v4283_v5  ;;  %v4282_v9 = vmul.f32 %v9399_v8, %v9395_v62 }
 0xa30   : > { %4604 = vmatpush1.bf16.msra.mxu0 %v9028_v56 }
 0xa31   : > { %v4284_v10 = vpack.c.bf16 %v4282_v9, %v4282_v9  ;;  %4605 = vmatprep.subr.bf16.mxu0 %v9033_v32  ;;  %v9084_v32 = vld [vmem:[#allocation12 + $0xec] ss:$16 sps:$4 sm:$0xff]  }
 0xa33   : > { %8214 = vmatmul.mubr.msk.bf16.vlgmr.msra.gmra.mxu1 %vm3573_vm3, %v4284_v10 }
 0xa34   : > { %4606 = vmatpush1.bf16.msra.mxu0 %v9031_v11  ;;  %v9087_v11 = vld [vmem:[#allocation12 + $0xc4] ss:$16 sps:$4 sm:$0xff]  }
 0xa35   : > { %4607 = vmatprep.subr.bf16.mxu0 %v9036_v58  ;;  %v9090_v58 = vld [vmem:[#allocation12 + $0xcc] ss:$16 sps:$4 sm:$0xff]  }
 0xa38   : > { %4608 = vmatpush1.bf16.msra.mxu0 %v9034_v7  ;;  %v9085_v7 = vld [vmem:[#allocation12 + $0xc0] ss:$16 sps:$4 sm:$0xff]  }
 0xa39   : > { %4609 = vmatprep.subr.bf16.mxu0 %v9039_v53  ;;  %v9096_v53 = vld [vmem:[#allocation12 + $0xac] ss:$16 sps:$4 sm:$0xff]  }
 0xa3c   : > { %4610 = vmatpush1.bf16.msra.mxu0 %v9037_v14  ;;  %v9091_v14 = vld [vmem:[#allocation12 + $0xa0] ss:$16 sps:$4 sm:$0xff]  }
 0xa3d   : > { %4611 = vmatprep.subr.bf16.mxu0 %v9042_v54  ;;  %v9094_v54 = vld [vmem:[#allocation12 + $0xa8] ss:$16 sps:$4 sm:$0xff]  }
 0xa40   : > { %4612 = vmatpush1.bf16.msra.mxu0 %v9040_v18  ;;  %v9099_v18 = vld [vmem:[#allocation12 + $0x84] ss:$16 sps:$4 sm:$0xff]  }
 0xa41   : > { %4613 = vmatprep.subr.bf16.mxu0 %v9045_v19  ;;  %v9102_v19 = vld [vmem:[#allocation12 + $0x8c] ss:$16 sps:$4 sm:$0xff]  }
 0xa44   : > { %4614 = vmatpush1.bf16.msra.mxu0 %v9043_v22  ;;  %v9097_v22 = vld [vmem:[#allocation12 + $0x80] ss:$16 sps:$4 sm:$0xff]  }
 0xa45   : > { %4615 = vmatprep.subr.bf16.mxu0 %v9048_v23  ;;  %v9100_v23 = vld [vmem:[#allocation12 + $0x88] ss:$16 sps:$4 sm:$0xff]  }
 0xa48   : > { %4616 = vmatpush1.bf16.msra.mxu0 %v9046_v24  ;;  %v9105_v24 = vld [vmem:[#allocation12 + $0x64] ss:$16 sps:$4 sm:$0xff]  }
 0xa49   : > { %4617 = vmatprep.subr.bf16.mxu0 %v9051_v27  ;;  %v9108_v27 = vld [vmem:[#allocation12 + $0x6c] ss:$16 sps:$4 sm:$0xff]  }
 0xa4c   : > { %4618 = vmatpush1.bf16.msra.mxu0 %v9049_v30  ;;  %v9103_v30 = vld [vmem:[#allocation12 + $0x60] ss:$16 sps:$4 sm:$0xff]  }
 0xa4d   : > { %4619 = vmatprep.subr.bf16.mxu0 %v9054_v20  ;;  %v9106_v20 = vld [vmem:[#allocation12 + $0x68] ss:$16 sps:$4 sm:$0xff]  }
 0xa50   : > { %4620 = vmatpush2.bf16.msra.mxu0 %v9052_v28  ;;  %v9111_v28 = vld [vmem:[#allocation12 + $0x44] ss:$16 sps:$4 sm:$0xff]  }
 0xa51   : > { %4621 = vmatprep.subr.bf16.mxu0 %v9057_v21  ;;  %v9114_v21 = vld [vmem:[#allocation12 + $0x4c] ss:$16 sps:$4 sm:$0xff]  }
 0xa54   : > { %4622 = vmatpush2.bf16.msra.mxu0 %v9055_v13  ;;  %v9109_v13 = vld [vmem:[#allocation12 + $0x40] ss:$16 sps:$4 sm:$0xff]  }
 0xa55   : > { %4623 = vmatprep.subr.bf16.mxu0 %v9060_v45  ;;  %v9112_v45 = vld [vmem:[#allocation12 + $0x48] ss:$16 sps:$4 sm:$0xff]  }
 0xa58   : > { %4624 = vmatpush2.bf16.msra.mxu0 %v9058_v34  ;;  %v9117_v34 = vld [vmem:[#allocation12 + $0x24] ss:$16 sps:$4 sm:$0xff]  }
 0xa59   : > { %4625 = vmatprep.subr.bf16.mxu0 %v9063_v35  ;;  %v9120_v35 = vld [vmem:[#allocation12 + $0x2c] ss:$16 sps:$4 sm:$0xff]  }
 0xa5c   : > { %4626 = vmatpush2.bf16.msra.mxu0 %v9061_v36  ;;  %v9115_v36 = vld [vmem:[#allocation12 + $0x20] ss:$16 sps:$4 sm:$0xff]  }
 0xa5d   : > { %4627 = vmatprep.subr.bf16.mxu0 %v9066_v37  ;;  %v9118_v37 = vld [vmem:[#allocation12 + $0x28] ss:$16 sps:$4 sm:$0xff]  }
 0xa60   : > { %4628 = vmatpush2.bf16.msra.mxu0 %v9064_v38  ;;  %v9123_v38 = vld [vmem:[#allocation12 + $0x4] ss:$16 sps:$4 sm:$0xff]  }
 0xa61   : > { %4629 = vmatprep.subr.bf16.mxu0 %v9069_v40  ;;  %v9121_v40 = vld [vmem:[#allocation12] ss:$16 sps:$4 sm:$0xff]  }
 0xa64   : > { %4630 = vmatpush2.bf16.msra.mxu0 %v9067_v39  ;;  %v9126_v39 = vld [vmem:[#allocation12 + $0xc] ss:$16 sps:$4 sm:$0xff]  }
 0xa65   : > { %4631 = vmatprep.subr.bf16.mxu0 %v9072_v42  ;;  %v9129_v42 = vld [vmem:[#allocation12 + $0x1e4] ss:$16 sps:$4 sm:$0xff]  }
 0xa68   : > { %4632 = vmatpush2.bf16.msra.mxu0 %v9070_v41  ;;  %v9124_v41 = vld [vmem:[#allocation12 + $0x8] ss:$16 sps:$4 sm:$0xff]  }
 0xa69   : > { %4633 = vmatprep.subr.bf16.mxu0 %v9075_v43  ;;  %v9132_v43 = vld [vmem:[#allocation12 + $0x1ec] ss:$16 sps:$4 sm:$0xff]  }
 0xa6c   : > { %4634 = vmatpush2.bf16.msra.mxu0 %v9073_v44  ;;  %v9127_v44 = vld [vmem:[#allocation12 + $0x1e0] ss:$16 sps:$4 sm:$0xff]  }
 0xa6d   : > { %5132 = vmatprep.subr.bf16.mxu0 %v9084_v32  ;;  %v9153_v32 = vld [vmem:[#allocation12 + $0x164] ss:$16 sps:$4 sm:$0xff]  }
 0xaef   : > { %v4328_v46 = vpop.f32.mrf.mxu0 }
 0xaf0   : > { %v8001_v48 = vpack.c.bf16 %v4328_v46, %v4328_v46  ;;  %v9130_v46 = vld [vmem:[#allocation12 + $0x1e8] ss:$16 sps:$4 sm:$0xff]  }
 0xaf1   : > { %v8209_v49 = vpop.f32.mrf.mxu0 }
 0xaf2   : > { %4391 = vrot.lane.b32.xlu0 %v8001_v48, %s9776_s18 }
 0xaf3   : > { %v4331_v52 = vpop.f32.mrf.mxu0  ;;  %v4377_v63 = vpop.f32.mrf.mxu1 }
 0xaf4   : > { %v8002_v26 = vpack.c.bf16 %v4377_v63, %v4377_v63 }
 0xaf5   : > { %v8210_v55 = vpop.f32.mrf.mxu0  ;;  %v8215_v17 = vpop.f32.mrf.mxu1 }
 0xaf6   : > { %4393 = vrot.lane.b32.xlu1 %v8002_v26, %s9776_s18 }
 0xaf7   : > { %v4380_v57 = vpop.f32.mrf.mxu1 }
 0xaf9   : > { %v8216_v59 = vpop.f32.mrf.mxu1 }
 0xb64   : > { %v4392_v62 = vpop.permute.xlu0 %4391 }
 0xb65   : > { %4397 = vst.msk [vmem:[#allocation2 + $0x4] sm:$0xf] %vm3936_vm5, %v4392_v62 }
 0xb68   : > { %v4394_v6 = vpop.permute.xlu1 %4393 }
 0xb69   : > { %4398 = vst.msk [vmem:[#allocation2 + $0xc] sm:$0xf] %vm3936_vm5, %v4394_v6 }
 0xb70   : > { %v9078_v25 = vld [vmem:[#allocation2 + $0x4] ss:$8 sps:$4 sm:$0xff]  }
 0xb71   : > { %4635 = vmatprep.mubr.bf16.mxu0 %v9078_v25 }
 0xb72   : > { %4636 = vmatmul.mubr.bf16.vlgmr.msra.gmra.mxu0 %v9076_v33 }
 0xc32   : > { %v4637_v0 = vpop.f32.mrf.mxu0 }
 0xc33   : > { %v10309_v2 = vadd.f32 %v4637_v0, %v10149_v50  ;;  %v9079_v50 = vld [vmem:[#allocation12 + $0xe0] ss:$16 sps:$4 sm:$0xff]  }
 0xc34   : > { %v4639_v1 = vpop.f32.mrf.mxu0  ;;  %5090 = vmatpush1.bf16.msra.mxu1 %v9079_v50  ;;  %v9145_v50 = vld [vmem:[#allocation12 + $0x180] ss:$16 sps:$4 sm:$0xff]  }
 0xc35   : > { %v10312_v3 = vadd.f32 %v4639_v1, %v10151_v51  ;;  %v9082_v51 = vld [vmem:[#allocation12 + $0xe8] ss:$16 sps:$4 sm:$0xff]   ;;  %5091 = vmatprep.subr.bf16.mxu1 %v9087_v11  ;;  %v9135_v1 = vld [vmem:[#allocation12 + $0x1c4] ss:$16 sps:$4 sm:$0xff]   ;;  %v9156_v11 = vld [vmem:[#allocation12 + $0x16c] ss:$16 sps:$4 sm:$0xff]  }
 0xc36   : > { %v4641_v4 = vpop.f32.mrf.mxu0  ;;  %5133 = vmatpush1.bf16.msra.mxu0 %v9082_v51  ;;  %v9150_v51 = vld [vmem:[#allocation12 + $0x18c] ss:$16 sps:$4 sm:$0xff]  }
 0xc37   : > { %v4646_v5 = vadd.f32 %v10312_v3, %v10309_v2  ;;  %v10317_v9 = vadd.f32 %v4641_v4, %v10157_v60  ;;  %v9088_v60 = vld [vmem:[#allocation12 + $0xc8] ss:$16 sps:$4 sm:$0xff]   ;;  %5134 = vmatprep.subr.bf16.mxu0 %v9090_v58  ;;  %v9151_v58 = vld [vmem:[#allocation12 + $0x160] ss:$16 sps:$4 sm:$0xff]  }
 0xc38   : > { %v4643_v8 = vpop.f32.mrf.mxu0  ;;  %5092 = vmatpush1.bf16.msra.mxu1 %v9085_v7  ;;  %v9136_v4 = vld [vmem:[#allocation12 + $0x1c8] ss:$16 sps:$4 sm:$0xff]  }
 0xc39   : > { %v10320_v10 = vadd.f32 %v4643_v8, %v10159_v61  ;;  %4647 = vadd.xlane.f32.xlu0 %v4646_v5  ;;  %v9093_v61 = vld [vmem:[#allocation12 + $0xa4] ss:$16 sps:$4 sm:$0xff]   ;;  %v9144_v8 = vld [vmem:[#allocation12 + $0x1ac] ss:$16 sps:$4 sm:$0xff]   ;;  %v9154_v7 = vld [vmem:[#allocation12 + $0x168] ss:$16 sps:$4 sm:$0xff]  }
 0xc3a   : > { %5135 = vmatpush1.bf16.msra.mxu0 %v9088_v60  ;;  %5093 = vmatprep.subr.bf16.mxu1 %v9093_v61  ;;  %v9141_v5 = vld [vmem:[#allocation12 + $0x1a4] ss:$16 sps:$4 sm:$0xff]   ;;  %v9162_v61 = vld [vmem:[#allocation12 + $0x14c] ss:$16 sps:$4 sm:$0xff]  }
 0xc3b   : > { %v4649_v56 = vadd.f32 %v10320_v10, %v10317_v9  ;;  %5136 = vmatprep.subr.bf16.mxu0 %v9096_v53  ;;  %v9159_v60 = vld [vmem:[#allocation12 + $0x144] ss:$16 sps:$4 sm:$0xff]   ;;  %v9157_v53 = vld [vmem:[#allocation12 + $0x140] ss:$16 sps:$4 sm:$0xff]  }
 0xc3c   : > { %5094 = vmatpush1.bf16.msra.mxu1 %v9091_v14  ;;  %v9160_v14 = vld [vmem:[#allocation12 + $0x148] ss:$16 sps:$4 sm:$0xff]  }
 0xc3d   : > { %4650 = vadd.xlane.f32.xlu1 %v4649_v56  ;;  %5095 = vmatprep.subr.bf16.mxu1 %v9099_v18  ;;  %v9147_v56 = vld [vmem:[#allocation12 + $0x184] ss:$16 sps:$4 sm:$0xff]   ;;  %v9168_v18 = vld [vmem:[#allocation12 + $0x12c] ss:$16 sps:$4 sm:$0xff]  }
 0xc3e   : > { %5137 = vmatpush1.bf16.msra.mxu0 %v9094_v54  ;;  %v9165_v54 = vld [vmem:[#allocation12 + $0x124] ss:$16 sps:$4 sm:$0xff]  }
 0xc3f   : > { %5138 = vmatprep.subr.bf16.mxu0 %v9102_v19  ;;  %v9163_v19 = vld [vmem:[#allocation12 + $0x120] ss:$16 sps:$4 sm:$0xff]  }
 0xc40   : > { %5096 = vmatpush1.bf16.msra.mxu1 %v9097_v22  ;;  %v9166_v22 = vld [vmem:[#allocation12 + $0x128] ss:$16 sps:$4 sm:$0xff]  }
 0xc41   : > { %5097 = vmatprep.subr.bf16.mxu1 %v9105_v24  ;;  %v9174_v24 = vld [vmem:[#allocation12 + $0x10c] ss:$16 sps:$4 sm:$0xff]  }
 0xc42   : > { %5139 = vmatpush1.bf16.msra.mxu0 %v9100_v23  ;;  %v9171_v23 = vld [vmem:[#allocation12 + $0x104] ss:$16 sps:$4 sm:$0xff]  }
 0xc43   : > { %5140 = vmatprep.subr.bf16.mxu0 %v9108_v27  ;;  %v9169_v27 = vld [vmem:[#allocation12 + $0x100] ss:$16 sps:$4 sm:$0xff]  }
 0xc44   : > { %5098 = vmatpush1.bf16.msra.mxu1 %v9103_v30  ;;  %v9172_v30 = vld [vmem:[#allocation12 + $0x108] ss:$16 sps:$4 sm:$0xff]  }
 0xc45   : > { %5099 = vmatprep.subr.bf16.mxu1 %v9111_v28  ;;  %v9180_v28 = vld [vmem:[#allocation13 + $0x174] ss:$8 sps:$4 sm:$0xff]  }
 0xc46   : > { %5141 = vmatpush1.bf16.msra.mxu0 %v9106_v20  ;;  %v9177_v20 = vld [vmem:[#allocation13 + $0x74] ss:$8 sps:$4 sm:$0xff]  }
 0xc47   : > { %5142 = vmatprep.subr.bf16.mxu0 %v9114_v21 }
 0xc48   : > { %5100 = vmatpush1.bf16.msra.mxu1 %v9109_v13 }
 0xc49   : > { %5101 = vmatprep.subr.bf16.mxu1 %v9117_v34 }
 0xc4a   : > { %5143 = vmatpush1.bf16.msra.mxu0 %v9112_v45 }
 0xc4b   : > { %5144 = vmatprep.subr.bf16.mxu0 %v9120_v35 }
 0xc4c   : > { %5102 = vmatpush1.bf16.msra.mxu1 %v9115_v36 }
 0xc4d   : > { %5103 = vmatprep.subr.bf16.mxu1 %v9123_v38 }
 0xc4e   : > { %5145 = vmatpush1.bf16.msra.mxu0 %v9118_v37  ;;  %v4679_v37 = vlaneseq }
 0xc4f   : > { %5146 = vmatprep.subr.bf16.mxu0 %v9126_v39 }
 0xc50   : > { %5104 = vmatpush1.bf16.msra.mxu1 %v9121_v40  ;;  %v10344_v38 = vshrl.u32 %v4679_v37, 7  ;;  %v10350_v40 = vld [vmem:[%s10700_s13 + $0x8] sm:$0x7f] }
 0xc51   : > { %5105 = vmatprep.subr.bf16.mxu1 %v9129_v42  ;;  %v9226_v37 = vld [vmem:[#allocation13 + $0x1f0] ss:$8 sps:$4 sm:$0xff]  }
 0xc52   : > { %5147 = vmatpush1.bf16.msra.mxu0 %v9124_v41  ;;  %v4681_v39 = vsub.s32 0, %v10344_v38  ;;  %v10355_v41 = vld [vmem:[%s10700_s13] sm:$0x7f] }
 0xc53   : > { %5148 = vmatprep.subr.bf16.mxu0 %v9132_v43  ;;  %v4693_v43 = vsub.s32 1, %v10344_v38 }
 0xc54   : > { %5106 = vmatpush2.bf16.msra.mxu1 %v9127_v44 }
 0xc55   : > { %5107 = vmatprep.subr.bf16.mxu1 %v9135_v1 }
 0xc56   : > { %5149 = vmatpush2.bf16.msra.mxu0 %v9130_v46  ;;  %v4686_v46 = vrot.slane %v10350_v40, %v4681_v39 }
 0xcc2   : > { %v4648_v48 = vpop.xlane.xlu0 %4647 }
 0xcc3   : > { %v4653_v49 = vmul.f32 0.00390625, %v4648_v48 }
 0xcc5   : > { %v10325_v52 = vsub.f32 %v10309_v2, %v4653_v49  ;;  %v10328_v63 = vsub.f32 %v10312_v3, %v4653_v49  ;;  %v9138_v2 = vld [vmem:[#allocation12 + $0x1cc] ss:$16 sps:$4 sm:$0xff]   ;;  %v9133_v3 = vld [vmem:[#allocation12 + $0x1c0] ss:$16 sps:$4 sm:$0xff]   ;;  %v4682_v49 = vrot.slane %v10355_v41, %v4681_v39 }
 0xcc6   : > { %v4651_v26 = vpop.xlane.xlu1 %4650  ;;  %5150 = vmatprep.subr.bf16.mxu0 %v9138_v2  ;;  %5108 = vmatpush2.bf16.msra.mxu1 %v9133_v3  ;;  %v9231_v39 = vld [vmem:[#allocation13 + $0xe4] ss:$8 sps:$4 sm:$0xff]  }
 0xcc7   : > { %v4654_v55 = vmul.f32 0.00390625, %v4651_v26  ;;  %v4659_v17 = vmul.f32 %v10325_v52, %v10325_v52  ;;  %v4660_v57 = vmul.f32 %v10328_v63, %v10328_v63  ;;  %5151 = vmatpush2.bf16.msra.mxu0 %v9136_v4  ;;  %5109 = vmatprep.subr.bf16.mxu1 %v9141_v5  ;;  %v9175_v5 = vld [vmem:[#allocation13 + $0x70] ss:$8 sps:$4 sm:$0xff]  }
 0xcc8   : > { %5152 = vmatprep.subr.bf16.mxu0 %v9144_v8  ;;  %v9178_v8 = vld [vmem:[#allocation13 + $0x170] ss:$8 sps:$4 sm:$0xff]  }
 0xcc9   : > { %v10335_v59 = vsub.f32 %v10317_v9, %v4654_v55  ;;  %v10338_v62 = vsub.f32 %v10320_v10, %v4654_v55  ;;  %v4663_v6 = vadd.f32 %v4660_v57, %v4659_v17  ;;  %v9139_v9 = vld [vmem:[#allocation12 + $0x1a0] ss:$16 sps:$4 sm:$0xff]   ;;  %v9142_v10 = vld [vmem:[#allocation12 + $0x1a8] ss:$16 sps:$4 sm:$0xff]   ;;  %v4698_v55 = vrot.slane %v10350_v40, %v4693_v43 }
 0xcca   : > { %5110 = vmatpush2.bf16.msra.mxu1 %v9139_v9  ;;  %v4694_v17 = vrot.slane %v10355_v41, %v4693_v43  ;;  %v9186_v9 = vld [vmem:[#allocation13 + $0x164] ss:$8 sps:$4 sm:$0xff]   ;;  %v9229_v43 = vld [vmem:[#allocation13 + $0xe0] ss:$8 sps:$4 sm:$0xff]  }
 0xccb   : > { %4664 = vadd.xlane.f32.xlu0 %v4663_v6  ;;  %v4661_v33 = vmul.f32 %v10335_v59, %v10335_v59  ;;  %v4662_v25 = vmul.f32 %v10338_v62, %v10338_v62  ;;  %5153 = vmatpush2.bf16.msra.mxu0 %v9142_v10  ;;  %v9181_v10 = vld [vmem:[#allocation13 + $0x60] ss:$8 sps:$4 sm:$0xff]  }
 0xccc   : > { %5111 = vmatprep.subr.bf16.mxu1 %v9147_v56  ;;  %5154 = vmatprep.subr.bf16.mxu0 %v9150_v51  ;;  %v9184_v56 = vld [vmem:[#allocation13 + $0x160] ss:$8 sps:$4 sm:$0xff]   ;;  %v9187_v51 = vld [vmem:[#allocation13 + $0x50] ss:$8 sps:$4 sm:$0xff]  }
 0xccd   : > { %v4666_v0 = vadd.f32 %v4662_v25, %v4661_v33 }
 0xcce   : > { %5112 = vmatpush2.bf16.msra.mxu1 %v9145_v50  ;;  %v9189_v50 = vld [vmem:[#allocation13 + $0x54] ss:$8 sps:$4 sm:$0xff]  }
 0xccf   : > { %4667 = vadd.xlane.f32.xlu0 %v4666_v0  ;;  %5155 = vmatpush2.bf16.msra.mxu0 %v9148_v15  ;;  %v9192_v15 = vld [vmem:[#allocation13 + $0x154] ss:$8 sps:$4 sm:$0xff]  }
 0xcd0   : > { %5113 = vmatprep.subr.bf16.mxu1 %v9153_v32  ;;  %5156 = vmatprep.subr.bf16.mxu0 %v9156_v11  ;;  %v9190_v32 = vld [vmem:[#allocation13 + $0x150] ss:$8 sps:$4 sm:$0xff]   ;;  %v9195_v11 = vld [vmem:[#allocation13 + $0x44] ss:$8 sps:$4 sm:$0xff]  }
 0xcd2   : > { %5114 = vmatpush2.bf16.msra.mxu1 %v9151_v58  ;;  %v9198_v58 = vld [vmem:[#allocation13 + $0x144] ss:$8 sps:$4 sm:$0xff]  }
 0xcd3   : > { %5157 = vmatpush2.bf16.msra.mxu0 %v9154_v7  ;;  %5115 = vmatprep.subr.bf16.mxu1 %v9159_v60  ;;  %v9193_v7 = vld [vmem:[#allocation13 + $0x40] ss:$8 sps:$4 sm:$0xff]  }
 0xcd4   : > { %5158 = vmatprep.subr.bf16.mxu0 %v9162_v61  ;;  %v9196_v60 = vld [vmem:[#allocation13 + $0x140] ss:$8 sps:$4 sm:$0xff]   ;;  %v9201_v61 = vld [vmem:[#allocation13 + $0x34] ss:$8 sps:$4 sm:$0xff]  }
 0xcd6   : > { %5116 = vmatpush2.bf16.msra.mxu1 %v9157_v53  ;;  %v9204_v53 = vld [vmem:[#allocation13 + $0x134] ss:$8 sps:$4 sm:$0xff]  }
 0xcd7   : > { %5159 = vmatpush2.bf16.msra.mxu0 %v9160_v14  ;;  %5117 = vmatprep.subr.bf16.mxu1 %v9165_v54  ;;  %v9199_v14 = vld [vmem:[#allocation13 + $0x30] ss:$8 sps:$4 sm:$0xff]  }
 0xcd8   : > { %5160 = vmatprep.subr.bf16.mxu0 %v9168_v18  ;;  %v9202_v54 = vld [vmem:[#allocation13 + $0x130] ss:$8 sps:$4 sm:$0xff]   ;;  %v9207_v18 = vld [vmem:[#allocation13 + $0x24] ss:$8 sps:$4 sm:$0xff]  }
 0xcda   : > { %5118 = vmatpush2.bf16.msra.mxu1 %v9163_v19  ;;  %v9210_v19 = vld [vmem:[#allocation13 + $0x124] ss:$8 sps:$4 sm:$0xff]  }
 0xcdb   : > { %5161 = vmatpush2.bf16.msra.mxu0 %v9166_v22  ;;  %5119 = vmatprep.subr.bf16.mxu1 %v9171_v23  ;;  %v9205_v22 = vld [vmem:[#allocation13 + $0x20] ss:$8 sps:$4 sm:$0xff]  }
 0xcdc   : > { %5162 = vmatprep.subr.bf16.mxu0 %v9174_v24  ;;  %v9208_v23 = vld [vmem:[#allocation13 + $0x120] ss:$8 sps:$4 sm:$0xff]   ;;  %v9213_v24 = vld [vmem:[#allocation13 + $0x14] ss:$8 sps:$4 sm:$0xff]  }
 0xcde   : > { %5120 = vmatpush2.bf16.msra.mxu1 %v9169_v27  ;;  %v9216_v27 = vld [vmem:[#allocation13 + $0x114] ss:$8 sps:$4 sm:$0xff]  }
 0xcdf   : > { %5163 = vmatpush2.bf16.msra.mxu0 %v9172_v30  ;;  %5571 = vmatprep.subr.bf16.mxu1 %v9177_v20  ;;  %v9211_v30 = vld [vmem:[#allocation13 + $0x10] ss:$8 sps:$4 sm:$0xff]  }
 0xce0   : > { %5614 = vmatprep.subr.bf16.mxu0 %v9180_v28  ;;  %v9214_v20 = vld [vmem:[#allocation13 + $0x110] ss:$8 sps:$4 sm:$0xff]   ;;  %v9219_v28 = vld [vmem:[#allocation13 + $0x4] ss:$8 sps:$4 sm:$0xff]  }
 0xd54   : > { %v4665_v21 = vpop.xlane.xlu0 %4664 }
 0xd55   : > { %v4669_v13 = vmul.f32 0.00390625, %v4665_v21  ;;  %v9222_v21 = vld [vmem:[#allocation13 + $0x104] ss:$8 sps:$4 sm:$0xff]  }
 0xd57   : > { %v4671_v45 = vadd.f32 1e-05, %v4669_v13  ;;  %v9217_v13 = vld [vmem:[#allocation13] ss:$8 sps:$4 sm:$0xff]  }
 0xd58   : > { %v4668_v34 = vpop.xlane.xlu0 %4667 }
 0xd59   : > { %9400 = vrsqrt.f32 %v4671_v45  ;;  %v4670_v35 = vmul.f32 0.00390625, %v4668_v34  ;;  %v9220_v45 = vld [vmem:[#allocation13 + $0x100] ss:$8 sps:$4 sm:$0xff]   ;;  %v9225_v34 = vld [vmem:[#allocation13 + $0xf4] ss:$8 sps:$4 sm:$0xff]  }
 0xd5b   : > { %v4672_v36 = vadd.f32 1e-05, %v4670_v35  ;;  %v9228_v35 = vld [vmem:[#allocation13 + $0x1f4] ss:$8 sps:$4 sm:$0xff]  }
 0xd5d   : > { %9402 = vrsqrt.f32 %v4672_v36  ;;  %v9223_v36 = vld [vmem:[#allocation13 + $0xf0] ss:$8 sps:$4 sm:$0xff]  }
 0xd66   : > { %v9401_v42 = vpop.eup %9400 }
 0xd67   : > { %v4676_v44 = vmul.f32 %v9401_v42, %v10328_v63  ;;  %v4675_v48 = vmul.f32 %v9401_v42, %v10325_v52  ;;  %v9234_v42 = vld [vmem:[#allocation13 + $0x1e4] ss:$8 sps:$4 sm:$0xff]  }
 0xd69   : > { %v4688_v6 = vmul.f32 %v4686_v46, %v4676_v44  ;;  %v4687_v25 = vmul.f32 %v4682_v49, %v4675_v48  ;;  %v9232_v44 = vld [vmem:[#allocation13 + $0x1e0] ss:$8 sps:$4 sm:$0xff]   ;;  %v9240_v48 = vld [vmem:[#allocation13 + $0x1d4] ss:$8 sps:$4 sm:$0xff]  }
 0xd6a   : > { %v9403_v26 = vpop.eup %9402 }
 0xd6b   : > { %v4678_v57 = vmul.f32 %v9403_v26, %v10338_v62  ;;  %v4677_v33 = vmul.f32 %v9403_v26, %v10335_v59  ;;  %v10366_v63 = vadd.f32 %v4698_v55, %v4688_v6  ;;  %v10370_v52 = vadd.f32 %v4694_v17, %v4687_v25  ;;  %v9183_v59 = vld [vmem:[#allocation13 + $0x64] ss:$8 sps:$4 sm:$0xff]   ;;  %v9238_v26 = vld [vmem:[#allocation13 + $0x1d0] ss:$8 sps:$4 sm:$0xff]   ;;  %v9244_v6 = vld [vmem:[#allocation13 + $0x1c0] ss:$8 sps:$4 sm:$0xff]  }
 0xd6c   : > { %v9252_v25 = vld [vmem:[#allocation13 + $0x1b4] ss:$8 sps:$4 sm:$0xff]  }
 0xd6d   : > { %v4690_v0 = vmul.f32 %v4686_v46, %v4678_v57  ;;  %v4689_v1 = vmul.f32 %v4682_v49, %v4677_v33  ;;  %v9237_v46 = vld [vmem:[#allocation13 + $0xd4] ss:$8 sps:$4 sm:$0xff]   ;;  %v9235_v49 = vld [vmem:[#allocation13 + $0xd0] ss:$8 sps:$4 sm:$0xff]   ;;  %v9241_v57 = vld [vmem:[#allocation13 + $0xc0] ss:$8 sps:$4 sm:$0xff]  }
 0xd6e   : > { %v9249_v33 = vld [vmem:[#allocation13 + $0xb4] ss:$8 sps:$4 sm:$0xff]  }
 0xd6f   : > { %v10368_v2 = vadd.f32 %v4698_v55, %v4690_v0  ;;  %v10372_v3 = vadd.f32 %v4694_v17, %v4689_v1  ;;  %v9243_v55 = vld [vmem:[#allocation13 + $0xc4] ss:$8 sps:$4 sm:$0xff]   ;;  %v9247_v0 = vld [vmem:[#allocation13 + $0xb0] ss:$8 sps:$4 sm:$0xff]  }
 0xd70   : > { %v9246_v17 = vld [vmem:[#allocation13 + $0x1c4] ss:$8 sps:$4 sm:$0xff]   ;;  %v9250_v1 = vld [vmem:[#allocation13 + $0x1b0] ss:$8 sps:$4 sm:$0xff]  }
 0xd71   : > { %v4704_v4 = vpack.c.bf16 %v10368_v2, %v10366_v63  ;;  %v4703_v62 = vpack.c.bf16 %v10372_v3, %v10370_v52 }
 0xd73   : > { %5121 = vmatprep.mubr.bf16.mxu1 %v4704_v4  ;;  %5164 = vmatprep.mubr.bf16.mxu0 %v4704_v4  ;;  %v9255_v4 = vld [vmem:[#allocation13 + $0xa4] ss:$8 sps:$4 sm:$0xff]  }
 0xd74   : > { %5122 = vmatmul.mubr.bf16.vlgmr.msra.gmra.mxu1 %v4703_v62  ;;  %5165 = vmatmul.mubr.bf16.vlgmr.msra.gmra.mxu0 %v4703_v62  ;;  %v9258_v62 = vld [vmem:[#allocation13 + $0x1a4] ss:$8 sps:$4 sm:$0xff]  }
 0xd75   : > { %5572 = vmatpush1.bf16.msra.mxu1 %v9175_v5  ;;  %5615 = vmatpush1.bf16.msra.mxu0 %v9178_v8  ;;  %v9253_v5 = vld [vmem:[#allocation13 + $0xa0] ss:$8 sps:$4 sm:$0xff]  }
 0xd76   : > { %5573 = vmatprep.subr.bf16.mxu1 %v9183_v59  ;;  %5616 = vmatprep.subr.bf16.mxu0 %v9186_v9  ;;  %v9256_v8 = vld [vmem:[#allocation13 + $0x1a0] ss:$8 sps:$4 sm:$0xff]   ;;  %v9261_v59 = vld [vmem:[#allocation13 + $0x94] ss:$8 sps:$4 sm:$0xff]  }
 0xd77   : > { %v9264_v9 = vld [vmem:[#allocation13 + $0x194] ss:$8 sps:$4 sm:$0xff]  }
 0xd79   : > { %5574 = vmatpush1.bf16.msra.mxu1 %v9181_v10  ;;  %5617 = vmatpush1.bf16.msra.mxu0 %v9184_v56  ;;  %v9259_v10 = vld [vmem:[#allocation13 + $0x90] ss:$8 sps:$4 sm:$0xff]  }
 0xd7a   : > { %5575 = vmatprep.subr.bf16.mxu1 %v9189_v50  ;;  %5618 = vmatprep.subr.bf16.mxu0 %v9192_v15  ;;  %v9262_v56 = vld [vmem:[#allocation13 + $0x190] ss:$8 sps:$4 sm:$0xff]   ;;  %v9267_v50 = vld [vmem:[#allocation13 + $0x84] ss:$8 sps:$4 sm:$0xff]  }
 0xd7b   : > { %v9270_v15 = vld [vmem:[#allocation13 + $0x184] ss:$8 sps:$4 sm:$0xff]  }
 0xd7d   : > { %5576 = vmatpush1.bf16.msra.mxu1 %v9187_v51  ;;  %5619 = vmatpush1.bf16.msra.mxu0 %v9190_v32  ;;  %v9265_v51 = vld [vmem:[#allocation13 + $0x80] ss:$8 sps:$4 sm:$0xff]  }
 0xd7e   : > { %5577 = vmatprep.subr.bf16.mxu1 %v9195_v11  ;;  %5620 = vmatprep.subr.bf16.mxu0 %v9198_v58  ;;  %v9268_v32 = vld [vmem:[#allocation13 + $0x180] ss:$8 sps:$4 sm:$0xff]  }
 0xd81   : > { %5578 = vmatpush1.bf16.msra.mxu1 %v9193_v7  ;;  %5621 = vmatpush1.bf16.msra.mxu0 %v9196_v60 }
 0xd82   : > { %5579 = vmatprep.subr.bf16.mxu1 %v9201_v61  ;;  %5622 = vmatprep.subr.bf16.mxu0 %v9204_v53 }
 0xd85   : > { %5580 = vmatpush1.bf16.msra.mxu1 %v9199_v14  ;;  %5623 = vmatpush1.bf16.msra.mxu0 %v9202_v54 }
 0xd86   : > { %5581 = vmatprep.subr.bf16.mxu1 %v9207_v18  ;;  %5624 = vmatprep.subr.bf16.mxu0 %v9210_v19 }
 0xd89   : > { %5582 = vmatpush1.bf16.msra.mxu1 %v9205_v22  ;;  %5625 = vmatpush1.bf16.msra.mxu0 %v9208_v23 }
 0xd8a   : > { %5583 = vmatprep.subr.bf16.mxu1 %v9213_v24  ;;  %5626 = vmatprep.subr.bf16.mxu0 %v9216_v27 }
 0xd8d   : > { %5584 = vmatpush1.bf16.msra.mxu1 %v9211_v30  ;;  %5627 = vmatpush1.bf16.msra.mxu0 %v9214_v20 }
 0xd8e   : > { %5585 = vmatprep.subr.bf16.mxu1 %v9219_v28  ;;  %5628 = vmatprep.subr.bf16.mxu0 %v9222_v21 }
 0xd91   : > { %5586 = vmatpush1.bf16.msra.mxu1 %v9217_v13  ;;  %5629 = vmatpush1.bf16.msra.mxu0 %v9220_v45 }
 0xd92   : > { %5587 = vmatprep.subr.bf16.mxu1 %v9225_v34  ;;  %5630 = vmatprep.subr.bf16.mxu0 %v9228_v35 }
 0xd95   : > { %5588 = vmatpush2.bf16.msra.mxu1 %v9223_v36  ;;  %5631 = vmatpush2.bf16.msra.mxu0 %v9226_v37 }
 0xd96   : > { %5589 = vmatprep.subr.bf16.mxu1 %v9231_v39  ;;  %5632 = vmatprep.subr.bf16.mxu0 %v9234_v42 }
 0xd99   : > { %5590 = vmatpush2.bf16.msra.mxu1 %v9229_v43  ;;  %5633 = vmatpush2.bf16.msra.mxu0 %v9232_v44 }
 0xd9a   : > { %5591 = vmatprep.subr.bf16.mxu1 %v9237_v46  ;;  %5634 = vmatprep.subr.bf16.mxu0 %v9240_v48 }
 0xd9d   : > { %5592 = vmatpush2.bf16.msra.mxu1 %v9235_v49  ;;  %5635 = vmatpush2.bf16.msra.mxu0 %v9238_v26 }
 0xd9e   : > { %5593 = vmatprep.subr.bf16.mxu1 %v9243_v55  ;;  %5636 = vmatprep.subr.bf16.mxu0 %v9246_v17 }
 0xda1   : > { %5594 = vmatpush2.bf16.msra.mxu1 %v9241_v57  ;;  %5637 = vmatpush2.bf16.msra.mxu0 %v9244_v6 }
 0xda2   : > { %5595 = vmatprep.subr.bf16.mxu1 %v9249_v33  ;;  %5638 = vmatprep.subr.bf16.mxu0 %v9252_v25 }
 0xda5   : > { %5596 = vmatpush2.bf16.msra.mxu1 %v9247_v0  ;;  %5639 = vmatpush2.bf16.msra.mxu0 %v9250_v1  ;;  %v9271_v0 = vld [vmem:[#allocation15 + $0x70] ss:$8 sps:$4 sm:$0xff]   ;;  %v9273_v1 = vld [vmem:[#allocation15 + $0x74] ss:$8 sps:$4 sm:$0xff]  }
 0xda6   : > { %5597 = vmatprep.subr.bf16.mxu1 %v9255_v4  ;;  %5640 = vmatprep.subr.bf16.mxu0 %v9258_v62  ;;  %v9276_v4 = vld [vmem:[#allocation15 + $0x64] ss:$8 sps:$4 sm:$0xff]   ;;  %v9298_v62 = vld [vmem:[#allocation16 + $0x78] sm:$0xff]  }
 0xda9   : > { %5598 = vmatpush2.bf16.msra.mxu1 %v9253_v5  ;;  %5641 = vmatpush2.bf16.msra.mxu0 %v9256_v8  ;;  %v9277_v5 = vld [vmem:[#allocation15 + $0x50] ss:$8 sps:$4 sm:$0xff]   ;;  %v9282_v8 = vld [vmem:[#allocation15 + $0x44] ss:$8 sps:$4 sm:$0xff]  }
 0xdaa   : > { %5599 = vmatprep.subr.bf16.mxu1 %v9261_v59  ;;  %5642 = vmatprep.subr.bf16.mxu0 %v9264_v9  ;;  %v9283_v59 = vld [vmem:[#allocation15 + $0x30] ss:$8 sps:$4 sm:$0xff]   ;;  %v9288_v9 = vld [vmem:[#allocation15 + $0x24] ss:$8 sps:$4 sm:$0xff]  }
 0xdad   : > { %5600 = vmatpush2.bf16.msra.mxu1 %v9259_v10  ;;  %5643 = vmatpush2.bf16.msra.mxu0 %v9262_v56  ;;  %v9286_v10 = vld [vmem:[#allocation15 + $0x20] ss:$8 sps:$4 sm:$0xff]   ;;  %v9291_v56 = vld [vmem:[#allocation15 + $0x14] ss:$8 sps:$4 sm:$0xff]  }
 0xdae   : > { %5601 = vmatprep.subr.bf16.mxu1 %v9267_v50  ;;  %5644 = vmatprep.subr.bf16.mxu0 %v9270_v15  ;;  %v9289_v50 = vld [vmem:[#allocation15 + $0x10] ss:$8 sps:$4 sm:$0xff]   ;;  %v9294_v15 = vld [vmem:[#allocation15 + $0x4] ss:$8 sps:$4 sm:$0xff]  }
 0xdb1   : > { %5602 = vmatpush2.bf16.msra.mxu1 %v9265_v51  ;;  %5645 = vmatpush2.bf16.msra.mxu0 %v9268_v32  ;;  %v9292_v51 = vld [vmem:[#allocation15] ss:$8 sps:$4 sm:$0xff]   ;;  %v9297_v32 = vld [vmem:[#allocation15 + $0xf4] ss:$8 sps:$4 sm:$0xff]  }
 0xdb2   : > { %5911 = vmatprep.subr.bf16.mxu1 %v9273_v1  ;;  %8042 = vmatprep.subr.bf16.mxu0 %v9298_v62  ;;  %v9329_v1 = vld [vmem:[#allocation16 + $0x8] sm:$0xff]   ;;  %v9334_v62 = vld [vmem:[#allocation16] sm:$0xff]  }
 0xe34   : > { %v5123_v11 = vpop.f32.mrf.mxu1  ;;  %v5166_v58 = vpop.f32.mrf.mxu0 }
 0xe35   : > { %v5175_v30 = vmax.f32 %v5123_v11, 0.0  ;;  %v5177_v20 = vmax.f32 %v5166_v58, 0.0  ;;  %v9295_v11 = vld [vmem:[#allocation15 + $0xf0] ss:$8 sps:$4 sm:$0xff]  }
 0xe36   : > { %v5125_v7 = vpop.f32.mrf.mxu1  ;;  %v5168_v60 = vpop.f32.mrf.mxu0 }
 0xe37   : > { %v5176_v22 = vmax.f32 %v5125_v7, 0.0  ;;  %v5178_v23 = vmax.f32 %v5168_v60, 0.0 }
 0xe38   : > { %v5127_v61 = vpop.f32.mrf.mxu1  ;;  %v5170_v53 = vpop.f32.mrf.mxu0 }
 0xe39   : > { %v5179_v14 = vmax.f32 %v5127_v61, 0.0  ;;  %v5181_v54 = vmax.f32 %v5170_v53, 0.0 }
 0xe3a   : > { %v5129_v18 = vpop.f32.mrf.mxu1  ;;  %v5172_v19 = vpop.f32.mrf.mxu0 }
 0xe3b   : > { %v5180_v24 = vmax.f32 %v5129_v18, 0.0  ;;  %v5182_v27 = vmax.f32 %v5172_v19, 0.0  ;;  %v5183_v13 = vpack.c.bf16 %v5179_v14, %v5175_v30  ;;  %v5185_v45 = vpack.c.bf16 %v5181_v54, %v5177_v20  ;;  %v9299_v20 = vld [vmem:[#allocation16 + $0x38] sm:$0xff]  }
 0xe3d   : > { %v5184_v28 = vpack.c.bf16 %v5180_v24, %v5176_v22  ;;  %v5186_v21 = vpack.c.bf16 %v5182_v27, %v5178_v23 }
 0xe3f   : > { %5603 = vmatprep.mubr.bf16.mxu1 %v5184_v28  ;;  %5646 = vmatprep.mubr.bf16.mxu0 %v5186_v21  ;;  %v9302_v28 = vld [vmem:[#allocation15 + $0xe4] ss:$8 sps:$4 sm:$0xff]   ;;  %v9303_v21 = vld [vmem:[#allocation16 + $0x70] sm:$0xff]  }
 0xe40   : > { %5604 = vmatmul.mubr.bf16.vlgmr.msra.gmra.mxu1 %v5183_v13  ;;  %5647 = vmatmul.mubr.bf16.vlgmr.msra.gmra.mxu0 %v5185_v45  ;;  %v9300_v13 = vld [vmem:[#allocation15 + $0xe0] ss:$8 sps:$4 sm:$0xff]   ;;  %v9304_v45 = vld [vmem:[#allocation16 + $0x30] sm:$0xff]  }
 0xe41   : > { %5912 = vmatpush1.bf16.msra.mxu1 %v9271_v0  ;;  %8043 = vmatpush3.bf16.msra.mxu0 %v9299_v20  ;;  %v9325_v0 = vld [vmem:[#allocation15 + $0x90] ss:$8 sps:$4 sm:$0xff]  }
 0xe42   : > { %5913 = vmatprep.subr.bf16.mxu1 %v9276_v4  ;;  %8044 = vmatprep.subr.bf16.mxu0 %v9303_v21  ;;  %v9332_v4 = vld [vmem:[#allocation15 + $0x84] ss:$8 sps:$4 sm:$0xff]  }
 0xe43   : > { %v9336_v21 = vld [vmem:[%s10696_s9 + $0x38] sm:$0xff]  }
 0xe45   : > { %8045 = vmatpush3.bf16.msra.mxu0 %v9304_v45  ;;  %v9338_v45 = vld [vmem:[%s10696_s9 + $0x30] sm:$0xff]  }
 0xf00   : > { %v5605_v34 = vpop.f32.mrf.mxu1  ;;  %v5648_v35 = vpop.f32.mrf.mxu0 }
 0xf01   : > { %v5649_v36 = vadd.f32 %v5648_v35, %v5605_v34  ;;  %v9307_v34 = vld [vmem:[#allocation15 + $0xd4] ss:$8 sps:$4 sm:$0xff]   ;;  %v9308_v35 = vld [vmem:[#allocation16 + $0x68] sm:$0xff]  }
 0xf02   : > { %v5607_v37 = vpop.f32.mrf.mxu1  ;;  %v5650_v39 = vpop.f32.mrf.mxu0  ;;  %8046 = vmatprep.subr.bf16.mxu0 %v9308_v35  ;;  %v9340_v35 = vld [vmem:[%s10696_s9 + $0x28] sm:$0xff]  }
 0xf03   : > { %v5651_v42 = vadd.f32 %v5650_v39, %v5607_v37  ;;  %v5657_v46 = vadd.f32 %v5649_v36, %v10370_v52  ;;  %v9274_v52 = vld [vmem:[#allocation15 + $0x60] ss:$8 sps:$4 sm:$0xff]   ;;  %v9305_v36 = vld [vmem:[#allocation15 + $0xd0] ss:$8 sps:$4 sm:$0xff]   ;;  %v9312_v39 = vld [vmem:[#allocation15 + $0xc4] ss:$8 sps:$4 sm:$0xff]  }
 0xf04   : > { %v5609_v43 = vpop.f32.mrf.mxu1  ;;  %v5652_v44 = vpop.f32.mrf.mxu0  ;;  %5914 = vmatpush1.bf16.msra.mxu1 %v9274_v52  ;;  %v9309_v37 = vld [vmem:[#allocation16 + $0x28] sm:$0xff]   ;;  %v9333_v52 = vld [vmem:[#allocation16 + $0x40] sm:$0xff]  }
 0xf05   : > { %v5658_v48 = vadd.f32 %v5651_v42, %v10366_v63  ;;  %v5653_v49 = vadd.f32 %v5652_v44, %v5609_v43  ;;  %v9279_v63 = vld [vmem:[#allocation15 + $0x54] ss:$8 sps:$4 sm:$0xff]   ;;  %v9313_v42 = vld [vmem:[#allocation16 + $0x60] sm:$0xff]   ;;  %8047 = vmatpush3.bf16.msra.mxu0 %v9309_v37  ;;  %v9342_v37 = vld [vmem:[%s10696_s9 + $0x20] sm:$0xff]  }
 0xf06   : > { %v5611_v26 = vpop.f32.mrf.mxu1  ;;  %v5654_v55 = vpop.f32.mrf.mxu0  ;;  %5915 = vmatprep.subr.bf16.mxu1 %v9279_v63  ;;  %v9310_v43 = vld [vmem:[#allocation15 + $0xc0] ss:$8 sps:$4 sm:$0xff]   ;;  %8048 = vmatprep.subr.bf16.mxu0 %v9313_v42 }
 0xf07   : > { %v5655_v17 = vadd.f32 %v5654_v55, %v5611_v26  ;;  %v5661_v57 = vadd.f32 %v5658_v48, %v5657_v46  ;;  %v5659_v6 = vadd.f32 %v5653_v49, %v10372_v3  ;;  %v9280_v3 = vld [vmem:[#allocation15 + $0x40] ss:$8 sps:$4 sm:$0xff]   ;;  %v9315_v49 = vld [vmem:[#allocation15 + $0xb0] ss:$8 sps:$4 sm:$0xff]   ;;  %v9322_v55 = vld [vmem:[#allocation15 + $0xa4] ss:$8 sps:$4 sm:$0xff]  }
 0xf08   : > { %5916 = vmatpush1.bf16.msra.mxu1 %v9277_v5  ;;  %v9314_v44 = vld [vmem:[#allocation16 + $0x20] sm:$0xff]   ;;  %v9319_v26 = vld [vmem:[#allocation16 + $0x18] sm:$0xff]  }
 0xf09   : > { %v5660_v33 = vadd.f32 %v5655_v17, %v10368_v2  ;;  %5662 = vadd.xlane.f32.xlu0 %v5661_v57  ;;  %5917 = vmatprep.subr.bf16.mxu1 %v9282_v8  ;;  %v9285_v2 = vld [vmem:[#allocation15 + $0x34] ss:$8 sps:$4 sm:$0xff]   ;;  %v9320_v57 = vld [vmem:[#allocation15 + $0xa0] ss:$8 sps:$4 sm:$0xff]  }
 0xf0a   : > { %8049 = vmatpush3.bf16.msra.mxu0 %v9314_v44  ;;  %v9323_v17 = vld [vmem:[#allocation16 + $0x50] sm:$0xff]   ;;  %v9330_v63 = vld [vmem:[#allocation15 + $0x80] ss:$8 sps:$4 sm:$0xff]   ;;  %v9346_v44 = vld [vmem:[%s10696_s9 + $0x10] sm:$0xff]  }
 0xf0b   : > { %v5664_v25 = vadd.f32 %v5660_v33, %v5659_v6  ;;  %v9344_v42 = vld [vmem:[%s10696_s9 + $0x18] sm:$0xff]  }
 0xf0c   : > { %5918 = vmatpush1.bf16.msra.mxu1 %v9280_v3 }
 0xf0d   : > { %5665 = vadd.xlane.f32.xlu1 %v5664_v25  ;;  %5919 = vmatprep.subr.bf16.mxu1 %v9285_v2  ;;  %v9328_v25 = vld [vmem:[#allocation16 + $0x48] sm:$0xff]  }
 0xf10   : > { %5920 = vmatpush1.bf16.msra.mxu1 %v9283_v59 }
 0xf11   : > { %5921 = vmatprep.subr.bf16.mxu1 %v9288_v9 }
 0xf14   : > { %5922 = vmatpush1.bf16.msra.mxu1 %v9286_v10  ;;  %v5695_v10 = vsub.s32 2, %v10344_v38 }
 0xf15   : > { %5923 = vmatprep.subr.bf16.mxu1 %v9291_v56 }
 0xf18   : > { %5924 = vmatpush1.bf16.msra.mxu1 %v9289_v50  ;;  %v5707_v50 = vsub.s32 3, %v10344_v38 }
 0xf19   : > { %5925 = vmatprep.subr.bf16.mxu1 %v9294_v15 }
 0xf1c   : > { %5926 = vmatpush1.bf16.msra.mxu1 %v9292_v51  ;;  %v5700_v51 = vrot.slane %v10350_v40, %v5695_v10 }
 0xf1d   : > { %5927 = vmatprep.subr.bf16.mxu1 %v9297_v32 }
 0xf20   : > { %5928 = vmatpush2.bf16.msra.mxu1 %v9295_v11  ;;  %v5696_v11 = vrot.slane %v10355_v41, %v5695_v10 }
 0xf21   : > { %5929 = vmatprep.subr.bf16.mxu1 %v9302_v28 }
 0xf24   : > { %5930 = vmatpush2.bf16.msra.mxu1 %v9300_v13  ;;  %v9337_v13 = vld [vmem:[%s10696_s9 + $0x70] sm:$0xff]  }
 0xf25   : > { %5931 = vmatprep.subr.bf16.mxu1 %v9307_v34  ;;  %v9339_v34 = vld [vmem:[%s10696_s9 + $0x68] sm:$0xff]  }
 0xf28   : > { %5932 = vmatpush2.bf16.msra.mxu1 %v9305_v36  ;;  %v9341_v36 = vld [vmem:[%s10696_s9 + $0x60] sm:$0xff]  }
 0xf29   : > { %5933 = vmatprep.subr.bf16.mxu1 %v9312_v39  ;;  %v9343_v39 = vld [vmem:[%s10696_s9 + $0x58] sm:$0xff]  }
 0xf2c   : > { %5934 = vmatpush2.bf16.msra.mxu1 %v9310_v43  ;;  %v9345_v43 = vld [vmem:[%s10696_s9 + $0x50] sm:$0xff]  }
 0xf92   : > { %v5663_v58 = vpop.xlane.xlu0 %5662 }
 0xf93   : > { %v5667_v7 = vmul.f32 0.00390625, %v5663_v58 }
 0xf95   : > { %v10382_v60 = vsub.f32 %v5657_v46, %v5667_v7  ;;  %v10384_v61 = vsub.f32 %v5658_v48, %v5667_v7  ;;  %v9317_v46 = vld [vmem:[#allocation15 + $0xb4] ss:$8 sps:$4 sm:$0xff]   ;;  %v5712_v7 = vrot.slane %v10350_v40, %v5707_v50 }
 0xf96   : > { %v5666_v53 = vpop.xlane.xlu1 %5665  ;;  %v9318_v48 = vld [vmem:[#allocation16 + $0x58] sm:$0xff]   ;;  %5935 = vmatprep.subr.bf16.mxu1 %v9317_v46  ;;  %v9347_v46 = vld [vmem:[%s10696_s9 + $0x48] sm:$0xff]  }
 0xf97   : > { %v5668_v14 = vmul.f32 0.00390625, %v5666_v53  ;;  %v5673_v54 = vmul.f32 %v10382_v60, %v10382_v60  ;;  %v5674_v18 = vmul.f32 %v10384_v61, %v10384_v61  ;;  %8050 = vmatprep.subr.bf16.mxu0 %v9318_v48  ;;  %5936 = vmatpush2.bf16.msra.mxu1 %v9315_v49  ;;  %v5708_v53 = vrot.slane %v10355_v41, %v5707_v50  ;;  %v9348_v48 = vld [vmem:[%s10696_s9 + $0x8] sm:$0xff]   ;;  %v9349_v49 = vld [vmem:[%s10696_s9 + $0x40] sm:$0xff]  }
 0xf98   : > { %8051 = vmatpush3.bf16.msra.mxu0 %v9319_v26  ;;  %5937 = vmatprep.subr.bf16.mxu1 %v9322_v55  ;;  %v9350_v26 = vld [vmem:[%s10696_s9] sm:$0xff]   ;;  %v5956_v55 = vsub.s32 4, %v10344_v38 }
 0xf99   : > { %v10390_v19 = vsub.f32 %v5659_v6, %v5668_v14  ;;  %v10392_v22 = vsub.f32 %v5660_v33, %v5668_v14  ;;  %v5677_v23 = vadd.f32 %v5674_v18, %v5673_v54  ;;  %v9324_v6 = vld [vmem:[#allocation16 + $0x10] sm:$0xff]   ;;  %8052 = vmatprep.subr.bf16.mxu0 %v9323_v17 }
 0xf9a   : > { %v9327_v33 = vld [vmem:[#allocation15 + $0x94] ss:$8 sps:$4 sm:$0xff]   ;;  %v5957_v17 = vrot.slane %v10355_v41, %v5956_v55 }
 0xf9b   : > { %5678 = vadd.xlane.f32.xlu0 %v5677_v23  ;;  %v5675_v24 = vmul.f32 %v10390_v19, %v10390_v19  ;;  %v5676_v27 = vmul.f32 %v10392_v22, %v10392_v22  ;;  %5938 = vmatpush2.bf16.msra.mxu1 %v9320_v57 }
 0xf9c   : > { %8053 = vmatpush3.bf16.msra.mxu0 %v9324_v6  ;;  %5939 = vmatprep.subr.bf16.mxu1 %v9327_v33 }
 0xf9d   : > { %v5680_v30 = vadd.f32 %v5676_v27, %v5675_v24  ;;  %8054 = vmatprep.subr.bf16.mxu0 %v9328_v25  ;;  %v5961_v25 = vrot.slane %v10350_v40, %v5956_v55 }
 0xf9f   : > { %5681 = vadd.xlane.f32.xlu1 %v5680_v30  ;;  %5940 = vmatpush2.bf16.msra.mxu1 %v9325_v0 }
 0xfa0   : > { %8055 = vmatpush3.bf16.msra.mxu0 %v9329_v1  ;;  %5941 = vmatprep.subr.bf16.mxu1 %v9332_v4 }
 0xfa1   : > { %8056 = vmatprep.subr.bf16.mxu0 %v9333_v52 }
 0xfa3   : > { %5942 = vmatpush2.bf16.msra.mxu1 %v9330_v63 }
 0xfa4   : > { %8057 = vmatpush3.bf16.msra.mxu0 %v9334_v62 }
 0xfa5   : > { %8217 = vmatprep.subr.bf16.mxu0 %v9777_v16 }
0x1024   : > { %v5679_v5 = vpop.xlane.xlu0 %5678 }
0x1025   : > { %v5683_v8 = vmul.f32 0.00390625, %v5679_v5 }
0x1027   : > { %v5685_v3 = vadd.f32 1e-05, %v5683_v8 }
0x1028   : > { %v5682_v2 = vpop.xlane.xlu1 %5681 }
0x1029   : > { %9404 = vrsqrt.f32 %v5685_v3  ;;  %v5684_v59 = vmul.f32 0.00390625, %v5682_v2 }
0x102b   : > { %v5686_v9 = vadd.f32 1e-05, %v5684_v59 }
0x102d   : > { %9406 = vrsqrt.f32 %v5686_v9 }
0x1036   : > { %v9405_v56 = vpop.eup %9404 }
0x1037   : > { %v5690_v15 = vmul.f32 %v9405_v56, %v10384_v61  ;;  %v5689_v32 = vmul.f32 %v9405_v56, %v10382_v60 }
0x1039   : > { %v5702_v54 = vmul.f32 %v5700_v51, %v5690_v15  ;;  %v5701_v23 = vmul.f32 %v5696_v11, %v5689_v32 }
0x103a   : > { %v9407_v58 = vpop.eup %9406 }
0x103b   : > { %v5692_v14 = vmul.f32 %v9407_v58, %v10392_v22  ;;  %v5691_v18 = vmul.f32 %v9407_v58, %v10390_v19  ;;  %v10409_v61 = vadd.f32 %v5712_v7, %v5702_v54  ;;  %v10413_v60 = vadd.f32 %v5708_v53, %v5701_v23  ;;  %v9335_v19 = vld [vmem:[%s10696_s9 + $0x78] sm:$0xff]  }
0x103c   : > { %8064 = vmatprep.subr.bf16.mxu1 %v9335_v19 }
0x103d   : > { %v5704_v24 = vmul.f32 %v5700_v51, %v5692_v14  ;;  %v5703_v27 = vmul.f32 %v5696_v11, %v5691_v18 }
0x103f   : > { %v10411_v30 = vadd.f32 %v5712_v7, %v5704_v24  ;;  %v10415_v20 = vadd.f32 %v5708_v53, %v5703_v27 }
0x1041   : > { %v5718_v28 = vpack.c.bf16 %v10411_v30, %v10409_v61  ;;  %v5717_v22 = vpack.c.bf16 %v10415_v20, %v10413_v60 }
0x1043   : > { %5943 = vmatprep.mubr.bf16.mxu1 %v5718_v28  ;;  %6154 = vmatprep.mubr.bf16.mxu0 %v5718_v28 }
0x1044   : > { %5944 = vmatmul.mubr.bf16.vlgmr.msra.gmra.mxu1 %v5717_v22  ;;  %6155 = vmatmul.mubr.bf16.vlgmr.msra.gmra.mxu0 %v5717_v22 }
0x1045   : > { %8219 = vmatprep.mubr.msk.bf16.mxu0 %vm9778_vm1, %v9777_v16  ;;  %8065 = vmatpush3.bf16.msra.mxu1 %v9336_v21 }
0x1046   : > { %8066 = vmatprep.subr.bf16.mxu1 %v9337_v13 }
0x1049   : > { %8067 = vmatpush3.bf16.msra.mxu1 %v9338_v45 }
0x104a   : > { %8068 = vmatprep.subr.bf16.mxu1 %v9339_v34 }
0x104d   : > { %8069 = vmatpush3.bf16.msra.mxu1 %v9340_v35 }
0x104e   : > { %8070 = vmatprep.subr.bf16.mxu1 %v9341_v36 }
0x1051   : > { %8071 = vmatpush3.bf16.msra.mxu1 %v9342_v37 }
0x1052   : > { %8072 = vmatprep.subr.bf16.mxu1 %v9343_v39 }
0x1055   : > { %8073 = vmatpush3.bf16.msra.mxu1 %v9344_v42 }
0x1056   : > { %8074 = vmatprep.subr.bf16.mxu1 %v9345_v43 }
0x1059   : > { %8075 = vmatpush3.bf16.msra.mxu1 %v9346_v44 }
0x105a   : > { %8076 = vmatprep.subr.bf16.mxu1 %v9347_v46 }
0x105d   : > { %8077 = vmatpush3.bf16.msra.mxu1 %v9348_v48 }
0x105e   : > { %8078 = vmatprep.subr.bf16.mxu1 %v9349_v49 }
0x1061   : > { %8079 = vmatpush3.bf16.msra.mxu1 %v9350_v26 }
0x1062   : > { %8223 = vmatprep.subr.bf16.mxu1 %v9777_v16 }
0x1104   : > { %v5945_v57 = vpop.f32.mrf.mxu1  ;;  %v8058_v6 = vpop.f32.mrf.mxu0 }
0x1105   : > { %v5946_v33 = vadd.f32 %v5945_v57, %v10171_v12 }
0x1106   : > { %v5947_v0 = vpop.f32.mrf.mxu1  ;;  %v8059_v1 = vpop.f32.mrf.mxu0 }
0x1107   : > { %v5962_v4 = vadd.f32 %v5957_v17, %v5946_v33  ;;  %v5948_v52 = vadd.f32 %v5947_v0, %v10173_v31  ;;  %v8060_v63 = vadd.f32 %v8059_v1, %v8058_v6 }
0x1108   : > { %v5949_v62 = vpop.f32.mrf.mxu1  ;;  %v8061_v5 = vpop.f32.mrf.mxu0 }
0x1109   : > { %v7912_v8 = vmul.f32 -1.442695, %v5962_v4  ;;  %v5963_v3 = vadd.f32 %v5961_v25, %v5948_v52  ;;  %v10477_v2 = vpack.c.bf16 %v8060_v63, %v8060_v63  ;;  %v5950_v41 = vadd.f32 %v5949_v62, %v10175_v29 }
0x110a   : > { %v5951_v59 = vpop.f32.mrf.mxu1  ;;  %v8062_v9 = vpop.f32.mrf.mxu0 }
0x110b   : > { %9408 = vpow2.f32 %v7912_v8  ;;  %v7913_v12 = vmul.f32 -1.442695, %v5963_v3  ;;  %v5964_v10 = vadd.f32 %v5957_v17, %v5950_v41  ;;  %v5952_v40 = vadd.f32 %v5951_v59, %v10177_v47  ;;  %6346 = vrot.lane.b32.xlu0 %v10477_v2, %s9776_s18 }
0x110c   : > { %v8063_v31 = vadd.f32 %v8062_v9, %v8061_v5 }
0x110d   : > { %9410 = vpow2.f32 %v7913_v12  ;;  %v7914_v56 = vmul.f32 -1.442695, %v5964_v10  ;;  %v5965_v50 = vadd.f32 %v5961_v25, %v5952_v40 }
0x110e   : > { %v10483_v15 = vpack.c.bf16 %v8063_v31, %v8063_v31 }
0x110f   : > { %9412 = vpow2.f32 %v7914_v56  ;;  %v7915_v51 = vmul.f32 -1.442695, %v5965_v50 }
0x1110   : > { %6395 = vrot.lane.b32.xlu1 %v10483_v15, %s9776_s18  ;;  %s9779_s18 = smov 32  }
0x1111   : > { %9414 = vpow2.f32 %v7915_v51 }
0x1118   : > { %v9409_v29 = vpop.eup %9408 }
0x1119   : > { %v5978_v32 = vadd.f32 1.0, %v9409_v29 }
0x111a   : > { %v9411_v11 = vpop.eup %9410 }
0x111b   : > { %v5979_v58 = vadd.f32 1.0, %v9411_v11  ;;  %9416 = vrcp.f32 %v5978_v32 }
0x111c   : > { %v9413_v47 = vpop.eup %9412 }
0x111d   : > { %v5980_v7 = vadd.f32 1.0, %v9413_v47  ;;  %9418 = vrcp.f32 %v5979_v58 }
0x111e   : > { %v9415_v53 = vpop.eup %9414 }
0x111f   : > { %9420 = vrcp.f32 %v5980_v7  ;;  %v5981_v14 = vadd.f32 1.0, %v9415_v53 }
0x1121   : > { %9422 = vrcp.f32 %v5981_v14 }
0x1128   : > { %v9417_v54 = vpop.eup %9416 }
0x1129   : > { %v5990_v24 = vmul.f32 %v9417_v54, %v10413_v60 }
0x112a   : > { %v9419_v18 = vpop.eup %9418 }
0x112b   : > { %v5991_v22 = vmul.f32 %v9419_v18, %v10409_v61 }
0x112c   : > { %v9421_v23 = vpop.eup %9420 }
0x112d   : > { %v5992_v27 = vmul.f32 %v9421_v23, %v10415_v20 }
0x112e   : > { %v9423_v28 = vpop.eup %9422 }
0x112f   : > { %v5993_v19 = vmul.f32 %v9423_v28, %v10411_v30  ;;  %v6163_v21 = vpack.c.bf16 %v5992_v27, %v5990_v24 }
0x1131   : > { %v6164_v13 = vpack.c.bf16 %v5993_v19, %v5991_v22 }
0x1133   : > { %6325 = vmatprep.mubr.bf16.mxu1 %v6164_v13 }
0x1134   : > { %6326 = vmatmul.mubr.bf16.vlgmr.msra.gmra.mxu1 %v6163_v21 }
0x1135   : > { %8225 = vmatprep.mubr.msk.bf16.mxu1 %vm9778_vm1, %v9777_v16 }
0x117d   : > { %v6347_v45 = vpop.permute.xlu0 %6346 }
0x117e   : > { %v6353_v34 = vsel %vm6348_vm6, %v6347_v45, 0 }
0x117f   : > { %8218 = vmatpush3.bf16.xpose.msra.mxu0 %v6353_v34 }
0x1180   : > { %8229 = vmatprep.subr.bf16.mxu0 %v9777_v16 }
0x1182   : > { %v6396_v60 = vpop.permute.xlu1 %6395 }
0x1183   : > { %v6401_v20 = vsel %vm6348_vm6, %v6396_v60, 0 }
0x1184   : > { %8224 = vmatpush3.bf16.xpose.msra.mxu1 %v6401_v20 }
0x1185   : > { %8235 = vmatprep.subr.bf16.mxu1 %v9777_v16 }
0x1186   : > { %8220 = vmatmul.mubr.msk.bf16.vlgmr.msra.gmra.mxu0 %vm6348_vm6, %v10477_v2 }
0x1187   : > { %8231 = vmatprep.mubr.msk.bf16.mxu0 %vm9778_vm1, %v9777_v16 }
0x118b   : > { %8226 = vmatmul.mubr.msk.bf16.vlgmr.msra.gmra.mxu1 %vm6348_vm6, %v10483_v15 }
0x118c   : > { %8237 = vmatprep.mubr.msk.bf16.mxu1 %vm9778_vm1, %v9777_v16 }
0x11f4   : > { %v8080_v61 = vpop.f32.mrf.mxu1 }
0x11f6   : > { %v8081_v30 = vpop.f32.mrf.mxu1 }
0x11f7   : > { %v10505_v35 = vadd.f32 %v8081_v30, %v8080_v61 }
0x11f8   : > { %v8083_v36 = vpop.f32.mrf.mxu1 }
0x11f9   : > { %v10509_v37 = vpack.c.bf16 %v10505_v35, %v10505_v35 }
0x11fa   : > { %v8084_v39 = vpop.f32.mrf.mxu1 }
0x11fb   : > { %v10511_v42 = vadd.f32 %v8084_v39, %v8083_v36  ;;  %v6471_v43 = vsel %vm3601_vm2, %v10509_v37, 0 }
0x11fc   : > { %8230 = vmatpush3.bf16.msra.mxu0 %v6471_v43 }
0x11fd   : > { %v10517_v44 = vpack.c.bf16 %v10511_v42, %v10511_v42  ;;  %8241 = vmatprep.subr.bf16.mxu0 %v9777_v16 }
0x11ff   : > { %v6517_v46 = vsel %vm3601_vm2, %v10517_v44, 0 }
0x1200   : > { %8236 = vmatpush3.bf16.msra.mxu1 %v6517_v46 }
0x1201   : > { %8247 = vmatprep.subr.bf16.mxu1 %v9777_v16 }
0x1246   : > { %v6389_v48 = vpop.f32.mrf.mxu0 }
0x1247   : > { %v6443_v49 = vsel %vm3573_vm3, %v6389_v48, -inf }
0x1248   : > { %6444 = vmax.xlane.f32.xlu1 %v6443_v49  ;;  %v8221_v26 = vpop.f32.mrf.mxu0 }
0x124a   : > { %v6392_v55 = vpop.f32.mrf.mxu0 }
0x124b   : > { %v6437_v17 = vpop.f32.mrf.mxu1 }
0x124c   : > { %v8222_v57 = vpop.f32.mrf.mxu0  ;;  %v6446_v6 = vsel %vm3573_vm3, %v6437_v17, -inf }
0x124d   : > { %6447 = vmax.xlane.f32.xlu0 %v6446_v6  ;;  %v8227_v33 = vpop.f32.mrf.mxu1 }
0x124f   : > { %v6440_v25 = vpop.f32.mrf.mxu1 }
0x1251   : > { %v8228_v0 = vpop.f32.mrf.mxu1 }
0x1259   : > { %6616 = vrot.lane.b32.xlu1 %v10483_v15, %s9779_s18 }
0x12d1   : > { %v6445_v1 = vpop.xlane.xlu1 %6444 }
0x12d2   : > { %v6449_v4 = vsub.f32 %v6389_v48, %v6445_v1 }
0x12d4   : > { %v6451_v52 = vmul.f32 1.442695, %v6449_v4 }
0x12d5   : > { %v6617_v12 = vpop.permute.xlu1 %6616 }
0x12d6   : > { %9424 = vpow2.f32 %v6451_v52  ;;  %v6448_v63 = vpop.xlane.xlu0 %6447 }
0x12d7   : > { %v6450_v62 = vsub.f32 %v6437_v17, %v6448_v63 }
0x12d9   : > { %v6453_v5 = vmul.f32 1.442695, %v6450_v62 }
0x12db   : > { %9426 = vpow2.f32 %v6453_v5 }
0x12e3   : > { %v9425_v8 = vpop.eup %9424 }
0x12e4   : > { %v6455_v3 = vsel %vm3573_vm3, %v9425_v8, 0.0 }
0x12e5   : > { %6456 = vadd.xlane.f32.xlu0 %v6455_v3  ;;  %v9352_v3 = vld [vmem:[%s10697_s10 + $0x10] sm:$0xff]  }
0x12e8   : > { %v9427_v41 = vpop.eup %9426 }
0x12e9   : > { %v6458_v59 = vsel %vm3573_vm3, %v9427_v41, 0.0 }
0x12ea   : > { %6459 = vadd.xlane.f32.xlu1 %v6458_v59  ;;  %v9354_v59 = vld [vmem:[%s10697_s10] sm:$0xff]  }
0x12fb   : > { %6564 = vrot.lane.b32.xlu1 %v10477_v2, %s9780_s29  ;;  %6566 = vrot.lane.b32.xlu0 %v10477_v2, %s9779_s18 }
0x12ff   : > { %6614 = vrot.lane.b32.xlu1 %v10483_v15, %s9780_s29  ;;  %v6622_v15 = vsel %vm6348_vm6, %v6617_v12, 0 }
0x136e   : > { %v6457_v9 = vpop.xlane.xlu0 %6456 }
0x136f   : > { %9428 = vrcp.f32 %v6457_v9 }
0x1372   : > { %v6567_v56 = vpop.permute.xlu0 %6566 }
0x1373   : > { %v6460_v10 = vpop.xlane.xlu1 %6459  ;;  %v6572_v29 = vsel %vm6348_vm6, %v6567_v56, 0 }
0x1374   : > { %9430 = vrcp.f32 %v6460_v10 }
0x1377   : > { %v6565_v11 = vpop.permute.xlu1 %6564 }
0x137b   : > { %v6615_v58 = vpop.permute.xlu1 %6614 }
0x137c   : > { %v9429_v40 = vpop.eup %9428 }
0x137d   : > { %v6463_v31 = vmul.f32 %v9429_v40, %v9425_v8  ;;  %v9351_v8 = vld [vmem:[%s10697_s10 + $0x18] sm:$0xff]  }
0x137f   : > { %v6465_v50 = vpack.c.bf16 %v6463_v31, %v6463_v31 }
0x1381   : > { %v9431_v51 = vpop.eup %9430  ;;  %8232 = vmatmul.mubr.msk.bf16.vlgmr.msra.gmra.mxu0 %vm3573_vm3, %v6465_v50 }
0x1382   : > { %8242 = vmatpush3.bf16.xpose.msra.mxu0 %v6572_v29  ;;  %v6464_v32 = vmul.f32 %v9431_v51, %v9427_v41  ;;  %8243 = vmatprep.mubr.msk.bf16.mxu0 %vm9778_vm1, %v9777_v16  ;;  %v9353_v41 = vld [vmem:[%s10697_s10 + $0x8] sm:$0xff]  }
0x1383   : > { %8253 = vmatprep.subr.bf16.mxu0 %v9777_v16 }
0x1384   : > { %v6466_v2 = vpack.c.bf16 %v6464_v32, %v6464_v32 }
0x1386   : > { %8238 = vmatmul.mubr.msk.bf16.vlgmr.msra.gmra.mxu1 %vm3573_vm3, %v6466_v2 }
0x1387   : > { %8248 = vmatpush3.bf16.xpose.msra.mxu1 %v6622_v15  ;;  %8249 = vmatprep.mubr.msk.bf16.mxu1 %vm9778_vm1, %v9777_v16 }
0x1388   : > { %8259 = vmatprep.subr.bf16.mxu1 %v9777_v16 }
0x1389   : > { %8244 = vmatmul.mubr.msk.bf16.vlgmr.msra.gmra.mxu0 %vm6348_vm6, %v6565_v11 }
0x138a   : > { %8255 = vmatprep.mubr.msk.bf16.mxu0 %vm9778_vm1, %v9777_v16 }
0x138e   : > { %8250 = vmatmul.mubr.msk.bf16.vlgmr.msra.gmra.mxu1 %vm6348_vm6, %v6615_v58 }
0x138f   : > { %8261 = vmatprep.mubr.msk.bf16.mxu1 %vm9778_vm1, %v9777_v16 }
0x1441   : > { %v6507_v47 = vpop.f32.mrf.mxu0 }
0x1442   : > { %v6559_v7 = vpack.c.bf16 %v6507_v47, %v6507_v47 }
0x1443   : > { %v8233_v53 = vpop.f32.mrf.mxu0 }
0x1444   : > { %6562 = vst.msk [vmem:[#allocation3] sm:$0xf] %vm6561_vm7, %v6559_v7 }
0x1445   : > { %v6510_v14 = vpop.f32.mrf.mxu0 }
0x1446   : > { %v6553_v54 = vpop.f32.mrf.mxu1 }
0x1447   : > { %v6560_v18 = vpack.c.bf16 %v6553_v54, %v6553_v54  ;;  %v8234_v23 = vpop.f32.mrf.mxu0 }
0x1448   : > { %v8239_v24 = vpop.f32.mrf.mxu1 }
0x1449   : > { %6563 = vst.msk [vmem:[#allocation3 + $0x4] sm:$0xf] %vm6561_vm7, %v6560_v18  ;;  %v6608_v27 = vpop.f32.mrf.mxu0 }
0x144a   : > { %v6556_v28 = vpop.f32.mrf.mxu1  ;;  %v6664_v22 = vsel %vm3573_vm3, %v6608_v27, -inf }
0x144b   : > { %6665 = vmax.xlane.f32.xlu0 %v6664_v22  ;;  %v8245_v19 = vpop.f32.mrf.mxu0 }
0x144c   : > { %v8240_v21 = vpop.f32.mrf.mxu1 }
0x144d   : > { %v6611_v13 = vpop.f32.mrf.mxu0 }
0x144e   : > { %v6658_v45 = vpop.f32.mrf.mxu1 }
0x144f   : > { %v6667_v34 = vsel %vm3573_vm3, %v6658_v45, -inf  ;;  %v8246_v60 = vpop.f32.mrf.mxu0 }
0x1450   : > { %6668 = vmax.xlane.f32.xlu1 %v6667_v34  ;;  %v8251_v20 = vpop.f32.mrf.mxu1  ;;  %v9356_v60 = vld [vmem:[#allocation18 + $0x18] sm:$0xff]  }
0x1451   : > { %v9358_v20 = vld [vmem:[#allocation18 + $0x8] sm:$0xff]  }
0x1452   : > { %v6661_v61 = vpop.f32.mrf.mxu1 }
0x1453   : > { %v9359_v61 = vld [vmem:[#allocation18] sm:$0xff]  }
0x1454   : > { %v8252_v30 = vpop.f32.mrf.mxu1 }
0x1455   : > { %v9360_v30 = vld [vmem:[%s10699_s12 + $0x38] sm:$0xff]  }
0x1461   : > { %6736 = vrot.lane.b32.xlu1 %v10517_v44, %s9780_s29 }
0x14d4   : > { %v6666_v36 = vpop.xlane.xlu0 %6665 }
0x14d5   : > { %v6670_v39 = vsub.f32 %v6608_v27, %v6666_v36  ;;  %v9361_v36 = vld [vmem:[%s10699_s12 + $0x30] sm:$0xff]  }
0x14d7   : > { %v6672_v43 = vmul.f32 1.442695, %v6670_v39  ;;  %v9362_v39 = vld [vmem:[%s10699_s12 + $0x28] sm:$0xff]  }
0x14d9   : > { %9432 = vpow2.f32 %v6672_v43  ;;  %v6669_v46 = vpop.xlane.xlu1 %6668  ;;  %v9363_v43 = vld [vmem:[%s10699_s12 + $0x20] sm:$0xff]  }
0x14da   : > { %v6671_v48 = vsub.f32 %v6658_v45, %v6669_v46  ;;  %v9364_v46 = vld [vmem:[%s10699_s12 + $0x18] sm:$0xff]  }
0x14dc   : > { %v6674_v49 = vmul.f32 1.442695, %v6671_v48  ;;  %v9365_v48 = vld [vmem:[%s10699_s12 + $0x10] sm:$0xff]  }
0x14dd   : > { %v6737_v26 = vpop.permute.xlu1 %6736 }
0x14de   : > { %9434 = vpow2.f32 %v6674_v49  ;;  %v6742_v55 = vsel %vm3601_vm2, %v6737_v26, 0 }
0x14df   : > { %8260 = vmatpush3.bf16.msra.mxu1 %v6742_v55 }
0x14e0   : > { %8265 = vmatprep.subr.bf16.mxu1 %v9777_v16 }
0x14e6   : > { %v9433_v17 = vpop.eup %9432 }
0x14e7   : > { %v6676_v57 = vsel %vm3573_vm3, %v9433_v17, 0.0 }
0x14e8   : > { %6677 = vadd.xlane.f32.xlu0 %v6676_v57 }
0x14eb   : > { %v9435_v6 = vpop.eup %9434 }
0x14ec   : > { %v6679_v44 = vsel %vm3573_vm3, %v9435_v6, 0.0 }
0x14ed   : > { %6680 = vadd.xlane.f32.xlu0 %v6679_v44  ;;  %v6913_v44 = vsub.s32 5, %v10344_v38 }
0x1503   : > { %6688 = vrot.lane.b32.xlu0 %v10509_v37, %s9780_s29 }
0x1571   : > { %v6678_v33 = vpop.xlane.xlu0 %6677 }
0x1572   : > { %9436 = vrcp.f32 %v6678_v33 }
0x1576   : > { %v6681_v25 = vpop.xlane.xlu0 %6680 }
0x1577   : > { %9438 = vrcp.f32 %v6681_v25 }
0x157a   : > { %v6689_v0 = vpop.permute.xlu0 %6688 }
0x157b   : > { %v6694_v1 = vsel %vm3601_vm2, %v6689_v0, 0  ;;  %v9444_v0 = vld [vmem:[%s10700_s13] sm:$0x7f] }
0x157c   : > { %8254 = vmatpush3.bf16.msra.mxu0 %v6694_v1  ;;  %v6914_v1 = vrot.slane %v9444_v0, %v6913_v44 }
0x157d   : > { %8289 = vmatprep.subr.bf16.mxu0 %v9777_v16 }
0x157f   : > { %v9437_v4 = vpop.eup %9436 }
0x1580   : > { %v6684_v52 = vmul.f32 %v9437_v4, %v9433_v17  ;;  %v6919_v4 = vsub.s32 6, %v10344_v38  ;;  %v9367_v38 = vld [vmem:[%s10699_s12] sm:$0xff]  }
0x1582   : > { %v6686_v63 = vpack.c.bf16 %v6684_v52, %v6684_v52 }
0x1584   : > { %v9439_v62 = vpop.eup %9438  ;;  %8256 = vmatmul.mubr.msk.bf16.vlgmr.msra.gmra.mxu0 %vm3573_vm3, %v6686_v63 }
0x1585   : > { %v6685_v5 = vmul.f32 %v9439_v62, %v9435_v6  ;;  %8305 = vmatprep.mubr.msk.bf16.mxu0 %vm9778_vm1, %v9777_v16  ;;  %8290 = vmatpush3.bf16.msra.mxu0 %v9360_v30 }
0x1586   : > { %8291 = vmatprep.subr.bf16.mxu0 %v9777_v16 }
0x1587   : > { %v6687_v37 = vpack.c.bf16 %v6685_v5, %v6685_v5  ;;  %v6920_v5 = vrot.slane %v9444_v0, %v6919_v4 }
0x1589   : > { %8262 = vmatmul.mubr.msk.bf16.vlgmr.msra.gmra.mxu1 %vm3573_vm3, %v6687_v37  ;;  %8292 = vmatpush3.bf16.msra.mxu0 %v9361_v36 }
0x158a   : > { %8273 = vmatprep.mubr.msk.bf16.mxu1 %vm9778_vm1, %v9777_v16  ;;  %8266 = vmatpush3.bf16.msra.mxu1 %v9351_v8 }
0x158b   : > { %8267 = vmatprep.subr.bf16.mxu1 %v9777_v16  ;;  %8293 = vmatprep.subr.bf16.mxu0 %v9777_v16 }
0x158d   : > { %8294 = vmatpush3.bf16.msra.mxu0 %v9362_v39 }
0x158e   : > { %8268 = vmatpush3.bf16.msra.mxu1 %v9352_v3  ;;  %8295 = vmatprep.subr.bf16.mxu0 %v9777_v16 }
0x158f   : > { %8269 = vmatprep.subr.bf16.mxu1 %v9777_v16 }
0x1591   : > { %8296 = vmatpush3.bf16.msra.mxu0 %v9363_v43 }
0x1592   : > { %8270 = vmatpush3.bf16.msra.mxu1 %v9353_v41  ;;  %8297 = vmatprep.subr.bf16.mxu0 %v9777_v16 }
0x1593   : > { %8271 = vmatprep.subr.bf16.mxu1 %v9777_v16 }
0x1595   : > { %8298 = vmatpush3.bf16.msra.mxu0 %v9364_v46 }
0x1596   : > { %8272 = vmatpush3.bf16.msra.mxu1 %v9354_v59  ;;  %8299 = vmatprep.subr.bf16.mxu0 %v9777_v16  ;;  %v9366_v59 = vld [vmem:[%s10699_s12 + $0x8] sm:$0xff]  }
0x1597   : > { %8277 = vmatprep.subr.bf16.mxu1 %v9777_v16 }
0x1599   : > { %8300 = vmatpush3.bf16.msra.mxu0 %v9365_v48 }
0x159a   : > { %8301 = vmatprep.subr.bf16.mxu0 %v9777_v16 }
0x159d   : > { %8302 = vmatpush3.bf16.msra.mxu0 %v9366_v59 }
0x159e   : > { %8303 = vmatprep.subr.bf16.mxu0 %v9777_v16 }
0x15a1   : > { %8304 = vmatpush3.bf16.msra.mxu0 %v9367_v38 }
0x1644   : > { %v6730_v9 = vpop.f32.mrf.mxu0 }
0x1645   : > { %v8007_v12 = vpack.c.bf16 %v6730_v9, %v6730_v9 }
0x1646   : > { %v8257_v10 = vpop.f32.mrf.mxu0 }
0x1647   : > { %6792 = vrot.lane.b32.xlu1 %v8007_v12, %s9779_s18 }
0x1648   : > { %v6733_v40 = vpop.f32.mrf.mxu0 }
0x1649   : > { %v6778_v31 = vpop.f32.mrf.mxu1 }
0x164a   : > { %v8008_v56 = vpack.c.bf16 %v6778_v31, %v6778_v31  ;;  %v8258_v50 = vpop.f32.mrf.mxu0 }
0x164b   : > { %v8263_v51 = vpop.f32.mrf.mxu1 }
0x164c   : > { %6794 = vrot.lane.b32.xlu1 %v8008_v56, %s9779_s18  ;;  %s8009_s18 = sshll.u32 %s9880_s17, 8  ;;  %s9679_s17 = scalar_lea.vmem %s10639_s27, 256 }
0x164d   : > { %v6781_v29 = vpop.f32.mrf.mxu1  ;;  %s10644_s2 = scalar_lea.hbm %s10701_s14, %s8009_s18  ;;  %p9680_p3 = scmp.ne.s32.totalorder %s10639_s27, %s9679_s17 }
0x164e   : > { %p9687_p4 = scmp.lt.s32.totalorder %s9685_s28, %s9679_s17 }
0x164f   : > { %v8264_v32 = vpop.f32.mrf.mxu1  ;;  %p9681_p2 = pnand %p9680_p3, %p10749_p1 }
0x1650   : > { %p9688_p9 = por %p9687_p4, %p9686_p7 }
0x1651   : > { %p9682_p13 = pneg %p9681_p2 }
0x1653   : > { %p9689_p6 = pnand %p9688_p9, %p9682_p13 }
0x16b9   : > { %v6793_v2 = vpop.permute.xlu1 %6792 }
0x16ba   : > { %6799 = vst.msk [vmem:[#allocation3] sm:$0xf] %vm6798_vm8, %v6793_v2 }
0x16be   : > { %v6795_v15 = vpop.permute.xlu1 %6794 }
0x16bf   : > { %6800 = vst.msk [vmem:[#allocation3 + $0x4] sm:$0xf] %vm6798_vm8, %v6795_v15 }
0x16c6   : > { %v9355_v11 = vld [vmem:[#allocation3] sm:$0xff]  }
0x16c7   : > { %8274 = vmatmul.mubr.msk.bf16.vlgmr.msra.gmra.mxu1 %vm3480_vm0, %v9355_v11 }
0x16c8   : > { %8285 = vmatprep.mubr.msk.bf16.mxu1 %vm9778_vm1, %v9777_v16  ;;  %8278 = vmatpush3.bf16.msra.mxu1 %v9356_v60 }
0x16c9   : > { %8279 = vmatprep.subr.bf16.mxu1 %v9777_v16 }
0x1787   : > { %v6877_v58 = vpop.f32.mrf.mxu1 }
0x1788   : > { %v6878_v47 = vadd.f32 %v10505_v35, %v6877_v58 }
0x1789   : > { %v8275_v7 = vpop.f32.mrf.mxu1 }
0x178a   : > { %v6884_v53 = vsel %vm3480_vm0, %v6878_v47, 0.0 }
0x178b   : > { %6885 = vadd.xlane.f32.xlu0 %v6884_v53  ;;  %v6880_v14 = vpop.f32.mrf.mxu1 }
0x178c   : > { %v6881_v54 = vadd.f32 %v10511_v42, %v6880_v14  ;;  %v9357_v42 = vld [vmem:[#allocation18 + $0x10] sm:$0xff]  }
0x178d   : > { %v8276_v18 = vpop.f32.mrf.mxu1  ;;  %8280 = vmatpush3.bf16.msra.mxu1 %v9357_v42 }
0x178e   : > { %v6887_v23 = vsel %vm3480_vm0, %v6881_v54, 0.0  ;;  %8281 = vmatprep.subr.bf16.mxu1 %v9777_v16 }
0x178f   : > { %6888 = vadd.xlane.f32.xlu1 %v6887_v23 }
0x1791   : > { %8282 = vmatpush3.bf16.msra.mxu1 %v9358_v20 }
0x1792   : > { %8283 = vmatprep.subr.bf16.mxu1 %v9777_v16 }
0x1795   : > { %8284 = vmatpush3.bf16.msra.mxu1 %v9359_v61 }
0x1814   : > { %v6886_v24 = vpop.xlane.xlu0 %6885 }
0x1815   : > { %v6891_v27 = vmul.f32 0.015625, %v6886_v24 }
0x1817   : > { %v6893_v28 = vsub.f32 %v6878_v47, %v6891_v27 }
0x1818   : > { %v6889_v22 = vpop.xlane.xlu1 %6888 }
0x1819   : > { %v6892_v19 = vmul.f32 0.015625, %v6889_v22  ;;  %v6895_v21 = vmul.f32 %v6893_v28, %v6893_v28 }
0x181b   : > { %v6894_v13 = vsub.f32 %v6881_v54, %v6892_v19  ;;  %v6897_v35 = vsel %vm3480_vm0, %v6895_v21, 0.0 }
0x181c   : > { %6898 = vadd.xlane.f32.xlu0 %v6897_v35 }
0x181d   : > { %v6896_v45 = vmul.f32 %v6894_v13, %v6894_v13 }
0x181f   : > { %v6900_v34 = vsel %vm3480_vm0, %v6896_v45, 0.0 }
0x1820   : > { %6901 = vadd.xlane.f32.xlu0 %v6900_v34 }
0x18a5   : > { %v6899_v49 = vpop.xlane.xlu0 %6898 }
0x18a6   : > { %v6903_v26 = vmul.f32 0.015625, %v6899_v49 }
0x18a8   : > { %v6905_v55 = vadd.f32 1e-05, %v6903_v26 }
0x18a9   : > { %v6902_v17 = vpop.xlane.xlu0 %6901 }
0x18aa   : > { %9440 = vrsqrt.f32 %v6905_v55  ;;  %v6904_v57 = vmul.f32 0.015625, %v6902_v17 }
0x18ac   : > { %v6906_v6 = vadd.f32 1e-05, %v6904_v57 }
0x18ae   : > { %9442 = vrsqrt.f32 %v6906_v6 }
0x18b7   : > { %v9441_v33 = vpop.eup %9440 }
0x18b8   : > { %v6909_v25 = vmul.f32 %v9441_v33, %v6893_v28 }
0x18ba   : > { %v6915_v62 = vmul.f32 %v6914_v1, %v6909_v25 }
0x18bb   : > { %v9443_v52 = vpop.eup %9442 }
0x18bc   : > { %v6910_v63 = vmul.f32 %v9443_v52, %v6894_v13  ;;  %v6921_v8 = vadd.f32 %v6920_v5, %v6915_v62 }
0x18be   : > { %v6916_v37 = vmul.f32 %v6914_v1, %v6910_v63 }
0x18c0   : > { %v6922_v3 = vadd.f32 %v6920_v5, %v6916_v37 }
0x18c2   : > { %v6923_v41 = vpack.c.bf16 %v6922_v3, %v6921_v8 }
0x18c4   : > { %8286 = vmatmul.mubr.msk.bf16.vlgmr.msra.gmra.mxu1 %vm3480_vm0, %v6923_v41 }
0x1984   : > { %v6993_v9 = vpop.f32.mrf.mxu1 }
0x1985   : > { %v7000_v40 = vmax.f32 %v6993_v9, 0.0 }
0x1986   : > { %v8287_v12 = vpop.f32.mrf.mxu1 }
0x1988   : > { %v6996_v10 = vpop.f32.mrf.mxu1 }
0x1989   : > { %v7001_v31 = vmax.f32 %v6996_v10, 0.0 }
0x198a   : > { %v8288_v56 = vpop.f32.mrf.mxu1 }
0x198b   : > { %v7002_v50 = vpack.c.bf16 %v7001_v31, %v7000_v40 }
0x198d   : > { %8306 = vmatmul.mubr.bf16.vlgmr.msra.gmra.mxu0 %v7002_v50 }
0x1a4d   : > { %v7101_v51 = vpop.f32.mrf.mxu0 }
0x1a4e   : > { %v7108_v29 = vadd.f32 %v7101_v51, %v6921_v8 }
0x1a4f   : > { %v8307_v16 = vpop.f32.mrf.mxu0 }
0x1a50   : > { %7110 = vst.msk [vmem:[%s594_s21] sm:$0xff] %vm3480_vm0, %v7108_v29 }
0x1a51   : > { %v7104_v32 = vpop.f32.mrf.mxu0 }
0x1a52   : > { %v7109_v2 = vadd.f32 %v7104_v32, %v6922_v3 }
0x1a53   : > { %v8308_v15 = vpop.f32.mrf.mxu0 }
0x1a54   : > { %7111 = vst.msk [vmem:[%s594_s21 + $0x8] sm:$0xff] %vm3480_vm0, %v7109_v2 }
0x1a55   : > { %9692 = shalt.err (!%p9689_p6)
}
0x1a56   : > { %s9693_s22 = scalar_lea.hbm %s10644_s2, 256  ;;  %s9697_s4 = scalar_lea.hbm %s10701_s14, 512 }
0x1a57   : > { %p9694_p12 = scmp.ne.s32.totalorder %s10644_s2, %s9693_s22  ;;  %p9698_p5 = scmp.lt.s32.totalorder %s10644_s2, %s10701_s14 }
0x1a58   : > { %p9699_p0 = scmp.lt.s32.totalorder %s9697_s4, %s9693_s22 }
0x1a59   : > { %p9695_p8 = pnand %p9694_p12, %p10749_p1 }
0x1a5a   : > { %p9700_p10 = por %p9699_p0, %p9698_p5 }
0x1a5b   : > { %p9696_p11 = pneg %p9695_p8 }
0x1a5d   : > { %p9701_p3 = pnand %p9700_p10, %p9696_p11 }
0x1a5f   : > { %9704 = shalt.err (!%p9701_p3)
}
0x1a60   : > { %s9782_s21 = smov 128   ;;  %s9783_s18 = smov 8  }
0x1a61   : > { %8345 = dma.vmem_to_hbm [thread:$0]  (%p10749_p1), %s10639_s27, 256, %s10644_s2, %s10647_s1, %s9782_s21, %s9782_s21, %s9783_s18  }
0x1a62 PF: > { %s10750_s29 = sld [smem:[#allocation28_spill]] }
0x1a63   : > { %s10751_s16 = sld [smem:[#allocation26_spill]] }
0x1a64   : > { %s10752_s17 = sld [smem:[#allocation31_spill]] }
0x1a68   : > { %p8397_p2 = scmp.ge.s32.totalorder %s10750_s29, 2 }
0x1a69   : > { %s7141_s15 = sand.u32 1, %s10751_s16  }
0x1a6a   : > { %p10753_p13 = scmp.ne.s32.totalorder %s10752_s17, 0  ;;  %s7142_s25 = scalar_lea.sflag [#allocation6], %s7141_s15 }
0x1a6c   : > { %p8376_p7 = pnand %p8397_p2, %p10753_p13 }
0x1a6e   : > { %p8377_p4 = pneg %p8376_p7 }
0x1a70   : > { %9742 = dma.done.wait (%p8377_p4), %s7142_s25, 256  }
0x1a71   : > { %9744 = vsyncadd (%p8377_p4), %s7142_s25, 4294967040  ;;  %s10754_s16 = sld [smem:[#allocation29_spill]]  ;;  %s10757_s29 = smov %s9751_s30 }
0x1a72   : > { %s10755_s28 = sld [smem:[#allocation27_spill]] }
0x1a73   : > { %s10756_s15 = sld [smem:[#allocation30_spill]] }
0x1a77   : > { %p29_p9 = scmp.ge.s32.totalorder %s10754_s16, 4  }
0x1a78   : > { %s10758_s30 = smov %s10755_s28 }
0x1a79   :  { %31 = sbr.rel (!%p29_p9) target bundleno = 12 (0xc), region = 148 }
0x1a7e   :  { %7147 = vsyncpa [#allocation5], 1 }
0x1a7f   :  { %7149 = vsyncpa [#allocation5 + $0x1], 1 }
0x1a80   :  { %7150 = vsyncpa [#allocation8], 1 }
0x1a81   :  { %7151 = vsyncpa [#allocation11], 1 }
0x1a82   :  { %7152 = vsyncpa [#allocation14], 1 }
0x1a83   :  { %7153 = vsyncpa [#allocation17], 1 }
0x1a84   :  { %7154 = vsyncpa [#allocation6], 1 }
0x1a85   :  { %7156 = vsyncpa [#allocation6 + $0x1], 1 }

</bundles_post_ra>
